<compile_context>
chip_gen: v7x
topology: tpu7x:2x2x1
jax: 0.10.0
libtpu: 0.0.40
codegen_flags: <defaults>
</compile_context>

<pallas_src>
import jax
import jax.numpy as jnp
from jax.experimental import pallas as pl
from jax.experimental.pallas import tpu as pltpu

# ------------------------- model hyper-params (small) -------------------------
Y_DIM = 8
FP_DIM = 24
FEATURE_DIM = 256
N_STEPS = 10                 # module adds +1 internally -> 11 embedding rows
N_EMBED = N_STEPS + 1
IMG_SHAPE = (3, 32, 32)      # flattens to 3072 (required by nn.Linear(3072, feature_dim))
IN_DIM = 3 * 32 * 32
BATCH = 8
BN_EPS = 1e-5

# Row layout of the packed small-vector table (one [VEC_ROWS, 256] DMA).
(ENC_B1, ENC_BN1_W, ENC_BN1_B,
 ENC_B2, ENC_BN2_W, ENC_BN2_B,
 ENC_B3, NORM_W, NORM_B,
 LIN1_B, BN1_W, BN1_B,
 LIN2_B, BN2_W, BN2_B,
 LIN3_B, BN3_W, BN3_B,
 LIN4_B) = range(19)
VEC_ROWS = 24


# ------------------------------ Pallas kernel --------------------------------
def _softplus(z):
    return jnp.logaddexp(z, 0.0)


def _batchnorm(z, w, b):
    # BatchNorm1d, training-mode batch statistics (biased variance). Full batch is
    # resident in the kernel, so per-feature stats are exact. Two-pass form on purpose
    # (avoids E[z^2]-mean^2 cancellation).
    mean = jnp.mean(z, axis=0, keepdims=True)
    var = jnp.mean(jnp.square(z - mean), axis=0, keepdims=True)
    return (z - mean) * jax.lax.rsqrt(var + BN_EPS) * w + b


def _model_kernel(
    x_ref, yc_ref, t_ref,
    enc_w1_hbm,                      # [3072, F] bf16, memory_space=pl.ANY (stays in HBM)
    enc_w2_ref, enc_w3_ref,          # [F, F] bf16
    embed_all_ref,                   # [11, 3F] f32 (embed1|embed2|embed3)
    lin1_w_ref,                      # [Y+FP, F] f32 (tiny -> kept f32)
    lin2_w_ref, lin3_w_ref,          # [F, F] bf16
    lin4_w_ref,                      # [F, Y] f32 (tiny -> kept f32)
    vec_ref,                         # [VEC_ROWS, F] f32 packed biases / BN params
    o_ref,                           # [B, Y] f32
    w1_buf, w1_sem,                  # scratch: VMEM bf16 [3072, F] + DMA semaphore
):
    F = FEATURE_DIM
    B = x_ref.shape[0]
    bf16 = jnp.bfloat16

    # Kick off the dominant transfer first; the independent branch below runs under it.
    w1_copy = pltpu.make_async_copy(enc_w1_hbm, w1_buf, w1_sem)
    w1_copy.start()

    vecs = vec_ref[...]

    def vrow(i):                      # one packed per-feature vector as [1, F]
        return vecs[i:i + 1, :]

    # ---- branch independent of enc_w1: embedding gammas + lin1 / bn1 / softplus ----
    onehot = (t_ref[...] == jax.lax.broadcasted_iota(jnp.int32, (B, N_EMBED), 1)
              ).astype(jnp.float32)                                        # [B, 11]
    # TODO(synk): out-of-range t silently yields zero gammas (PyTorch nn.Embedding raises).
    gammas = jnp.dot(onehot, embed_all_ref[...],
                     preferred_element_type=jnp.float32)                   # [B, 3F] exact gather
    g1 = gammas[:, 0:F]
    g2 = gammas[:, F:2 * F]
    g3 = gammas[:, 2 * F:3 * F]

    y = g1 * (jnp.dot(yc_ref[...], lin1_w_ref[...],
                      preferred_element_type=jnp.float32) + vrow(LIN1_B))
    y_pre = _softplus(_batchnorm(y, vrow(BN1_W), vrow(BN1_B)))             # x_embed multiply later

    # ---- encoder chain (needs enc_w1 -> wait for the async copy now) ----
    w1_copy.wait()
    h = jnp.dot(x_ref[...].astype(bf16), w1_buf[...],
                preferred_element_type=jnp.float32) + vrow(ENC_B1)
    h = _softplus(_batchnorm(h, vrow(ENC_BN1_W), vrow(ENC_BN1_B)))
    h = jnp.dot(h.astype(bf16), enc_w2_ref[...],
                preferred_element_type=jnp.float32) + vrow(ENC_B2)
    h = _softplus(_batchnorm(h, vrow(ENC_BN2_W), vrow(ENC_BN2_B)))
    x_embed = jnp.dot(h.astype(bf16), enc_w3_ref[...],
                      preferred_element_type=jnp.float32) + vrow(ENC_B3)
    x_embed = _batchnorm(x_embed, vrow(NORM_W), vrow(NORM_B))

    # ---- conditional trunk ----
    y = x_embed * y_pre
    y = g2 * (jnp.dot(y.astype(bf16), lin2_w_ref[...],
                      preferred_element_type=jnp.float32) + vrow(LIN2_B))
    y = _softplus(_batchnorm(y, vrow(BN2_W), vrow(BN2_B)))
    y = g3 * (jnp.dot(y.astype(bf16), lin3_w_ref[...],
                      preferred_element_type=jnp.float32) + vrow(LIN3_B))
    y = _softplus(_batchnorm(y, vrow(BN3_W), vrow(BN3_B)))

    # lin4 (256 -> 8) fused into the same kernel; its bias lives in the packed table.
    o_ref[...] = (jnp.dot(y, lin4_w_ref[...], preferred_element_type=jnp.float32)
                  + vecs[LIN4_B:LIN4_B + 1, 0:Y_DIM])


# --------------------------- one-time parameter prep ---------------------------
def prepare_params(p):
    """Pack / cast the raw f32 parameter pytree once (hoisted out of the per-call path)."""
    F = FEATURE_DIM
    lin4_b_row = jnp.zeros((F,), jnp.float32).at[:Y_DIM].set(p["lin4_b"])
    rows = [p["enc_b1"], p["enc_bn1_w"], p["enc_bn1_b"],
            p["enc_b2"], p["enc_bn2_w"], p["enc_bn2_b"],
            p["enc_b3"], p["norm_w"], p["norm_b"],
            p["lin1_b"], p["bn1_w"], p["bn1_b"],
            p["lin2_b"], p["bn2_w"], p["bn2_b"],
            p["lin3_b"], p["bn3_w"], p["bn3_b"],
            lin4_b_row]
    rows += [jnp.zeros((F,), jnp.float32)] * (VEC_ROWS - len(rows))
    vecs = jnp.stack(rows, axis=0).astype(jnp.float32)

    bf16 = jnp.bfloat16
    return {
        "enc_w1": p["enc_w1"].astype(bf16),
        "enc_w2": p["enc_w2"].astype(bf16),
        "enc_w3": p["enc_w3"].astype(bf16),
        "lin2_w": p["lin2_w"].astype(bf16),
        "lin3_w": p["lin3_w"].astype(bf16),
        "lin1_w": p["lin1_w"].astype(jnp.float32),
        "lin4_w": p["lin4_w"].astype(jnp.float32),
        "embed_all": jnp.concatenate([p["embed1"], p["embed2"], p["embed3"]], axis=-1),
        "vecs": vecs,
    }


# ------------------------------- forward pass ---------------------------------
def conditional_model_forward(prep, x, y, t, fp_x):
    B = x.shape[0]
    F = FEATURE_DIM
    x_flat = x.reshape(B, -1).astype(jnp.float32)                 # torch.flatten(x, 1)
    yc = jnp.concatenate([y, fp_x], axis=-1)                      # guidance concat [B, Y+FP]
    t2 = t.astype(jnp.int32).reshape(B, 1)

    args = (x_flat, yc, t2,
            prep["enc_w1"], prep["enc_w2"], prep["enc_w3"],
            prep["embed_all"], prep["lin1_w"], prep["lin2_w"], prep["lin3_w"],
            prep["lin4_w"], prep["vecs"])

    vmem = pl.BlockSpec(memory_space=pltpu.MemorySpace.VMEM)       # whole array, VMEM-resident
    hbm = pl.BlockSpec(memory_space=pl.ANY)                        # enc_w1: DMA'd in-kernel
    in_specs = [vmem, vmem, vmem,
                hbm,
                vmem, vmem, vmem, vmem, vmem, vmem, vmem, vmem]

    flops = 2 * B * (IN_DIM * F + 2 * F * F                   # encoder
                     + N_EMBED * 3 * F                        # one-hot embedding gather
                     + (Y_DIM + FP_DIM) * F + 2 * F * F       # lin1..lin3
                     + F * Y_DIM)                             # lin4
    bytes_accessed = sum(int(a.size) * a.dtype.itemsize for a in args) + B * Y_DIM * 4
    transcendentals = 5 * B * F                               # softplus exps

    return pl.pallas_call(
        _model_kernel,
        out_shape=jax.ShapeDtypeStruct((B, Y_DIM), jnp.float32),
        in_specs=in_specs,
        out_specs=vmem,
        scratch_shapes=[pltpu.VMEM((IN_DIM, F), jnp.bfloat16),    # enc_w1 landing buffer
                        pltpu.SemaphoreType.DMA(())],
        cost_estimate=pl.CostEstimate(flops=flops,
                                      transcendentals=transcendentals,
                                      bytes_accessed=bytes_accessed),
    )(*args)


# ----------------------------- parameter setup --------------------------------
def _linear_init(key, fan_in, fan_out):
    kw, kb = jax.random.split(key)
    bound = 1.0 / jnp.sqrt(float(fan_in))
    W = jax.random.uniform(kw, (fan_in, fan_out), jnp.float32, -bound, bound)
    b = jax.random.uniform(kb, (fan_out,), jnp.float32, -bound, bound)
    return W, b


def init_params(key):
    F = FEATURE_DIM
    keys = jax.random.split(key, 16)
    p = {}
    # encoder_x = Linear(3072,F) -> BN -> Softplus -> Linear(F,F) -> BN -> Softplus -> Linear(F,F)
    p["enc_w1"], p["enc_b1"] = _linear_init(keys[0], IN_DIM, F)
    p["enc_w2"], p["enc_b2"] = _linear_init(keys[1], F, F)
    p["enc_w3"], p["enc_b3"] = _linear_init(keys[2], F, F)
    # ConditionalLinear blocks
    p["lin1_w"], p["lin1_b"] = _linear_init(keys[3], Y_DIM + FP_DIM, F)
    p["lin2_w"], p["lin2_b"] = _linear_init(keys[4], F, F)
    p["lin3_w"], p["lin3_b"] = _linear_init(keys[5], F, F)
    p["lin4_w"], p["lin4_b"] = _linear_init(keys[6], F, Y_DIM)
    # Embedding tables: .uniform_() -> U[0, 1)
    p["embed1"] = jax.random.uniform(keys[7], (N_EMBED, F), jnp.float32)
    p["embed2"] = jax.random.uniform(keys[8], (N_EMBED, F), jnp.float32)
    p["embed3"] = jax.random.uniform(keys[9], (N_EMBED, F), jnp.float32)
    # BatchNorm affine params (PyTorch default init: weight=1, bias=0)
    for name in ["enc_bn1", "enc_bn2", "norm", "bn1", "bn2", "bn3"]:
        p[name + "_w"] = jnp.ones((F,), jnp.float32)
        p[name + "_b"] = jnp.zeros((F,), jnp.float32)
    return p


# --------------------------- pure-JAX reference --------------------------------
def _bn_ref(z, w, b):
    mean = jnp.mean(z, axis=0, keepdims=True)
    var = jnp.mean(jnp.square(z - mean), axis=0, keepdims=True)
    return (z - mean) * jax.lax.rsqrt(var + BN_EPS) * w + b


def reference_forward(p, x, y, t, fp_x, *, bf16_big_weights=False):
    """f32 reference; with bf16_big_weights=True it mirrors the kernel's weight quantization."""
    B = x.shape[0]

    def big(a, w):
        if bf16_big_weights:
            return jnp.dot(a.astype(jnp.bfloat16), w.astype(jnp.bfloat16),
                           preferred_element_type=jnp.float32)
        return a @ w

    xf = x.reshape(B, -1)
    h = jnp.logaddexp(_bn_ref(big(xf, p["enc_w1"]) + p["enc_b1"],
                              p["enc_bn1_w"], p["enc_bn1_b"]), 0.0)
    h = jnp.logaddexp(_bn_ref(big(h, p["enc_w2"]) + p["enc_b2"],
                              p["enc_bn2_w"], p["enc_bn2_b"]), 0.0)
    x_embed = _bn_ref(big(h, p["enc_w3"]) + p["enc_b3"], p["norm_w"], p["norm_b"])
    yc = jnp.concatenate([y, fp_x], axis=-1)
    y1 = p["embed1"][t] * (yc @ p["lin1_w"] + p["lin1_b"])
    y1 = x_embed * jnp.logaddexp(_bn_ref(y1, p["bn1_w"], p["bn1_b"]), 0.0)
    y2 = p["embed2"][t] * (big(y1, p["lin2_w"]) + p["lin2_b"])
    y2 = jnp.logaddexp(_bn_ref(y2, p["bn2_w"], p["bn2_b"]), 0.0)
    y3 = p["embed3"][t] * (big(y2, p["lin3_w"]) + p["lin3_b"])
    y3 = jnp.logaddexp(_bn_ref(y3, p["bn3_w"], p["bn3_b"]), 0.0)
    return y3 @ p["lin4_w"] + p["lin4_b"]


# ----------------------------------- main --------------------------------------
if __name__ == "__main__":
    key = jax.random.PRNGKey(0)
    k_params, kx, ky, kt, kfp = jax.random.split(key, 5)

    params = init_params(k_params)
    prep = prepare_params(params)      # one-time packing / bf16 casting / embed concat

    x = jax.random.normal(kx, (BATCH,) + IMG_SHAPE, jnp.float32)        # NCHW image
    y = jax.random.normal(ky, (BATCH, Y_DIM), jnp.float32)              # noisy labels
    t = jax.random.randint(kt, (BATCH,), 0, N_EMBED)                    # diffusion steps
    fp_x = jax.random.normal(kfp, (BATCH, FP_DIM), jnp.float32)         # guidance features

    fwd = jax.jit(conditional_model_forward)
    out = jax.block_until_ready(fwd(prep, x, y, t, fp_x))
    assert out.shape == (BATCH, Y_DIM)

    # Implementation check: reference with identical bf16 weight quantization (tight).
    ref_bf16 = reference_forward(params, x, y, t, fp_x, bf16_big_weights=True)
    assert jnp.allclose(out, ref_bf16, rtol=2e-3, atol=2e-3), \
        "Pallas output mismatch vs bf16-matched reference"

    # Sanity bound vs the full-f32 module (bf16 weight quantization error only).
    ref_f32 = reference_forward(params, x, y, t, fp_x, bf16_big_weights=False)
    assert jnp.allclose(out, ref_f32, rtol=1e-1, atol=2e-1), \
        "Pallas output deviates too far from f32 reference"

    print("KERNEL_OK")
</pallas_src>

<mosaic_0001>
module attributes {stable_mosaic.version = 11 : i64} {
  func.func @_model_kernel(%arg0: memref<8x3072xf32, #tpu.memory_space<vmem>>, %arg1: memref<8x32xf32, #tpu.memory_space<vmem>>, %arg2: memref<8x1xi32, #tpu.memory_space<vmem>>, %arg3: memref<3072x256xbf16, #tpu.memory_space<any>>, %arg4: memref<256x256xbf16, #tpu.memory_space<vmem>>, %arg5: memref<256x256xbf16, #tpu.memory_space<vmem>>, %arg6: memref<11x768xf32, #tpu.memory_space<vmem>>, %arg7: memref<32x256xf32, #tpu.memory_space<vmem>>, %arg8: memref<256x256xbf16, #tpu.memory_space<vmem>>, %arg9: memref<256x256xbf16, #tpu.memory_space<vmem>>, %arg10: memref<256x8xf32, #tpu.memory_space<vmem>>, %arg11: memref<24x256xf32, #tpu.memory_space<vmem>>, %arg12: memref<8x8xf32, #tpu.memory_space<vmem>>, %arg13: memref<3072x256xbf16, #tpu.memory_space<vmem>>, %arg14: memref<!tpu.dma_semaphore, #tpu.memory_space<semaphore_mem>>) attributes {dimension_semantics = [], scalar_prefetch = 0 : i64, scratch_operands = 2 : i64, tpu.core_type = #tpu.core_type<tc>} {
    tpu.enqueue_dma source(%arg3 : memref<3072x256xbf16, #tpu.memory_space<any>>) target(%arg13 : memref<3072x256xbf16, #tpu.memory_space<vmem>>) target_semaphore(%arg14 : memref<!tpu.dma_semaphore, #tpu.memory_space<semaphore_mem>>)
    %c0 = arith.constant 0 : index
    %c0_0 = arith.constant 0 : index
    %0 = vector.load %arg11[%c0, %c0_0] : memref<24x256xf32, #tpu.memory_space<vmem>>, vector<24x256xf32>
    %c0_1 = arith.constant 0 : index
    %c0_2 = arith.constant 0 : index
    %1 = vector.load %arg2[%c0_1, %c0_2] : memref<8x1xi32, #tpu.memory_space<vmem>>, vector<8x1xi32>
    %2 = tpu.iota {dimensions = array<i32: 1>} : vector<8x11xi32>
    %3 = vector.broadcast %1 : vector<8x1xi32> to vector<8x11xi32>
    %4 = arith.cmpi eq, %3, %2 : vector<8x11xi32>
    %5 = arith.extui %4 : vector<8x11xi1> to vector<8x11xi32>
    %6 = arith.sitofp %5 : vector<8x11xi32> to vector<8x11xf32>
    %c0_3 = arith.constant 0 : index
    %c0_4 = arith.constant 0 : index
    %7 = vector.load %arg6[%c0_3, %c0_4] : memref<11x768xf32, #tpu.memory_space<vmem>>, vector<11x768xf32>
    %cst = arith.constant dense<0.000000e+00> : vector<8x768xf32>
    %8 = tpu.matmul %6, %7, %cst {dimension_numbers = #tpu.dot_dimension_numbers<[1], [0], [0], [1], [0, 0, 1, 1], [], []>} : vector<8x11xf32>, vector<11x768xf32>, vector<8x768xf32> -> vector<8x768xf32>
    %9 = vector.extract_strided_slice %8 {offsets = [0, 0], sizes = [8, 256], strides = [1, 1]} : vector<8x768xf32> to vector<8x256xf32>
    %10 = vector.extract_strided_slice %8 {offsets = [0, 256], sizes = [8, 256], strides = [1, 1]} : vector<8x768xf32> to vector<8x256xf32>
    %11 = vector.extract_strided_slice %8 {offsets = [0, 512], sizes = [8, 256], strides = [1, 1]} : vector<8x768xf32> to vector<8x256xf32>
    %c0_5 = arith.constant 0 : index
    %c0_6 = arith.constant 0 : index
    %12 = vector.load %arg1[%c0_5, %c0_6] : memref<8x32xf32, #tpu.memory_space<vmem>>, vector<8x32xf32>
    %c0_7 = arith.constant 0 : index
    %c0_8 = arith.constant 0 : index
    %13 = vector.load %arg7[%c0_7, %c0_8] : memref<32x256xf32, #tpu.memory_space<vmem>>, vector<32x256xf32>
    %cst_9 = arith.constant dense<0.000000e+00> : vector<8x256xf32>
    %14 = tpu.matmul %12, %13, %cst_9 {dimension_numbers = #tpu.dot_dimension_numbers<[1], [0], [0], [1], [0, 0, 1, 1], [], []>} : vector<8x32xf32>, vector<32x256xf32>, vector<8x256xf32> -> vector<8x256xf32>
    %15 = vector.extract_strided_slice %0 {offsets = [9, 0], sizes = [1, 256], strides = [1, 1]} : vector<24x256xf32> to vector<1x256xf32>
    %16 = vector.broadcast %15 : vector<1x256xf32> to vector<8x256xf32>
    %17 = arith.addf %14, %16 : vector<8x256xf32>
    %18 = arith.mulf %9, %17 : vector<8x256xf32>
    %19 = vector.extract_strided_slice %0 {offsets = [10, 0], sizes = [1, 256], strides = [1, 1]} : vector<24x256xf32> to vector<1x256xf32>
    %20 = vector.extract_strided_slice %0 {offsets = [11, 0], sizes = [1, 256], strides = [1, 1]} : vector<24x256xf32> to vector<1x256xf32>
    %cst_10 = arith.constant dense<0.000000e+00> : vector<256xf32>
    %21 = vector.multi_reduction <add>, %18, %cst_10 [0] : vector<8x256xf32> to vector<256xf32>
    %22 = vector.shape_cast %21 : vector<256xf32> to vector<1x256xf32>
    %cst_11 = arith.constant 8.000000e+00 : f32
    %23 = vector.broadcast %cst_11 : f32 to vector<1x256xf32>
    %24 = arith.divf %22, %23 : vector<1x256xf32>
    %25 = vector.broadcast %24 : vector<1x256xf32> to vector<8x256xf32>
    %26 = arith.subf %18, %25 : vector<8x256xf32>
    %27 = arith.mulf %26, %26 : vector<8x256xf32>
    %cst_12 = arith.constant dense<0.000000e+00> : vector<256xf32>
    %28 = vector.multi_reduction <add>, %27, %cst_12 [0] : vector<8x256xf32> to vector<256xf32>
    %29 = vector.shape_cast %28 : vector<256xf32> to vector<1x256xf32>
    %cst_13 = arith.constant 8.000000e+00 : f32
    %30 = vector.broadcast %cst_13 : f32 to vector<1x256xf32>
    %31 = arith.divf %29, %30 : vector<1x256xf32>
    %32 = vector.broadcast %24 : vector<1x256xf32> to vector<8x256xf32>
    %33 = arith.subf %18, %32 : vector<8x256xf32>
    %cst_14 = arith.constant 9.99999974E-6 : f32
    %34 = vector.broadcast %cst_14 : f32 to vector<1x256xf32>
    %35 = arith.addf %31, %34 : vector<1x256xf32>
    %36 = math.rsqrt %35 : vector<1x256xf32>
    %37 = vector.broadcast %36 : vector<1x256xf32> to vector<8x256xf32>
    %38 = arith.mulf %33, %37 : vector<8x256xf32>
    %39 = vector.broadcast %19 : vector<1x256xf32> to vector<8x256xf32>
    %40 = arith.mulf %38, %39 : vector<8x256xf32>
    %41 = vector.broadcast %20 : vector<1x256xf32> to vector<8x256xf32>
    %42 = arith.addf %40, %41 : vector<8x256xf32>
    %cst_15 = arith.constant 0.000000e+00 : f32
    %43 = vector.broadcast %cst_15 : f32 to vector<8x256xf32>
    %44 = arith.maximumf %42, %43 : vector<8x256xf32>
    %45 = vector.broadcast %cst_15 : f32 to vector<8x256xf32>
    %46 = arith.subf %42, %45 : vector<8x256xf32>
    %47 = arith.cmpf one, %46, %46 : vector<8x256xf32>
    %48 = vector.broadcast %cst_15 : f32 to vector<8x256xf32>
    %49 = arith.addf %42, %48 : vector<8x256xf32>
    %50 = math.absf %46 : vector<8x256xf32>
    %cst_16 = arith.constant 0.000000e+00 : f32
    %51 = vector.broadcast %cst_16 : f32 to vector<8x256xf32>
    %52 = arith.subf %51, %50 : vector<8x256xf32>
    %53 = math.exp %52 : vector<8x256xf32>
    %54 = math.log1p %53 : vector<8x256xf32>
    %55 = arith.addf %44, %54 : vector<8x256xf32>
    %56 = arith.select %47, %49, %55 : vector<8x256xi1>, vector<8x256xf32>
    tpu.wait_dma2 semaphore(%arg14 : memref<!tpu.dma_semaphore, #tpu.memory_space<semaphore_mem>>) src(%arg3 : memref<3072x256xbf16, #tpu.memory_space<any>>) dst(%arg13 : memref<3072x256xbf16, #tpu.memory_space<vmem>>)
    %c0_17 = arith.constant 0 : index
    %c0_18 = arith.constant 0 : index
    %57 = vector.load %arg0[%c0_17, %c0_18] : memref<8x3072xf32, #tpu.memory_space<vmem>>, vector<8x3072xf32>
    %58 = arith.truncf %57 : vector<8x3072xf32> to vector<8x3072xbf16>
    %c0_19 = arith.constant 0 : index
    %c0_20 = arith.constant 0 : index
    %59 = vector.load %arg13[%c0_19, %c0_20] : memref<3072x256xbf16, #tpu.memory_space<vmem>>, vector<3072x256xbf16>
    %cst_21 = arith.constant dense<0.000000e+00> : vector<8x256xf32>
    %60 = tpu.matmul %58, %59, %cst_21 {dimension_numbers = #tpu.dot_dimension_numbers<[1], [0], [0], [1], [0, 0, 1, 1], [], []>} : vector<8x3072xbf16>, vector<3072x256xbf16>, vector<8x256xf32> -> vector<8x256xf32>
    %61 = vector.extract_strided_slice %0 {offsets = [0, 0], sizes = [1, 256], strides = [1, 1]} : vector<24x256xf32> to vector<1x256xf32>
    %62 = vector.broadcast %61 : vector<1x256xf32> to vector<8x256xf32>
    %63 = arith.addf %60, %62 : vector<8x256xf32>
    %64 = vector.extract_strided_slice %0 {offsets = [1, 0], sizes = [1, 256], strides = [1, 1]} : vector<24x256xf32> to vector<1x256xf32>
    %65 = vector.extract_strided_slice %0 {offsets = [2, 0], sizes = [1, 256], strides = [1, 1]} : vector<24x256xf32> to vector<1x256xf32>
    %cst_22 = arith.constant dense<0.000000e+00> : vector<256xf32>
    %66 = vector.multi_reduction <add>, %63, %cst_22 [0] : vector<8x256xf32> to vector<256xf32>
    %67 = vector.shape_cast %66 : vector<256xf32> to vector<1x256xf32>
    %cst_23 = arith.constant 8.000000e+00 : f32
    %68 = vector.broadcast %cst_23 : f32 to vector<1x256xf32>
    %69 = arith.divf %67, %68 : vector<1x256xf32>
    %70 = vector.broadcast %69 : vector<1x256xf32> to vector<8x256xf32>
    %71 = arith.subf %63, %70 : vector<8x256xf32>
    %72 = arith.mulf %71, %71 : vector<8x256xf32>
    %cst_24 = arith.constant dense<0.000000e+00> : vector<256xf32>
    %73 = vector.multi_reduction <add>, %72, %cst_24 [0] : vector<8x256xf32> to vector<256xf32>
    %74 = vector.shape_cast %73 : vector<256xf32> to vector<1x256xf32>
    %cst_25 = arith.constant 8.000000e+00 : f32
    %75 = vector.broadcast %cst_25 : f32 to vector<1x256xf32>
    %76 = arith.divf %74, %75 : vector<1x256xf32>
    %77 = vector.broadcast %69 : vector<1x256xf32> to vector<8x256xf32>
    %78 = arith.subf %63, %77 : vector<8x256xf32>
    %cst_26 = arith.constant 9.99999974E-6 : f32
    %79 = vector.broadcast %cst_26 : f32 to vector<1x256xf32>
    %80 = arith.addf %76, %79 : vector<1x256xf32>
    %81 = math.rsqrt %80 : vector<1x256xf32>
    %82 = vector.broadcast %81 : vector<1x256xf32> to vector<8x256xf32>
    %83 = arith.mulf %78, %82 : vector<8x256xf32>
    %84 = vector.broadcast %64 : vector<1x256xf32> to vector<8x256xf32>
    %85 = arith.mulf %83, %84 : vector<8x256xf32>
    %86 = vector.broadcast %65 : vector<1x256xf32> to vector<8x256xf32>
    %87 = arith.addf %85, %86 : vector<8x256xf32>
    %cst_27 = arith.constant 0.000000e+00 : f32
    %88 = vector.broadcast %cst_27 : f32 to vector<8x256xf32>
    %89 = arith.maximumf %87, %88 : vector<8x256xf32>
    %90 = vector.broadcast %cst_27 : f32 to vector<8x256xf32>
    %91 = arith.subf %87, %90 : vector<8x256xf32>
    %92 = arith.cmpf one, %91, %91 : vector<8x256xf32>
    %93 = vector.broadcast %cst_27 : f32 to vector<8x256xf32>
    %94 = arith.addf %87, %93 : vector<8x256xf32>
    %95 = math.absf %91 : vector<8x256xf32>
    %cst_28 = arith.constant 0.000000e+00 : f32
    %96 = vector.broadcast %cst_28 : f32 to vector<8x256xf32>
    %97 = arith.subf %96, %95 : vector<8x256xf32>
    %98 = math.exp %97 : vector<8x256xf32>
    %99 = math.log1p %98 : vector<8x256xf32>
    %100 = arith.addf %89, %99 : vector<8x256xf32>
    %101 = arith.select %92, %94, %100 : vector<8x256xi1>, vector<8x256xf32>
    %102 = arith.truncf %101 : vector<8x256xf32> to vector<8x256xbf16>
    %c0_29 = arith.constant 0 : index
    %c0_30 = arith.constant 0 : index
    %103 = vector.load %arg4[%c0_29, %c0_30] : memref<256x256xbf16, #tpu.memory_space<vmem>>, vector<256x256xbf16>
    %cst_31 = arith.constant dense<0.000000e+00> : vector<8x256xf32>
    %104 = tpu.matmul %102, %103, %cst_31 {dimension_numbers = #tpu.dot_dimension_numbers<[1], [0], [0], [1], [0, 0, 1, 1], [], []>} : vector<8x256xbf16>, vector<256x256xbf16>, vector<8x256xf32> -> vector<8x256xf32>
    %105 = vector.extract_strided_slice %0 {offsets = [3, 0], sizes = [1, 256], strides = [1, 1]} : vector<24x256xf32> to vector<1x256xf32>
    %106 = vector.broadcast %105 : vector<1x256xf32> to vector<8x256xf32>
    %107 = arith.addf %104, %106 : vector<8x256xf32>
    %108 = vector.extract_strided_slice %0 {offsets = [4, 0], sizes = [1, 256], strides = [1, 1]} : vector<24x256xf32> to vector<1x256xf32>
    %109 = vector.extract_strided_slice %0 {offsets = [5, 0], sizes = [1, 256], strides = [1, 1]} : vector<24x256xf32> to vector<1x256xf32>
    %cst_32 = arith.constant dense<0.000000e+00> : vector<256xf32>
    %110 = vector.multi_reduction <add>, %107, %cst_32 [0] : vector<8x256xf32> to vector<256xf32>
    %111 = vector.shape_cast %110 : vector<256xf32> to vector<1x256xf32>
    %cst_33 = arith.constant 8.000000e+00 : f32
    %112 = vector.broadcast %cst_33 : f32 to vector<1x256xf32>
    %113 = arith.divf %111, %112 : vector<1x256xf32>
    %114 = vector.broadcast %113 : vector<1x256xf32> to vector<8x256xf32>
    %115 = arith.subf %107, %114 : vector<8x256xf32>
    %116 = arith.mulf %115, %115 : vector<8x256xf32>
    %cst_34 = arith.constant dense<0.000000e+00> : vector<256xf32>
    %117 = vector.multi_reduction <add>, %116, %cst_34 [0] : vector<8x256xf32> to vector<256xf32>
    %118 = vector.shape_cast %117 : vector<256xf32> to vector<1x256xf32>
    %cst_35 = arith.constant 8.000000e+00 : f32
    %119 = vector.broadcast %cst_35 : f32 to vector<1x256xf32>
    %120 = arith.divf %118, %119 : vector<1x256xf32>
    %121 = vector.broadcast %113 : vector<1x256xf32> to vector<8x256xf32>
    %122 = arith.subf %107, %121 : vector<8x256xf32>
    %cst_36 = arith.constant 9.99999974E-6 : f32
    %123 = vector.broadcast %cst_36 : f32 to vector<1x256xf32>
    %124 = arith.addf %120, %123 : vector<1x256xf32>
    %125 = math.rsqrt %124 : vector<1x256xf32>
    %126 = vector.broadcast %125 : vector<1x256xf32> to vector<8x256xf32>
    %127 = arith.mulf %122, %126 : vector<8x256xf32>
    %128 = vector.broadcast %108 : vector<1x256xf32> to vector<8x256xf32>
    %129 = arith.mulf %127, %128 : vector<8x256xf32>
    %130 = vector.broadcast %109 : vector<1x256xf32> to vector<8x256xf32>
    %131 = arith.addf %129, %130 : vector<8x256xf32>
    %cst_37 = arith.constant 0.000000e+00 : f32
    %132 = vector.broadcast %cst_37 : f32 to vector<8x256xf32>
    %133 = arith.maximumf %131, %132 : vector<8x256xf32>
    %134 = vector.broadcast %cst_37 : f32 to vector<8x256xf32>
    %135 = arith.subf %131, %134 : vector<8x256xf32>
    %136 = arith.cmpf one, %135, %135 : vector<8x256xf32>
    %137 = vector.broadcast %cst_37 : f32 to vector<8x256xf32>
    %138 = arith.addf %131, %137 : vector<8x256xf32>
    %139 = math.absf %135 : vector<8x256xf32>
    %cst_38 = arith.constant 0.000000e+00 : f32
    %140 = vector.broadcast %cst_38 : f32 to vector<8x256xf32>
    %141 = arith.subf %140, %139 : vector<8x256xf32>
    %142 = math.exp %141 : vector<8x256xf32>
    %143 = math.log1p %142 : vector<8x256xf32>
    %144 = arith.addf %133, %143 : vector<8x256xf32>
    %145 = arith.select %136, %138, %144 : vector<8x256xi1>, vector<8x256xf32>
    %146 = arith.truncf %145 : vector<8x256xf32> to vector<8x256xbf16>
    %c0_39 = arith.constant 0 : index
    %c0_40 = arith.constant 0 : index
    %147 = vector.load %arg5[%c0_39, %c0_40] : memref<256x256xbf16, #tpu.memory_space<vmem>>, vector<256x256xbf16>
    %cst_41 = arith.constant dense<0.000000e+00> : vector<8x256xf32>
    %148 = tpu.matmul %146, %147, %cst_41 {dimension_numbers = #tpu.dot_dimension_numbers<[1], [0], [0], [1], [0, 0, 1, 1], [], []>} : vector<8x256xbf16>, vector<256x256xbf16>, vector<8x256xf32> -> vector<8x256xf32>
    %149 = vector.extract_strided_slice %0 {offsets = [6, 0], sizes = [1, 256], strides = [1, 1]} : vector<24x256xf32> to vector<1x256xf32>
    %150 = vector.broadcast %149 : vector<1x256xf32> to vector<8x256xf32>
    %151 = arith.addf %148, %150 : vector<8x256xf32>
    %152 = vector.extract_strided_slice %0 {offsets = [7, 0], sizes = [1, 256], strides = [1, 1]} : vector<24x256xf32> to vector<1x256xf32>
    %153 = vector.extract_strided_slice %0 {offsets = [8, 0], sizes = [1, 256], strides = [1, 1]} : vector<24x256xf32> to vector<1x256xf32>
    %cst_42 = arith.constant dense<0.000000e+00> : vector<256xf32>
    %154 = vector.multi_reduction <add>, %151, %cst_42 [0] : vector<8x256xf32> to vector<256xf32>
    %155 = vector.shape_cast %154 : vector<256xf32> to vector<1x256xf32>
    %cst_43 = arith.constant 8.000000e+00 : f32
    %156 = vector.broadcast %cst_43 : f32 to vector<1x256xf32>
    %157 = arith.divf %155, %156 : vector<1x256xf32>
    %158 = vector.broadcast %157 : vector<1x256xf32> to vector<8x256xf32>
    %159 = arith.subf %151, %158 : vector<8x256xf32>
    %160 = arith.mulf %159, %159 : vector<8x256xf32>
    %cst_44 = arith.constant dense<0.000000e+00> : vector<256xf32>
    %161 = vector.multi_reduction <add>, %160, %cst_44 [0] : vector<8x256xf32> to vector<256xf32>
    %162 = vector.shape_cast %161 : vector<256xf32> to vector<1x256xf32>
    %cst_45 = arith.constant 8.000000e+00 : f32
    %163 = vector.broadcast %cst_45 : f32 to vector<1x256xf32>
    %164 = arith.divf %162, %163 : vector<1x256xf32>
    %165 = vector.broadcast %157 : vector<1x256xf32> to vector<8x256xf32>
    %166 = arith.subf %151, %165 : vector<8x256xf32>
    %cst_46 = arith.constant 9.99999974E-6 : f32
    %167 = vector.broadcast %cst_46 : f32 to vector<1x256xf32>
    %168 = arith.addf %164, %167 : vector<1x256xf32>
    %169 = math.rsqrt %168 : vector<1x256xf32>
    %170 = vector.broadcast %169 : vector<1x256xf32> to vector<8x256xf32>
    %171 = arith.mulf %166, %170 : vector<8x256xf32>
    %172 = vector.broadcast %152 : vector<1x256xf32> to vector<8x256xf32>
    %173 = arith.mulf %171, %172 : vector<8x256xf32>
    %174 = vector.broadcast %153 : vector<1x256xf32> to vector<8x256xf32>
    %175 = arith.addf %173, %174 : vector<8x256xf32>
    %176 = arith.mulf %175, %56 : vector<8x256xf32>
    %177 = arith.truncf %176 : vector<8x256xf32> to vector<8x256xbf16>
    %c0_47 = arith.constant 0 : index
    %c0_48 = arith.constant 0 : index
    %178 = vector.load %arg8[%c0_47, %c0_48] : memref<256x256xbf16, #tpu.memory_space<vmem>>, vector<256x256xbf16>
    %cst_49 = arith.constant dense<0.000000e+00> : vector<8x256xf32>
    %179 = tpu.matmul %177, %178, %cst_49 {dimension_numbers = #tpu.dot_dimension_numbers<[1], [0], [0], [1], [0, 0, 1, 1], [], []>} : vector<8x256xbf16>, vector<256x256xbf16>, vector<8x256xf32> -> vector<8x256xf32>
    %180 = vector.extract_strided_slice %0 {offsets = [12, 0], sizes = [1, 256], strides = [1, 1]} : vector<24x256xf32> to vector<1x256xf32>
    %181 = vector.broadcast %180 : vector<1x256xf32> to vector<8x256xf32>
    %182 = arith.addf %179, %181 : vector<8x256xf32>
    %183 = arith.mulf %10, %182 : vector<8x256xf32>
    %184 = vector.extract_strided_slice %0 {offsets = [13, 0], sizes = [1, 256], strides = [1, 1]} : vector<24x256xf32> to vector<1x256xf32>
    %185 = vector.extract_strided_slice %0 {offsets = [14, 0], sizes = [1, 256], strides = [1, 1]} : vector<24x256xf32> to vector<1x256xf32>
    %cst_50 = arith.constant dense<0.000000e+00> : vector<256xf32>
    %186 = vector.multi_reduction <add>, %183, %cst_50 [0] : vector<8x256xf32> to vector<256xf32>
    %187 = vector.shape_cast %186 : vector<256xf32> to vector<1x256xf32>
    %cst_51 = arith.constant 8.000000e+00 : f32
    %188 = vector.broadcast %cst_51 : f32 to vector<1x256xf32>
    %189 = arith.divf %187, %188 : vector<1x256xf32>
    %190 = vector.broadcast %189 : vector<1x256xf32> to vector<8x256xf32>
    %191 = arith.subf %183, %190 : vector<8x256xf32>
    %192 = arith.mulf %191, %191 : vector<8x256xf32>
    %cst_52 = arith.constant dense<0.000000e+00> : vector<256xf32>
    %193 = vector.multi_reduction <add>, %192, %cst_52 [0] : vector<8x256xf32> to vector<256xf32>
    %194 = vector.shape_cast %193 : vector<256xf32> to vector<1x256xf32>
    %cst_53 = arith.constant 8.000000e+00 : f32
    %195 = vector.broadcast %cst_53 : f32 to vector<1x256xf32>
    %196 = arith.divf %194, %195 : vector<1x256xf32>
    %197 = vector.broadcast %189 : vector<1x256xf32> to vector<8x256xf32>
    %198 = arith.subf %183, %197 : vector<8x256xf32>
    %cst_54 = arith.constant 9.99999974E-6 : f32
    %199 = vector.broadcast %cst_54 : f32 to vector<1x256xf32>
    %200 = arith.addf %196, %199 : vector<1x256xf32>
    %201 = math.rsqrt %200 : vector<1x256xf32>
    %202 = vector.broadcast %201 : vector<1x256xf32> to vector<8x256xf32>
    %203 = arith.mulf %198, %202 : vector<8x256xf32>
    %204 = vector.broadcast %184 : vector<1x256xf32> to vector<8x256xf32>
    %205 = arith.mulf %203, %204 : vector<8x256xf32>
    %206 = vector.broadcast %185 : vector<1x256xf32> to vector<8x256xf32>
    %207 = arith.addf %205, %206 : vector<8x256xf32>
    %cst_55 = arith.constant 0.000000e+00 : f32
    %208 = vector.broadcast %cst_55 : f32 to vector<8x256xf32>
    %209 = arith.maximumf %207, %208 : vector<8x256xf32>
    %210 = vector.broadcast %cst_55 : f32 to vector<8x256xf32>
    %211 = arith.subf %207, %210 : vector<8x256xf32>
    %212 = arith.cmpf one, %211, %211 : vector<8x256xf32>
    %213 = vector.broadcast %cst_55 : f32 to vector<8x256xf32>
    %214 = arith.addf %207, %213 : vector<8x256xf32>
    %215 = math.absf %211 : vector<8x256xf32>
    %cst_56 = arith.constant 0.000000e+00 : f32
    %216 = vector.broadcast %cst_56 : f32 to vector<8x256xf32>
    %217 = arith.subf %216, %215 : vector<8x256xf32>
    %218 = math.exp %217 : vector<8x256xf32>
    %219 = math.log1p %218 : vector<8x256xf32>
    %220 = arith.addf %209, %219 : vector<8x256xf32>
    %221 = arith.select %212, %214, %220 : vector<8x256xi1>, vector<8x256xf32>
    %222 = arith.truncf %221 : vector<8x256xf32> to vector<8x256xbf16>
    %c0_57 = arith.constant 0 : index
    %c0_58 = arith.constant 0 : index
    %223 = vector.load %arg9[%c0_57, %c0_58] : memref<256x256xbf16, #tpu.memory_space<vmem>>, vector<256x256xbf16>
    %cst_59 = arith.constant dense<0.000000e+00> : vector<8x256xf32>
    %224 = tpu.matmul %222, %223, %cst_59 {dimension_numbers = #tpu.dot_dimension_numbers<[1], [0], [0], [1], [0, 0, 1, 1], [], []>} : vector<8x256xbf16>, vector<256x256xbf16>, vector<8x256xf32> -> vector<8x256xf32>
    %225 = vector.extract_strided_slice %0 {offsets = [15, 0], sizes = [1, 256], strides = [1, 1]} : vector<24x256xf32> to vector<1x256xf32>
    %226 = vector.broadcast %225 : vector<1x256xf32> to vector<8x256xf32>
    %227 = arith.addf %224, %226 : vector<8x256xf32>
    %228 = arith.mulf %11, %227 : vector<8x256xf32>
    %229 = vector.extract_strided_slice %0 {offsets = [16, 0], sizes = [1, 256], strides = [1, 1]} : vector<24x256xf32> to vector<1x256xf32>
    %230 = vector.extract_strided_slice %0 {offsets = [17, 0], sizes = [1, 256], strides = [1, 1]} : vector<24x256xf32> to vector<1x256xf32>
    %cst_60 = arith.constant dense<0.000000e+00> : vector<256xf32>
    %231 = vector.multi_reduction <add>, %228, %cst_60 [0] : vector<8x256xf32> to vector<256xf32>
    %232 = vector.shape_cast %231 : vector<256xf32> to vector<1x256xf32>
    %cst_61 = arith.constant 8.000000e+00 : f32
    %233 = vector.broadcast %cst_61 : f32 to vector<1x256xf32>
    %234 = arith.divf %232, %233 : vector<1x256xf32>
    %235 = vector.broadcast %234 : vector<1x256xf32> to vector<8x256xf32>
    %236 = arith.subf %228, %235 : vector<8x256xf32>
    %237 = arith.mulf %236, %236 : vector<8x256xf32>
    %cst_62 = arith.constant dense<0.000000e+00> : vector<256xf32>
    %238 = vector.multi_reduction <add>, %237, %cst_62 [0] : vector<8x256xf32> to vector<256xf32>
    %239 = vector.shape_cast %238 : vector<256xf32> to vector<1x256xf32>
    %cst_63 = arith.constant 8.000000e+00 : f32
    %240 = vector.broadcast %cst_63 : f32 to vector<1x256xf32>
    %241 = arith.divf %239, %240 : vector<1x256xf32>
    %242 = vector.broadcast %234 : vector<1x256xf32> to vector<8x256xf32>
    %243 = arith.subf %228, %242 : vector<8x256xf32>
    %cst_64 = arith.constant 9.99999974E-6 : f32
    %244 = vector.broadcast %cst_64 : f32 to vector<1x256xf32>
    %245 = arith.addf %241, %244 : vector<1x256xf32>
    %246 = math.rsqrt %245 : vector<1x256xf32>
    %247 = vector.broadcast %246 : vector<1x256xf32> to vector<8x256xf32>
    %248 = arith.mulf %243, %247 : vector<8x256xf32>
    %249 = vector.broadcast %229 : vector<1x256xf32> to vector<8x256xf32>
    %250 = arith.mulf %248, %249 : vector<8x256xf32>
    %251 = vector.broadcast %230 : vector<1x256xf32> to vector<8x256xf32>
    %252 = arith.addf %250, %251 : vector<8x256xf32>
    %cst_65 = arith.constant 0.000000e+00 : f32
    %253 = vector.broadcast %cst_65 : f32 to vector<8x256xf32>
    %254 = arith.maximumf %252, %253 : vector<8x256xf32>
    %255 = vector.broadcast %cst_65 : f32 to vector<8x256xf32>
    %256 = arith.subf %252, %255 : vector<8x256xf32>
    %257 = arith.cmpf one, %256, %256 : vector<8x256xf32>
    %258 = vector.broadcast %cst_65 : f32 to vector<8x256xf32>
    %259 = arith.addf %252, %258 : vector<8x256xf32>
    %260 = math.absf %256 : vector<8x256xf32>
    %cst_66 = arith.constant 0.000000e+00 : f32
    %261 = vector.broadcast %cst_66 : f32 to vector<8x256xf32>
    %262 = arith.subf %261, %260 : vector<8x256xf32>
    %263 = math.exp %262 : vector<8x256xf32>
    %264 = math.log1p %263 : vector<8x256xf32>
    %265 = arith.addf %254, %264 : vector<8x256xf32>
    %266 = arith.select %257, %259, %265 : vector<8x256xi1>, vector<8x256xf32>
    %c0_67 = arith.constant 0 : index
    %c0_68 = arith.constant 0 : index
    %267 = vector.load %arg10[%c0_67, %c0_68] : memref<256x8xf32, #tpu.memory_space<vmem>>, vector<256x8xf32>
    %cst_69 = arith.constant dense<0.000000e+00> : vector<8x8xf32>
    %268 = tpu.matmul %266, %267, %cst_69 {dimension_numbers = #tpu.dot_dimension_numbers<[1], [0], [0], [1], [0, 0, 1, 1], [], []>} : vector<8x256xf32>, vector<256x8xf32>, vector<8x8xf32> -> vector<8x8xf32>
    %269 = vector.extract_strided_slice %0 {offsets = [18, 0], sizes = [1, 8], strides = [1, 1]} : vector<24x256xf32> to vector<1x8xf32>
    %270 = vector.broadcast %269 : vector<1x8xf32> to vector<8x8xf32>
    %271 = arith.addf %268, %270 : vector<8x8xf32>
    %c0_70 = arith.constant 0 : index
    %c0_71 = arith.constant 0 : index
    %272 = vector.load %arg12[%c0_70, %c0_71] : memref<8x8xf32, #tpu.memory_space<vmem>>, vector<8x8xf32>
    tpu.vector_store %arg12[%c0_70, %c0_71], %271 {strides = array<i32>} : memref<8x8xf32, #tpu.memory_space<vmem>>, vector<8x8xf32>,
    return
  }
}

</mosaic_0001>

<bundles_post_ra>
// kernel: conditional_model_forward.1
= control target key start
LH: loop header
LB: loop body
LE: loop exit
PB: predicated region body
PF: predicated region fallthrough
CT: control target
= control target key end

     0   :  { %17 = vsyncpa [#allocation5], 0  ;;  %s4406_s0 = inlined_call_operand.vmem [shape: f32[8,3072], index: 0, kind: input, shape index: {}]   ;;  %s4407_s1 = inlined_call_operand.vmem [shape: f32[8,32], index: 1, kind: input, shape index: {}]   ;;  %s4408_s2 = inlined_call_operand.vmem [shape: s32[8,1], index: 2, kind: input, shape index: {}]   ;;  %s4409_s3 = inlined_call_operand.hbm [shape: bf16[3072,256], index: 3, kind: input, shape index: {}]   ;;  %s4410_s4 = inlined_call_operand.hbm [shape: bf16[256,256], index: 4, kind: input, shape index: {}]   ;;  %s4411_s5 = inlined_call_operand.hbm [shape: bf16[256,256], index: 5, kind: input, shape index: {}]   ;;  %s4412_s6 = inlined_call_operand.hbm [shape: f32[11,768], index: 6, kind: input, shape index: {}]   ;;  %s4413_s7 = inlined_call_operand.hbm [shape: f32[32,256], index: 7, kind: input, shape index: {}]   ;;  %s4414_s8 = inlined_call_operand.hbm [shape: bf16[256,256], index: 8, kind: input, shape index: {}]   ;;  %s4415_s9 = inlined_call_operand.hbm [shape: bf16[256,256], index: 9, kind: input, shape index: {}]   ;;  %s4416_s10 = inlined_call_operand.vmem [shape: f32[256,8], index: 10, kind: input, shape index: {}]   ;;  %s4417_s11 = inlined_call_operand.hbm [shape: f32[24,256], index: 11, kind: input, shape index: {}]   ;;  %s4418_s12 = inlined_call_operand.hbm [shape: f32[8,8], index: 12, kind: output, shape index: {}]  }
   0x1   :  { %18 = vsyncpa [#allocation8], 0 }
   0x2   :  { %19 = vsyncpa [#allocation11], 0 }
   0x3   :  { %20 = vsyncpa [#allocation14], 0 }
   0x4   :  { %21 = vsyncpa [#allocation6], 0  ;;  %s3849_s21 = smov [#allocation7]   ;;  %s3850_s23 = smov [#allocation10]  }
   0x5   :  { %s45_s22 = sshll.u32 %s3849_s21, 4  ;;  %s69_s24 = sshll.u32 %s3850_s23, 4  ;;  %s46_s22 = int_to_ptr.vmem [resolvable:$true] %s45_s22  ;;  %s3937_s24 = int_to_ptr.vmem [resolvable:$true] %s69_s24 }
   0x6   :  { %s3661_s27 = scalar_lea.hbm %s4411_s5, 4096 }
   0x7   :  { %p3662_p0 = scmp.ne.s32.totalorder %s4411_s5, %s3661_s27  ;;  %p3665_p1 = scmp.lt.u32.totalorder %s3661_s27, %s4411_s5 }
   0x9   :  { %p3667_p2 = pnand %p3665_p1, %p3662_p0 }
   0xb   :  { %3670 = shalt.err (!%p3667_p2)
}
   0xc   :  { %s3671_s14 = scalar_lea.vmem %s46_s22, 4096  ;;  %p3676_p4 = scmp.lt.s32.totalorder %s46_s22, %s46_s22 }
   0xd   :  { %p3672_p3 = scmp.ne.s32.totalorder %s46_s22, %s3671_s14  ;;  %p3677_p5 = scmp.lt.s32.totalorder %s3671_s14, %s3671_s14 }
   0xf   :  { %p3678_p6 = por %p3677_p5, %p3676_p4 }
  0x11   :  { %p3679_p7 = pnand %p3678_p6, %p3672_p3 }
  0x13   :  { %3682 = shalt.err (!%p3679_p7)
}
  0x14   :  { %s3851_s15 = smov 128   ;;  %s3852_s16 = smov 8  }
  0x15   :  { %51 = dma.hbm_to_vmem [thread:$0]  %s4411_s5, 4096, %s46_s22, [#allocation8], %s3851_s15, %s3851_s15, %s3852_s16  }
  0x16   :  { %s3683_s21 = scalar_lea.hbm %s4413_s7, 1024 }
  0x17   :  { %p3684_p8 = scmp.ne.s32.totalorder %s4413_s7, %s3683_s21  ;;  %p3687_p9 = scmp.lt.u32.totalorder %s3683_s21, %s4413_s7 }
  0x19   :  { %p3689_p10 = pnand %p3687_p9, %p3684_p8 }
  0x1b   :  { %3692 = shalt.err (!%p3689_p10)
}
  0x1c   :  { %s3693_s28 = scalar_lea.vmem %s3937_s24, 1024  ;;  %p3698_p12 = scmp.lt.s32.totalorder %s3937_s24, %s3937_s24 }
  0x1d   :  { %p3694_p11 = scmp.ne.s32.totalorder %s3937_s24, %s3693_s28  ;;  %p3699_p13 = scmp.lt.s32.totalorder %s3693_s28, %s3693_s28 }
  0x1f   :  { %p3700_p0 = por %p3699_p13, %p3698_p12 }
  0x21   :  { %p3701_p1 = pnand %p3700_p0, %p3694_p11 }
  0x23   :  { %3704 = shalt.err (!%p3701_p1)
}
  0x24   :  { %s3853_s5 = smov 256   ;;  %s3854_s22 = smov 16  }
  0x25   :  { %75 = dma.hbm_to_vmem [thread:$0]  %s4413_s7, 1024, %s3937_s24, [#allocation11], %s3853_s5, %s3853_s5, %s3854_s22  }
  0x26   :  { %s3855_s13 = smov [#allocation13]   ;;  %s3856_s17 = smov [#allocation4]  }
  0x27   :  { %s93_s14 = sshll.u32 %s3855_s13, 4  ;;  %s33_s18 = sshll.u32 %s3856_s17, 4  ;;  %s94_s14 = int_to_ptr.vmem [resolvable:$true] %s93_s14  ;;  %s3974_s18 = int_to_ptr.vmem [resolvable:$true] %s33_s18 }
  0x28   :  { %s3705_s21 = scalar_lea.hbm %s4415_s9, 4096 }
  0x29   :  { %p3706_p2 = scmp.ne.s32.totalorder %s4415_s9, %s3705_s21  ;;  %p3709_p3 = scmp.lt.u32.totalorder %s3705_s21, %s4415_s9 }
  0x2b   :  { %p3711_p4 = pnand %p3709_p3, %p3706_p2 }
  0x2d   :  { %3714 = shalt.err (!%p3711_p4)
}
  0x2e   :  { %s3715_s7 = scalar_lea.vmem %s94_s14, 4096  ;;  %p3720_p6 = scmp.lt.s32.totalorder %s94_s14, %s94_s14 }
  0x2f   :  { %p3716_p5 = scmp.ne.s32.totalorder %s94_s14, %s3715_s7  ;;  %p3721_p7 = scmp.lt.s32.totalorder %s3715_s7, %s3715_s7 }
  0x31   :  { %p3722_p8 = por %p3721_p7, %p3720_p6 }
  0x33   :  { %p3723_p9 = pnand %p3722_p8, %p3716_p5 }
  0x35   :  { %3726 = shalt.err (!%p3723_p9)
}
  0x36   :  { %99 = dma.hbm_to_vmem [thread:$0]  %s4415_s9, 4096, %s94_s14, [#allocation14], %s3851_s15, %s3851_s15, %s3852_s16  }
  0x37   :  { %s3727_s13 = scalar_lea.hbm %s4410_s4, 4096 }
  0x38   :  { %p3728_p10 = scmp.ne.s32.totalorder %s4410_s4, %s3727_s13  ;;  %p3731_p11 = scmp.lt.u32.totalorder %s3727_s13, %s4410_s4 }
  0x3a   :  { %p3733_p12 = pnand %p3731_p11, %p3728_p10 }
  0x3c   :  { %3736 = shalt.err (!%p3733_p12)
}
  0x3d   :  { %s3737_s23 = scalar_lea.vmem %s3974_s18, 4096  ;;  %p3742_p0 = scmp.lt.s32.totalorder %s3974_s18, %s3974_s18 }
  0x3e   :  { %p3738_p13 = scmp.ne.s32.totalorder %s3974_s18, %s3737_s23  ;;  %p3743_p1 = scmp.lt.s32.totalorder %s3737_s23, %s3737_s23 }
  0x40   :  { %p3744_p2 = por %p3743_p1, %p3742_p0 }
  0x42   :  { %p3745_p3 = pnand %p3744_p2, %p3738_p13 }
  0x44   :  { %3748 = shalt.err (!%p3745_p3)
}
  0x45   :  { %39 = dma.hbm_to_vmem [thread:$0]  %s4410_s4, 4096, %s3974_s18, [#allocation5], %s3851_s15, %s3851_s15, %s3852_s16  }
  0x46   :  { %s3857_s25 = smov [#allocation9]   ;;  %s3749_s24 = scalar_lea.hbm %s4412_s6, 1536 }
  0x47   :  { %s57_s26 = sshll.u32 %s3857_s25, 4  ;;  %p3750_p4 = scmp.ne.s32.totalorder %s4412_s6, %s3749_s24  ;;  %s58_s26 = int_to_ptr.vmem [resolvable:$true] %s57_s26 }
  0x48   :  { %p3753_p5 = scmp.lt.u32.totalorder %s3749_s24, %s4412_s6 }
  0x4a   :  { %p3755_p6 = pnand %p3753_p5, %p3750_p4 }
  0x4c   :  { %3758 = shalt.err (!%p3755_p6)
}
  0x4d   :  { %s3759_s17 = scalar_lea.vmem %s58_s26, 1536  ;;  %p3764_p8 = scmp.lt.s32.totalorder %s58_s26, %s58_s26 }
  0x4e   :  { %p3760_p7 = scmp.ne.s32.totalorder %s58_s26, %s3759_s17  ;;  %p3765_p9 = scmp.lt.s32.totalorder %s3759_s17, %s3759_s17 }
  0x50   :  { %p3766_p10 = por %p3765_p9, %p3764_p8 }
  0x52   :  { %p3767_p11 = pnand %p3766_p10, %p3760_p7 }
  0x54   :  { %3770 = shalt.err (!%p3767_p11)
}
  0x55   :  { %s3858_s4 = smov 768   ;;  %s3859_s18 = smov 48  }
  0x56   :  { %63 = dma.hbm_to_vmem [thread:$0]  %s4412_s6, 1536, %s58_s26, [#allocation8], %s3858_s4, %s3858_s4, %s3859_s18  }
  0x57   :  { %s3860_s21 = smov [#allocation12]   ;;  %s3861_s9 = smov [#allocation15]  }
  0x58   :  { %s81_s23 = sshll.u32 %s3860_s21, 4  ;;  %s107_s14 = sshll.u32 %s3861_s9, 4  ;;  %s82_s23 = int_to_ptr.vmem [resolvable:$true] %s81_s23  ;;  %s108_s14 = int_to_ptr.vmem [resolvable:$true] %s107_s14 }
  0x59   :  { %s3771_s7 = scalar_lea.hbm %s4414_s8, 4096 }
  0x5a   :  { %p3772_p12 = scmp.ne.s32.totalorder %s4414_s8, %s3771_s7  ;;  %p3775_p13 = scmp.lt.u32.totalorder %s3771_s7, %s4414_s8 }
  0x5c   :  { %p3777_p0 = pnand %p3775_p13, %p3772_p12 }
  0x5e   :  { %3780 = shalt.err (!%p3777_p0)
}
  0x5f   :  { %s3781_s6 = scalar_lea.vmem %s82_s23, 4096  ;;  %p3786_p2 = scmp.lt.s32.totalorder %s82_s23, %s82_s23 }
  0x60   :  { %p3782_p1 = scmp.ne.s32.totalorder %s82_s23, %s3781_s6  ;;  %p3787_p3 = scmp.lt.s32.totalorder %s3781_s6, %s3781_s6 }
  0x62   :  { %p3788_p4 = por %p3787_p3, %p3786_p2 }
  0x64   :  { %p3789_p5 = pnand %p3788_p4, %p3782_p1 }
  0x66   :  { %3792 = shalt.err (!%p3789_p5)
}
  0x67   :  { %87 = dma.hbm_to_vmem [thread:$0]  %s4414_s8, 4096, %s82_s23, [#allocation11], %s3851_s15, %s3851_s15, %s3852_s16  }
  0x68   :  { %s3793_s18 = scalar_lea.hbm %s4417_s11, 768 }
  0x69   :  { %p3794_p6 = scmp.ne.s32.totalorder %s4417_s11, %s3793_s18  ;;  %p3797_p7 = scmp.lt.u32.totalorder %s3793_s18, %s4417_s11 }
  0x6b   :  { %p3799_p8 = pnand %p3797_p7, %p3794_p6 }
  0x6d   :  { %3802 = shalt.err (!%p3799_p8)
}
  0x6e   :  { %s3803_s25 = scalar_lea.vmem %s108_s14, 768  ;;  %p3808_p10 = scmp.lt.s32.totalorder %s108_s14, %s108_s14 }
  0x6f   :  { %p3804_p9 = scmp.ne.s32.totalorder %s108_s14, %s3803_s25  ;;  %p3809_p11 = scmp.lt.s32.totalorder %s3803_s25, %s3803_s25 }
  0x71   :  { %p3810_p12 = por %p3809_p11, %p3808_p10 }
  0x73   :  { %p3811_p13 = pnand %p3810_p12, %p3804_p9 }
  0x75   :  { %3814 = shalt.err (!%p3811_p13)
}
  0x76   :  { %113 = dma.hbm_to_vmem [thread:$0]  %s4417_s11, 768, %s108_s14, [#allocation14], %s3853_s5, %s3853_s5, %s3854_s22  }
  0x77   :  { %3837 = dma.done.wait [#allocation5], 4096  }
  0x78   :  { %3838 = vsyncadd [#allocation5], 4294963200 }
  0x79   :  { %3839 = dma.done.wait [#allocation8], 5632  }
  0x7a   :  { %3840 = vsyncadd [#allocation8], 4294961664 }
  0x7b   :  { %3841 = dma.done.wait [#allocation11], 5120  }
  0x7c   :  { %3842 = vsyncadd [#allocation11], 4294962176 }
  0x7d   :  { %3843 = dma.done.wait [#allocation14], 4864  }
  0x7e   :  { %3844 = vsyncadd [#allocation14], 4294962432  ;;  %s139_s23 = sld [smem:[#allocation0]]   ;;  %151 = sst [smem:[#allocation18]] %s3853_s5  ;;  %v3862_v0 = vmov 0   ;;  %v3863_v1 = vmov 0.0   ;;  %v177_v17 = vlaneseq }
  0x7f   :  { %3404 = vset.pattern.permute.xlu0 %v3862_v0  ;;  %153 = sst [smem:[#allocation18 + $0x1]] %s3853_s5  ;;  %284 = vmatprep.mubr.f32.mxu0 %v3863_v1  ;;  %s3864_s27 = smov 2   ;;  %vm201_vm0 = vcmask 1042432   ;;  %vm3870_vm1 = vmmov 1   ;;  %vm197_vm3 = vcmask 89088   ;;  %vm450_vm5 = vcmask 261120  }
  0x80   :  { %155 = sst [smem:[#allocation18 + $0x2]] %s3864_s27  ;;  %s3865_s11 = smov 64   ;;  %vm4061_vm2 = vmpackc.low %vm201_vm0, %vm3870_vm1  ;;  %v178_v18 = vand.u32 127, %v177_v17  ;;  %v4100_v46 = vshrl.u32 %v177_v17, 7 }
  0x81   :  { %157 = sst [smem:[#allocation18 + $0x3]] %s3865_s11  ;;  %s3866_s22 = smov [#allocation2]  }
  0x82   :  { %s147_s14 = sshll.u32 %s3866_s22, 4  ;;  %159 = sst [smem:[#allocation18 + $0x4]] %s3851_s15  ;;  %v4109_v50 = vsub.s32 1, %v4100_v46  ;;  %s148_s14 = int_to_ptr.vmem [resolvable:$true] %s147_s14 }
  0x83   :  { %161 = sst [smem:[#allocation18 + $0x5]] %s3864_s27  ;;  %s3867_s28 = smov 4  }
  0x84   :  { %s3102_s7 = sshll.u32 %s139_s23, 26  ;;  %163 = sst [smem:[#allocation18 + $0x6]] %s3851_s15 }
  0x85   :  { %s3103_s24 = sadd.s32 134217728, %s3102_s7  ;;  %165 = sst [smem:[#allocation18 + $0x7]] %s3865_s11 }
  0x86   :  { %167 = sst [smem:[#allocation18 + $0x8]] %s3867_s28  ;;  %s3868_s5 = smov [#allocation3]  }
  0x87   :  { %s3869_s29 = smov [#allocation17]  }
  0x88   :  { %169 = dma.general %s4409_s3, 49152, %s148_s14, %s3868_s5, %s3869_s29, [#allocation18], %s3103_s24, 0  }
  0x89   :  { %v4065_v3 = vld [vmem:[#allocation15] sm:$0xff]  ;;  %v4067_v4 = vld [vmem:[#allocation15 + $0x8] sm:$0xff]  ;;  %v192_v9 = vld [vmem:[#allocation9 + $0x38] sm:$0x7] }
  0x8a   :  { %v4069_v5 = vld [vmem:[#allocation15 + $0x20] sm:$0xff]  ;;  %v4071_v6 = vld [vmem:[#allocation15 + $0x28] sm:$0xff]  ;;  %v191_v11 = vld [vmem:[#allocation9 + $0x30] sm:$0x7] }
  0x8b   :  { %v176_v7 = vld [vmem:[%s4408_s2] sm:$0xff]  ;;  %v186_v8 = vld [vmem:[#allocation9 + $0x8] sm:$0xff]  ;;  %v188_v14 = vld [vmem:[#allocation9 + $0x18] sm:$0xff] }
  0x8c   :  { %180 = vperm.xlu0 %3404, %v176_v7   ;;  %v185_v10 = vld [vmem:[#allocation9] sm:$0xff]  ;;  %v3279_v12 = vpack.c.bf16 %v192_v9, %v186_v8  ;;  %v194_v15 = vld [vmem:[#allocation9 + $0x48] sm:$0x7]  ;;  %v187_v19 = vld [vmem:[#allocation9 + $0x10] sm:$0xff] }
  0x8d   :  { %v3282_v13 = vpack.c.bf16 %v191_v11, %v185_v10  ;;  %v3285_v16 = vpack.c.bf16 %v194_v15, %v188_v14  ;;  %v193_v20 = vld [vmem:[#allocation9 + $0x40] sm:$0x7]  ;;  %v190_v21 = vld [vmem:[#allocation9 + $0x28] sm:$0xff]  ;;  %v196_v22 = vld [vmem:[#allocation9 + $0x58] sm:$0x7] }
  0x8e   :  { %3281 = vmatprep.subr.msk.bf16.mxu0 %vm4061_vm2, %v3279_v12  ;;  %v3288_v24 = vpack.c.bf16 %v193_v20, %v187_v19  ;;  %v3291_v25 = vpack.c.bf16 %v196_v22, %v190_v21  ;;  %v189_v26 = vld [vmem:[#allocation9 + $0x20] sm:$0xff]  ;;  %v195_v27 = vld [vmem:[#allocation9 + $0x50] sm:$0x7]  ;;  %v435_v29 = vld [vmem:[#allocation10 + $0x8] sm:$0xff] }
  0x8f   :  { %3284 = vmatpush1.bf16.msk.msra.mxu0 %vm4061_vm2, %v3282_v13  ;;  %v437_v30 = vld [vmem:[#allocation10 + $0x18] sm:$0xff]  ;;  %v3294_v31 = vpack.c.bf16 %v195_v27, %v189_v26  ;;  %v434_v33 = vld [vmem:[#allocation10] sm:$0xff]  ;;  %v436_v34 = vld [vmem:[#allocation10 + $0x10] sm:$0xff] }
  0x90   :  { %3287 = vmatprep.subr.msk.bf16.mxu0 %vm4061_vm2, %v3285_v16  ;;  %v3297_v32 = vpack.c.bf16 %v437_v30, %v435_v29  ;;  %v439_v35 = vld [vmem:[#allocation10 + $0x28] sm:$0xff]  ;;  %v441_v36 = vld [vmem:[#allocation10 + $0x38] sm:$0xff]  ;;  %v3299_v37 = vpack.c.bf16 %v436_v34, %v434_v33  ;;  %v438_v39 = vld [vmem:[#allocation10 + $0x20] sm:$0xff] }
  0x91   :  { %v3301_v38 = vpack.c.bf16 %v441_v36, %v439_v35  ;;  %v440_v40 = vld [vmem:[#allocation10 + $0x30] sm:$0xff]  ;;  %v433_v42 = vld [vmem:[%s4407_s1] sm:$0xff]  ;;  %v4113_v52 = vld [vmem:[#allocation15 + $0x18] sm:$0xff]  ;;  %v4120_v35 = vsub.s32 2, %v4100_v46  ;;  %v4123_v36 = vsub.s32 3, %v4100_v46 }
  0x92   :  { %v3303_v41 = vpack.c.bf16 %v440_v40, %v438_v39  ;;  %v4111_v51 = vld [vmem:[#allocation15 + $0x10] sm:$0xff]  ;;  %v449_v54 = vrot.slane %v4113_v52, %v4109_v50 }
  0x93   :  { %v445_v53 = vrot.slane %v4111_v51, %v4109_v50  ;;  %v573_v39 = vrot.slane %v4113_v52, %v4120_v35 }
 0x10b   :  { %v181_v23 = vpop.permute.xlu0 %180 }
 0x10c   :  { %vm182_vm4 = vcmp.eq.s32.totalorder %v181_v23, %v178_v18 }
 0x10d   :  { %v3104_v28 = vsel %vm182_vm4, 1.0, %v3863_v1 }
 0x10e   :  { %3107 = vmatmul.mubr.msk.f32.vlgmr.msra.gmra.mrb[0].mxu0 %vm197_vm3, %v3104_v28 }
 0x10f   :  { %3290 = vmatpush1.bf16.msk.msra.mxu0 %vm4061_vm2, %v3288_v24  ;;  %355 = vmatprep.mubr.f32.mxu0 %v3863_v1 }
 0x110   :  { %3293 = vmatprep.subr.msk.bf16.mxu0 %vm4061_vm2, %v3291_v25 }
 0x112   :  { %3110 = vmatmul.mubr.msk.f32.vlgmr.msra.gmra.mrb[2].mxu0 %vm197_vm3, %v3104_v28 }
 0x113   :  { %3296 = vmatpush1.bf16.msk.msra.mxu0 %vm4061_vm2, %v3294_v31  ;;  %426 = vmatprep.mubr.f32.mxu0 %v3863_v1 }
 0x114   :  { %3298 = vmatprep.subr.bf16.mxu0 %v3297_v32 }
 0x116   :  { %3113 = vmatmul.mubr.msk.f32.vlgmr.msra.gmra.mrb[4].mxu0 %vm197_vm3, %v3104_v28 }
 0x117   :  { %3300 = vmatpush1.bf16.msra.mxu0 %v3299_v37  ;;  %518 = vmatprep.mubr.f32.mxu0 %v3863_v1  ;;  %v569_v37 = vrot.slane %v4111_v51, %v4120_v35 }
 0x118   :  { %3302 = vmatprep.subr.bf16.mxu0 %v3301_v38 }
 0x11b   :  { %3304 = vmatpush1.bf16.msra.mxu0 %v3303_v41 }
 0x11e   :  { %3114 = vmatmul.mubr.msk.f32.vlgmr.msra.gmra.mrb[6].mxu0 %vm450_vm5, %v433_v42  ;;  %v579_v42 = vrot.slane %v4111_v51, %v4123_v36 }
 0x1e1   :  { %v286_v43 = vpop.f32.mrb[0].mxu0 }
 0x1e2   :  { %v288_v44 = vpop.f32.mrb[1].mxu0 }
 0x1e5   :  { %v4098_v45 = vpop.f32.mrb[2].mxu0 }
 0x1e6   :  { %v4102_v47 = vpop.f32.mrb[3].mxu0 }
 0x1e9   :  { %v4104_v48 = vpop.f32.mrb[4].mxu0 }
 0x1ea   :  { %v4106_v49 = vpop.f32.mrb[5].mxu0 }
 0x1f1   :  { %v520_v55 = vpop.f32.mrb[6].mxu0 }
 0x1f2   :  { %v521_v56 = vadd.f32 %v520_v55, %v445_v53  ;;  %v522_v57 = vpop.f32.mrb[7].mxu0 }
 0x1f3   :  { %v523_v58 = vadd.f32 %v522_v57, %v449_v54 }
 0x1f4   :  { %v525_v59 = vmul.f32 %v521_v56, %v286_v43 }
 0x1f5   :  { %v526_v60 = vmul.f32 %v523_v58, %v288_v44  ;;  %v583_v44 = vrot.slane %v4113_v52, %v4123_v36 }
 0x1f6   :  { %v527_v61 = vrot.slane %v525_v59, 4 }
 0x1f7   :  { %v533_v62 = vrot.slane %v526_v60, 4 }
 0x1f8   :  { %v528_v63 = vadd.f32 %v527_v61, %v525_v59 }
 0x1f9   :  { %v534_v0 = vadd.f32 %v533_v62, %v526_v60 }
 0x1fa   :  { %v529_v1 = vrot.slane %v528_v63, 2 }
 0x1fb   :  { %v535_v2 = vrot.slane %v534_v0, 2 }
 0x1fc   :  { %v530_v7 = vadd.f32 %v529_v1, %v528_v63 }
 0x1fd   :  { %v536_v8 = vadd.f32 %v535_v2, %v534_v0 }
 0x1fe   :  { %v531_v9 = vrot.slane %v530_v7, 1 }
 0x1ff   :  { %v537_v10 = vrot.slane %v536_v8, 1 }
 0x200   :  { %v532_v11 = vadd.f32 %v531_v9, %v530_v7 }
 0x201   :  { %v538_v12 = vadd.f32 %v537_v10, %v536_v8 }
 0x202   :  { %v540_v13 = vmul.f32 0.125, %v532_v11 }
 0x203   :  { %v541_v14 = vmul.f32 0.125, %v538_v12 }
 0x204   :  { %v542_v15 = vsub.f32 %v525_v59, %v540_v13 }
 0x205   :  { %v543_v16 = vsub.f32 %v526_v60, %v541_v14 }
 0x206   :  { %v544_v17 = vmul.f32 %v542_v15, %v542_v15 }
 0x207   :  { %v545_v18 = vmul.f32 %v543_v16, %v543_v16 }
 0x208   :  { %v546_v19 = vrot.slane %v544_v17, 4 }
 0x209   :  { %v552_v20 = vrot.slane %v545_v18, 4 }
 0x20a   :  { %v547_v21 = vadd.f32 %v546_v19, %v544_v17 }
 0x20b   :  { %v553_v22 = vadd.f32 %v552_v20, %v545_v18 }
 0x20c   :  { %v548_v23 = vrot.slane %v547_v21, 2 }
 0x20d   :  { %v554_v24 = vrot.slane %v553_v22, 2 }
 0x20e   :  { %v549_v25 = vadd.f32 %v548_v23, %v547_v21 }
 0x20f   :  { %v555_v26 = vadd.f32 %v554_v24, %v553_v22 }
 0x210   :  { %v550_v27 = vrot.slane %v549_v25, 1 }
 0x211   :  { %v556_v28 = vrot.slane %v555_v26, 1 }
 0x212   :  { %v551_v29 = vadd.f32 %v550_v27, %v549_v25 }
 0x213   :  { %v557_v30 = vadd.f32 %v556_v28, %v555_v26 }
 0x214   :  { %v558_v31 = vmul.f32 0.125, %v551_v29 }
 0x215   :  { %v559_v32 = vmul.f32 0.125, %v557_v30 }
 0x216   :  { %v560_v33 = vadd.f32 1e-05, %v558_v31 }
 0x217   :  { %v561_v34 = vadd.f32 1e-05, %v559_v32 }
 0x218   :  { %3405 = vrsqrt.f32 %v560_v33 }
 0x219   :  { %3407 = vrsqrt.f32 %v561_v34 }
 0x222   :  { %v3406_v38 = vpop.eup %3405 }
 0x223   :  { %v3408_v40 = vpop.eup %3407  ;;  %v564_v41 = vmul.f32 %v3406_v38, %v542_v15 }
 0x224   :  { %v565_v43 = vmul.f32 %v3408_v40, %v543_v16 }
 0x225   :  { %v574_v53 = vmul.f32 %v569_v37, %v564_v41 }
 0x226   :  { %v575_v54 = vmul.f32 %v573_v39, %v565_v43 }
 0x227   :  { %v584_v55 = vadd.f32 %v579_v42, %v574_v53 }
 0x228   :  { %v585_v56 = vadd.f32 %v583_v44, %v575_v54 }
 0x229   :  { %v592_v57 = vand.u32 2147483647, %v584_v55  ;;  %v586_v17 = vmax.f32 %v584_v55, 0.0  ;;  %vm588_vm8 = vcmp.ne.f32.partialorder %v584_v55, %v584_v55 }
 0x22a   :  { %v593_v58 = vand.u32 2147483647, %v585_v56  ;;  %v587_v21 = vmax.f32 %v585_v56, 0.0  ;;  %vm589_vm9 = vcmp.ne.f32.partialorder %v585_v56, %v585_v56 }
 0x22b   :  { %v594_v59 = vsub.f32 0.0, %v592_v57 }
 0x22c   :  { %v595_v60 = vsub.f32 0.0, %v593_v58 }
 0x22d   :  { %v596_v61 = vmul.f32 1.442695, %v594_v59 }
 0x22e   :  { %v598_v62 = vmul.f32 1.442695, %v595_v60 }
 0x22f   :  { %3409 = vpow2.f32 %v596_v61 }
 0x230   :  { %3411 = vpow2.f32 %v598_v62 }
 0x239   :  { %v3410_v63 = vpop.eup %3409 }
 0x23a   :  { %v3412_v0 = vpop.eup %3411  ;;  %v600_v1 = vadd.f32 1.0, %v3410_v63  ;;  %v603_v7 = vmul.f32 -0.5, %v3410_v63  ;;  %v606_v10 = vand.u32 2147483647, %v3410_v63 }
 0x23b   :  { %v609_v2 = vadd.f32 1.0, %v3412_v0  ;;  %v612_v8 = vmul.f32 -0.5, %v3412_v0  ;;  %v615_v12 = vand.u32 2147483647, %v3412_v0 }
 0x23c   :  { %3413 = vlog2.f32 %v600_v1  ;;  %v604_v9 = vadd.f32 1.0, %v603_v7  ;;  %vm607_vm6 = vcmp.lt.f32.partialorder %v606_v10, 0.0004427343 }
 0x23d   :  { %3415 = vlog2.f32 %v609_v2  ;;  %v613_v11 = vadd.f32 1.0, %v612_v8  ;;  %vm616_vm7 = vcmp.lt.f32.partialorder %v615_v12, 0.0004427343 }
 0x23e   :  { %v605_v16 = vmul.f32 %v3410_v63, %v604_v9 }
 0x23f   :  { %v614_v19 = vmul.f32 %v3412_v0, %v613_v11 }
 0x246   :  { %v3414_v13 = vpop.eup %3413 }
 0x247   :  { %v3416_v14 = vpop.eup %3415  ;;  %v602_v15 = vmul.f32 0.6931472, %v3414_v13 }
 0x248   :  { %v611_v18 = vmul.f32 0.6931472, %v3416_v14 }
 0x249   :  { %v608_v20 = vsel %vm607_vm6, %v605_v16, %v602_v15 }
 0x24a   :  { %v618_v22 = vadd.f32 %v608_v20, %v586_v17  ;;  %v617_v23 = vsel %vm616_vm7, %v614_v19, %v611_v18 }
 0x24b   :  { %v619_v24 = vadd.f32 %v617_v23, %v587_v21 }
 0x24c   :  { %v4133_v25 = vsel %vm588_vm8, %v584_v55, %v618_v22 }
 0x24d   :  { %v4135_v26 = vsel %vm589_vm9, %v585_v56, %v619_v24 }
 0x24e   :  { %3845 = dma.done.wait [#allocation3], 49152 }
 0x24f   :  { %3846 = vsyncadd [#allocation3], 4294918144  ;;  %v803_v27 = vld [vmem:[#allocation2 + $0x408] sm:$0xff]  ;;  %v802_v28 = vld [vmem:[#allocation2 + $0x400] sm:$0xff] }
 0x250   :  { %v805_v29 = vld [vmem:[#allocation2 + $0x418] sm:$0xff]  ;;  %1230 = vmatprep.subr.bf16.mxu0 %v803_v27  ;;  %v804_v30 = vld [vmem:[#allocation2 + $0x410] sm:$0xff]  ;;  %v807_v31 = vld [vmem:[#allocation2 + $0x428] sm:$0xff] }
 0x251   :  { %1231 = vmatpush1.bf16.msra.mxu0 %v802_v28  ;;  %v806_v32 = vld [vmem:[#allocation2 + $0x420] sm:$0xff]  ;;  %v809_v33 = vld [vmem:[#allocation2 + $0x438] sm:$0xff]  ;;  %v675_v34 = vld [vmem:[#allocation2 + $0x8] sm:$0xff] }
 0x252   :  { %1232 = vmatprep.subr.bf16.mxu0 %v805_v29  ;;  %v674_v37 = vld [vmem:[#allocation2] sm:$0xff]  ;;  %v808_v38 = vld [vmem:[#allocation2 + $0x430] sm:$0xff]  ;;  %1066 = vmatprep.subr.bf16.mxu1 %v675_v34  ;;  %v677_v39 = vld [vmem:[#allocation2 + $0x18] sm:$0xff] }
 0x253   :  { %v635_v40 = vld [vmem:[%s4406_s0 + $0x48] sm:$0xff]  ;;  %1067 = vmatpush1.bf16.msra.mxu1 %v674_v37  ;;  %v676_v43 = vld [vmem:[#allocation2 + $0x10] sm:$0xff]  ;;  %v810_v53 = vld [vmem:[#allocation2 + $0x440] sm:$0xff] }
 0x254   :  { %v811_v41 = vld [vmem:[#allocation2 + $0x448] sm:$0xff]  ;;  %v659_v42 = vpack.c.bf16 %v635_v40, %v635_v40  ;;  %1068 = vmatprep.subr.bf16.mxu1 %v677_v39  ;;  %v813_v54 = vld [vmem:[#allocation2 + $0x458] sm:$0xff]  ;;  %v678_v55 = vld [vmem:[#allocation2 + $0x20] sm:$0xff] }
 0x255   :  { %1233 = vmatpush1.bf16.msra.mxu0 %v804_v30  ;;  %v679_v44 = vld [vmem:[#allocation2 + $0x28] sm:$0xff]  ;;  %v681_v56 = vld [vmem:[#allocation2 + $0x38] sm:$0xff]  ;;  %v812_v57 = vld [vmem:[#allocation2 + $0x450] sm:$0xff] }
 0x256   :  { %1234 = vmatprep.subr.bf16.mxu0 %v807_v31  ;;  %1262 = vmatprep.mubr.bf16.mxu0 %v659_v42  ;;  %v815_v58 = vld [vmem:[#allocation2 + $0x468] sm:$0xff]  ;;  %v680_v59 = vld [vmem:[#allocation2 + $0x30] sm:$0xff]  ;;  %v814_v61 = vld [vmem:[#allocation2 + $0x460] sm:$0xff] }
 0x257   :  { %1069 = vmatpush1.bf16.msra.mxu1 %v676_v43  ;;  %v683_v60 = vld [vmem:[#allocation2 + $0x48] sm:$0xff]  ;;  %v817_v62 = vld [vmem:[#allocation2 + $0x478] sm:$0xff]  ;;  %v682_v63 = vld [vmem:[#allocation2 + $0x40] sm:$0xff] }
 0x258   :  { %1070 = vmatprep.subr.bf16.mxu1 %v679_v44  ;;  %v685_v0 = vld [vmem:[#allocation2 + $0x58] sm:$0xff]  ;;  %v816_v1 = vld [vmem:[#allocation2 + $0x470] sm:$0xff]  ;;  %v819_v2 = vld [vmem:[#allocation2 + $0x488] sm:$0xff] }
 0x259   :  { %1235 = vmatpush1.bf16.msra.mxu0 %v806_v32  ;;  %v684_v7 = vld [vmem:[#allocation2 + $0x50] sm:$0xff]  ;;  %v687_v8 = vld [vmem:[#allocation2 + $0x68] sm:$0xff]  ;;  %v818_v9 = vld [vmem:[#allocation2 + $0x480] sm:$0xff] }
 0x25a   :  { %1236 = vmatprep.subr.bf16.mxu0 %v809_v33  ;;  %v821_v10 = vld [vmem:[#allocation2 + $0x498] sm:$0xff]  ;;  %v627_v11 = vld [vmem:[%s4406_s0 + $0x8] sm:$0xff]  ;;  %v686_v12 = vld [vmem:[#allocation2 + $0x60] sm:$0xff] }
 0x25b   :  { %1071 = vmatpush1.bf16.msra.mxu1 %v678_v55  ;;  %v651_v13 = vpack.c.bf16 %v627_v11, %v627_v11  ;;  %v689_v14 = vld [vmem:[#allocation2 + $0x78] sm:$0xff]  ;;  %v820_v15 = vld [vmem:[#allocation2 + $0x490] sm:$0xff]  ;;  %v823_v16 = vld [vmem:[#allocation2 + $0x4a8] sm:$0xff] }
 0x25c   :  { %1072 = vmatprep.subr.bf16.mxu1 %v681_v56  ;;  %v688_v17 = vld [vmem:[#allocation2 + $0x70] sm:$0xff]  ;;  %v691_v18 = vld [vmem:[#allocation2 + $0x88] sm:$0xff]  ;;  %v822_v19 = vld [vmem:[#allocation2 + $0x4a0] sm:$0xff] }
 0x25d   :  { %1237 = vmatpush1.bf16.msra.mxu0 %v808_v38  ;;  %1098 = vmatprep.mubr.bf16.mxu1 %v651_v13  ;;  %v825_v20 = vld [vmem:[#allocation2 + $0x4b8] sm:$0xff]  ;;  %v690_v21 = vld [vmem:[#allocation2 + $0x80] sm:$0xff]  ;;  %v824_v23 = vld [vmem:[#allocation2 + $0x4b0] sm:$0xff] }
 0x25e   :  { %1238 = vmatprep.subr.bf16.mxu0 %v811_v41  ;;  %v693_v22 = vld [vmem:[#allocation2 + $0x98] sm:$0xff]  ;;  %v827_v24 = vld [vmem:[#allocation2 + $0x4c8] sm:$0xff]  ;;  %v692_v27 = vld [vmem:[#allocation2 + $0x90] sm:$0xff] }
 0x25f   :  { %1073 = vmatpush1.bf16.msra.mxu1 %v680_v59  ;;  %v695_v28 = vld [vmem:[#allocation2 + $0xa8] sm:$0xff]  ;;  %v826_v29 = vld [vmem:[#allocation2 + $0x4c0] sm:$0xff]  ;;  %v829_v30 = vld [vmem:[#allocation2 + $0x4d8] sm:$0xff] }
 0x260   :  { %1074 = vmatprep.subr.bf16.mxu1 %v683_v60  ;;  %v694_v31 = vld [vmem:[#allocation2 + $0xa0] sm:$0xff]  ;;  %v697_v32 = vld [vmem:[#allocation2 + $0xb8] sm:$0xff]  ;;  %v828_v33 = vld [vmem:[#allocation2 + $0x4d0] sm:$0xff] }
 0x261   :  { %1239 = vmatpush1.bf16.msra.mxu0 %v810_v53  ;;  %v831_v34 = vld [vmem:[#allocation2 + $0x4e8] sm:$0xff]  ;;  %v696_v37 = vld [vmem:[#allocation2 + $0xb0] sm:$0xff]  ;;  %v830_v38 = vld [vmem:[#allocation2 + $0x4e0] sm:$0xff] }
 0x262   :  { %1240 = vmatprep.subr.bf16.mxu0 %v813_v54  ;;  %v699_v39 = vld [vmem:[#allocation2 + $0xc8] sm:$0xff]  ;;  %v833_v40 = vld [vmem:[#allocation2 + $0x4f8] sm:$0xff]  ;;  %v698_v41 = vld [vmem:[#allocation2 + $0xc0] sm:$0xff] }
 0x263   :  { %1075 = vmatpush1.bf16.msra.mxu1 %v682_v63  ;;  %v832_v42 = vld [vmem:[#allocation2 + $0x4f0] sm:$0xff]  ;;  %v634_v43 = vld [vmem:[%s4406_s0 + $0x40] sm:$0xff]  ;;  %v701_v44 = vld [vmem:[#allocation2 + $0xd8] sm:$0xff] }
 0x264   :  { %1076 = vmatprep.subr.bf16.mxu1 %v685_v0  ;;  %v835_v53 = vld [vmem:[#allocation2 + $0x508] sm:$0xff]  ;;  %v700_v54 = vld [vmem:[#allocation2 + $0xd0] sm:$0xff]  ;;  %v637_v55 = vld [vmem:[%s4406_s0 + $0x58] sm:$0xff]  ;;  %v658_v56 = vpack.c.bf16 %v634_v43, %v634_v43 }
 0x265   :  { %1241 = vmatpush1.bf16.msra.mxu0 %v812_v57  ;;  %v703_v57 = vld [vmem:[#allocation2 + $0xe8] sm:$0xff]  ;;  %v834_v59 = vld [vmem:[#allocation2 + $0x500] sm:$0xff]  ;;  %v837_v60 = vld [vmem:[#allocation2 + $0x518] sm:$0xff] }
 0x266   :  { %1242 = vmatprep.subr.bf16.mxu0 %v815_v58  ;;  %v661_v58 = vpack.c.bf16 %v637_v55, %v637_v55  ;;  %v839_v63 = vld [vmem:[#allocation2 + $0x528] sm:$0xff]  ;;  %v705_v0 = vld [vmem:[#allocation2 + $0xf8] sm:$0xff] }
 0x267   :  { %1077 = vmatpush1.bf16.msra.mxu1 %v684_v7  ;;  %v629_v7 = vld [vmem:[%s4406_s0 + $0x18] sm:$0xff]  ;;  %v723_v55 = vld [vmem:[#allocation2 + $0x188] sm:$0xff] }
 0x268   :  { %1078 = vmatprep.subr.bf16.mxu1 %v687_v8  ;;  %v838_v8 = vld [vmem:[#allocation2 + $0x520] sm:$0xff]  ;;  %v653_v13 = vpack.c.bf16 %v629_v7, %v629_v7  ;;  %v721_v43 = vld [vmem:[#allocation2 + $0x178] sm:$0xff] }
 0x269   :  { %1243 = vmatpush1.bf16.msra.mxu0 %v814_v61  ;;  %v836_v61 = vld [vmem:[#allocation2 + $0x510] sm:$0xff]  ;;  %v729_v7 = vld [vmem:[#allocation2 + $0x1b8] sm:$0xff] }
 0x26a   :  { %1244 = vmatprep.subr.bf16.mxu0 %v817_v62  ;;  %v702_v62 = vld [vmem:[#allocation2 + $0xe0] sm:$0xff] }
 0x26b   :  { %1079 = vmatpush1.bf16.msra.mxu1 %v686_v12  ;;  %v706_v12 = vld [vmem:[#allocation2 + $0x100] sm:$0xff] }
 0x26c   :  { %1080 = vmatprep.subr.bf16.mxu1 %v689_v14  ;;  %v840_v14 = vld [vmem:[#allocation2 + $0x530] sm:$0xff] }
 0x26d   :  { %1245 = vmatpush1.bf16.msra.mxu0 %v816_v1  ;;  %v704_v1 = vld [vmem:[#allocation2 + $0xf0] sm:$0xff] }
 0x26e   :  { %1246 = vmatprep.subr.bf16.mxu0 %v819_v2  ;;  %v626_v2 = vld [vmem:[%s4406_s0] sm:$0xff] }
 0x26f   :  { %1081 = vmatpush1.bf16.msra.mxu1 %v688_v17  ;;  %v650_v11 = vpack.c.bf16 %v626_v2, %v626_v2  ;;  %v708_v17 = vld [vmem:[#allocation2 + $0x110] sm:$0xff] }
 0x270   :  { %1082 = vmatprep.subr.bf16.mxu1 %v691_v18  ;;  %v842_v18 = vld [vmem:[#allocation2 + $0x540] sm:$0xff]  ;;  %v860_v2 = vld [vmem:[#allocation2 + $0x5d0] sm:$0xff] }
 0x271   :  { %1247 = vmatpush1.bf16.msra.mxu0 %v818_v9  ;;  %v707_v9 = vld [vmem:[#allocation2 + $0x108] sm:$0xff] }
 0x272   :  { %1248 = vmatprep.subr.bf16.mxu0 %v821_v10  ;;  %v841_v10 = vld [vmem:[#allocation2 + $0x538] sm:$0xff] }
 0x273   :  { %1083 = vmatpush1.bf16.msra.mxu1 %v690_v21  ;;  %v710_v21 = vld [vmem:[#allocation2 + $0x120] sm:$0xff] }
 0x274   :  { %1084 = vmatprep.subr.bf16.mxu1 %v693_v22  ;;  %v844_v22 = vld [vmem:[#allocation2 + $0x550] sm:$0xff] }
 0x275   :  { %1249 = vmatpush1.bf16.msra.mxu0 %v820_v15  ;;  %v709_v15 = vld [vmem:[#allocation2 + $0x118] sm:$0xff] }
 0x276   :  { %1250 = vmatprep.subr.bf16.mxu0 %v823_v16  ;;  %v843_v16 = vld [vmem:[#allocation2 + $0x548] sm:$0xff] }
 0x277   :  { %1085 = vmatpush1.bf16.msra.mxu1 %v692_v27  ;;  %v712_v27 = vld [vmem:[#allocation2 + $0x130] sm:$0xff] }
 0x278   :  { %1086 = vmatprep.subr.bf16.mxu1 %v695_v28  ;;  %v846_v28 = vld [vmem:[#allocation2 + $0x560] sm:$0xff] }
 0x279   :  { %1251 = vmatpush1.bf16.msra.mxu0 %v822_v19  ;;  %v711_v19 = vld [vmem:[#allocation2 + $0x128] sm:$0xff] }
 0x27a   :  { %1252 = vmatprep.subr.bf16.mxu0 %v825_v20  ;;  %v845_v20 = vld [vmem:[#allocation2 + $0x558] sm:$0xff] }
 0x27b   :  { %1087 = vmatpush1.bf16.msra.mxu1 %v694_v31  ;;  %v714_v31 = vld [vmem:[#allocation2 + $0x140] sm:$0xff] }
 0x27c   :  { %1088 = vmatprep.subr.bf16.mxu1 %v697_v32  ;;  %v848_v32 = vld [vmem:[#allocation2 + $0x570] sm:$0xff] }
 0x27d   :  { %1253 = vmatpush1.bf16.msra.mxu0 %v824_v23  ;;  %v713_v23 = vld [vmem:[#allocation2 + $0x138] sm:$0xff] }
 0x27e   :  { %1254 = vmatprep.subr.bf16.mxu0 %v827_v24  ;;  %v847_v24 = vld [vmem:[#allocation2 + $0x568] sm:$0xff] }
 0x27f   :  { %1089 = vmatpush1.bf16.msra.mxu1 %v696_v37  ;;  %v716_v37 = vld [vmem:[#allocation2 + $0x150] sm:$0xff] }
 0x280   :  { %1090 = vmatprep.subr.bf16.mxu1 %v699_v39  ;;  %v719_v39 = vld [vmem:[#allocation2 + $0x168] sm:$0xff] }
 0x281   :  { %1255 = vmatpush1.bf16.msra.mxu0 %v826_v29  ;;  %v715_v29 = vld [vmem:[#allocation2 + $0x148] sm:$0xff] }
 0x282   :  { %1256 = vmatprep.subr.bf16.mxu0 %v829_v30  ;;  %v849_v30 = vld [vmem:[#allocation2 + $0x578] sm:$0xff] }
 0x283   :  { %1091 = vmatpush1.bf16.msra.mxu1 %v698_v41  ;;  %v718_v41 = vld [vmem:[#allocation2 + $0x160] sm:$0xff] }
 0x284   :  { %1092 = vmatprep.subr.bf16.mxu1 %v701_v44  ;;  %v855_v44 = vld [vmem:[#allocation2 + $0x5a8] sm:$0xff] }
 0x285   :  { %1257 = vmatpush1.bf16.msra.mxu0 %v828_v33  ;;  %v717_v33 = vld [vmem:[#allocation2 + $0x158] sm:$0xff] }
 0x286   :  { %1258 = vmatprep.subr.bf16.mxu0 %v831_v34  ;;  %v851_v34 = vld [vmem:[#allocation2 + $0x588] sm:$0xff] }
 0x287   :  { %1093 = vmatpush1.bf16.msra.mxu1 %v700_v54  ;;  %v854_v54 = vld [vmem:[#allocation2 + $0x5a0] sm:$0xff] }
 0x288   :  { %1094 = vmatprep.subr.bf16.mxu1 %v703_v57  ;;  %v722_v57 = vld [vmem:[#allocation2 + $0x180] sm:$0xff] }
 0x289   :  { %1259 = vmatpush1.bf16.msra.mxu0 %v830_v38  ;;  %v850_v38 = vld [vmem:[#allocation2 + $0x580] sm:$0xff] }
 0x28a   :  { %1260 = vmatprep.subr.bf16.mxu0 %v833_v40  ;;  %v853_v40 = vld [vmem:[#allocation2 + $0x598] sm:$0xff] }
 0x28b   :  { %1095 = vmatpush1.bf16.msra.mxu1 %v702_v62  ;;  %v858_v62 = vld [vmem:[#allocation2 + $0x5c0] sm:$0xff] }
 0x28c   :  { %1096 = vmatprep.subr.bf16.mxu1 %v705_v0  ;;  %v861_v0 = vld [vmem:[#allocation2 + $0x5d8] sm:$0xff] }
 0x28d   :  { %1261 = vmatpush1.bf16.msra.mxu0 %v832_v42  ;;  %v852_v42 = vld [vmem:[#allocation2 + $0x590] sm:$0xff] }
 0x28e   :  { %1271 = vmatprep.subr.bf16.mxu0 %v835_v53  ;;  %v720_v53 = vld [vmem:[#allocation2 + $0x170] sm:$0xff] }
 0x28f   :  { %1097 = vmatpush1.bf16.msra.mxu1 %v704_v1  ;;  %v726_v1 = vld [vmem:[#allocation2 + $0x1a0] sm:$0xff] }
 0x290   :  { %1263 = vmatmul.mubr.bf16.vlgmr.msra.gmra.mrb[8].mxu0 %v658_v56  ;;  %1107 = vmatprep.subr.bf16.mxu1 %v707_v9  ;;  %v857_v56 = vld [vmem:[#allocation2 + $0x5b8] sm:$0xff]  ;;  %v728_v9 = vld [vmem:[#allocation2 + $0x1b0] sm:$0xff] }
 0x291   :  { %1272 = vmatpush1.bf16.msra.mxu0 %v834_v59  ;;  %1303 = vmatprep.mubr.bf16.mxu0 %v661_v58  ;;  %v856_v58 = vld [vmem:[#allocation2 + $0x5b0] sm:$0xff]  ;;  %v725_v59 = vld [vmem:[#allocation2 + $0x198] sm:$0xff] }
 0x292   :  { %1273 = vmatprep.subr.bf16.mxu0 %v837_v60  ;;  %1099 = vmatmul.mubr.bf16.vlgmr.msra.gmra.mrb[0].mxu1 %v650_v11  ;;  %v859_v60 = vld [vmem:[#allocation2 + $0x5c8] sm:$0xff]  ;;  %v862_v11 = vld [vmem:[#allocation2 + $0x5e0] sm:$0xff] }
 0x293   :  { %1108 = vmatpush1.bf16.msra.mxu1 %v706_v12  ;;  %1139 = vmatprep.mubr.bf16.mxu1 %v653_v13  ;;  %v865_v12 = vld [vmem:[#allocation2 + $0x5f8] sm:$0xff]  ;;  %v730_v13 = vld [vmem:[#allocation2 + $0x1c0] sm:$0xff] }
 0x294   :  { %1109 = vmatprep.subr.bf16.mxu1 %v709_v15  ;;  %v733_v15 = vld [vmem:[#allocation2 + $0x1d8] sm:$0xff] }
 0x295   :  { %1274 = vmatpush1.bf16.msra.mxu0 %v836_v61  ;;  %v724_v61 = vld [vmem:[#allocation2 + $0x190] sm:$0xff] }
 0x296   :  { %1275 = vmatprep.subr.bf16.mxu0 %v839_v63  ;;  %v727_v63 = vld [vmem:[#allocation2 + $0x1a8] sm:$0xff] }
 0x297   :  { %1110 = vmatpush1.bf16.msra.mxu1 %v708_v17  ;;  %v639_v17 = vld [vmem:[%s4406_s0 + $0x68] sm:$0xff] }
 0x298   :  { %1111 = vmatprep.subr.bf16.mxu1 %v711_v19 }
 0x299   :  { %1276 = vmatpush1.bf16.msra.mxu0 %v838_v8  ;;  %v863_v8 = vld [vmem:[#allocation2 + $0x5e8] sm:$0xff] }
 0x29a   :  { %1277 = vmatprep.subr.bf16.mxu0 %v841_v10  ;;  %v731_v10 = vld [vmem:[#allocation2 + $0x1c8] sm:$0xff] }
 0x29b   :  { %1112 = vmatpush1.bf16.msra.mxu1 %v710_v21  ;;  %v735_v21 = vld [vmem:[#allocation2 + $0x1e8] sm:$0xff] }
 0x29c   :  { %1113 = vmatprep.subr.bf16.mxu1 %v713_v23  ;;  %v866_v23 = vld [vmem:[#allocation2 + $0x600] sm:$0xff] }
 0x29d   :  { %1278 = vmatpush1.bf16.msra.mxu0 %v840_v14  ;;  %v636_v14 = vld [vmem:[%s4406_s0 + $0x50] sm:$0xff] }
 0x29e   :  { %1279 = vmatprep.subr.bf16.mxu0 %v843_v16  ;;  %v864_v16 = vld [vmem:[#allocation2 + $0x5f0] sm:$0xff]  ;;  %v660_v19 = vpack.c.bf16 %v636_v14, %v636_v14  ;;  %v753_v14 = vld [vmem:[#allocation2 + $0x278] sm:$0xff] }
 0x29f   :  { %1114 = vmatpush1.bf16.msra.mxu1 %v712_v27  ;;  %v734_v27 = vld [vmem:[#allocation2 + $0x1e0] sm:$0xff] }
 0x2a0   :  { %1115 = vmatprep.subr.bf16.mxu1 %v715_v29  ;;  %v868_v29 = vld [vmem:[#allocation2 + $0x610] sm:$0xff] }
 0x2a1   :  { %1280 = vmatpush1.bf16.msra.mxu0 %v842_v18  ;;  %v867_v18 = vld [vmem:[#allocation2 + $0x608] sm:$0xff] }
 0x2a2   :  { %1281 = vmatprep.subr.bf16.mxu0 %v845_v20  ;;  %v732_v20 = vld [vmem:[#allocation2 + $0x1d0] sm:$0xff] }
 0x2a3   :  { %1116 = vmatpush1.bf16.msra.mxu1 %v714_v31  ;;  %v628_v31 = vld [vmem:[%s4406_s0 + $0x10] sm:$0xff] }
 0x2a4   :  { %1117 = vmatprep.subr.bf16.mxu1 %v717_v33  ;;  %v631_v33 = vld [vmem:[%s4406_s0 + $0x28] sm:$0xff] }
 0x2a5   :  { %1282 = vmatpush1.bf16.msra.mxu0 %v844_v22  ;;  %v663_v22 = vpack.c.bf16 %v639_v17, %v639_v17  ;;  %v752_v17 = vld [vmem:[#allocation2 + $0x270] sm:$0xff] }
 0x2a6   :  { %1283 = vmatprep.subr.bf16.mxu0 %v847_v24  ;;  %v869_v24 = vld [vmem:[#allocation2 + $0x618] sm:$0xff] }
 0x2a7   :  { %1118 = vmatpush1.bf16.msra.mxu1 %v716_v37  ;;  %v870_v37 = vld [vmem:[#allocation2 + $0x620] sm:$0xff] }
 0x2a8   :  { %1119 = vmatprep.subr.bf16.mxu1 %v719_v39  ;;  %v873_v39 = vld [vmem:[#allocation2 + $0x638] sm:$0xff] }
 0x2a9   :  { %1284 = vmatpush1.bf16.msra.mxu0 %v846_v28  ;;  %v737_v28 = vld [vmem:[#allocation2 + $0x1f8] sm:$0xff] }
 0x2aa   :  { %1285 = vmatprep.subr.bf16.mxu0 %v849_v30  ;;  %v871_v30 = vld [vmem:[#allocation2 + $0x628] sm:$0xff] }
 0x2ab   :  { %1120 = vmatpush1.bf16.msra.mxu1 %v718_v41  ;;  %v738_v41 = vld [vmem:[#allocation2 + $0x200] sm:$0xff] }
 0x2ac   :  { %1121 = vmatprep.subr.bf16.mxu1 %v721_v43  ;;  %v872_v43 = vld [vmem:[#allocation2 + $0x630] sm:$0xff] }
 0x2ad   :  { %1286 = vmatpush1.bf16.msra.mxu0 %v848_v32  ;;  %v736_v32 = vld [vmem:[#allocation2 + $0x1f0] sm:$0xff] }
 0x2ae   :  { %1287 = vmatprep.subr.bf16.mxu0 %v851_v34  ;;  %v739_v34 = vld [vmem:[#allocation2 + $0x208] sm:$0xff] }
 0x2af   :  { %1122 = vmatpush1.bf16.msra.mxu1 %v720_v53  ;;  %v740_v53 = vld [vmem:[#allocation2 + $0x210] sm:$0xff] }
 0x2b0   :  { %1123 = vmatprep.subr.bf16.mxu1 %v723_v55  ;;  %v874_v55 = vld [vmem:[#allocation2 + $0x640] sm:$0xff] }
 0x2b1   :  { %1288 = vmatpush1.bf16.msra.mxu0 %v850_v38  ;;  %v652_v38 = vpack.c.bf16 %v628_v31, %v628_v31  ;;  %v758_v31 = vld [vmem:[#allocation2 + $0x2a0] sm:$0xff] }
 0x2b2   :  { %1289 = vmatprep.subr.bf16.mxu0 %v853_v40  ;;  %v655_v40 = vpack.c.bf16 %v631_v33, %v631_v33  ;;  %v892_v33 = vld [vmem:[#allocation2 + $0x6d0] sm:$0xff] }
 0x2b3   :  { %1124 = vmatpush1.bf16.msra.mxu1 %v722_v57  ;;  %v742_v57 = vld [vmem:[#allocation2 + $0x220] sm:$0xff] }
 0x2b4   :  { %1125 = vmatprep.subr.bf16.mxu1 %v725_v59  ;;  %v876_v59 = vld [vmem:[#allocation2 + $0x650] sm:$0xff] }
 0x2b5   :  { %1290 = vmatpush1.bf16.msra.mxu0 %v852_v42  ;;  %v741_v42 = vld [vmem:[#allocation2 + $0x218] sm:$0xff] }
 0x2b6   :  { %1291 = vmatprep.subr.bf16.mxu0 %v855_v44  ;;  %v875_v44 = vld [vmem:[#allocation2 + $0x648] sm:$0xff] }
 0x2b7   :  { %1126 = vmatpush1.bf16.msra.mxu1 %v724_v61  ;;  %v744_v61 = vld [vmem:[#allocation2 + $0x230] sm:$0xff] }
 0x2b8   :  { %1127 = vmatprep.subr.bf16.mxu1 %v727_v63  ;;  %v878_v63 = vld [vmem:[#allocation2 + $0x660] sm:$0xff] }
 0x2b9   :  { %1292 = vmatpush1.bf16.msra.mxu0 %v854_v54  ;;  %v743_v54 = vld [vmem:[#allocation2 + $0x228] sm:$0xff] }
 0x2ba   :  { %1293 = vmatprep.subr.bf16.mxu0 %v857_v56  ;;  %v877_v56 = vld [vmem:[#allocation2 + $0x658] sm:$0xff] }
 0x2bb   :  { %1128 = vmatpush1.bf16.msra.mxu1 %v726_v1  ;;  %v746_v1 = vld [vmem:[#allocation2 + $0x240] sm:$0xff] }
 0x2bc   :  { %1129 = vmatprep.subr.bf16.mxu1 %v729_v7  ;;  %v880_v7 = vld [vmem:[#allocation2 + $0x670] sm:$0xff] }
 0x2bd   :  { %1294 = vmatpush1.bf16.msra.mxu0 %v856_v58  ;;  %v745_v58 = vld [vmem:[#allocation2 + $0x238] sm:$0xff] }
 0x2be   :  { %1295 = vmatprep.subr.bf16.mxu0 %v859_v60  ;;  %v879_v60 = vld [vmem:[#allocation2 + $0x668] sm:$0xff] }
 0x2bf   :  { %1130 = vmatpush1.bf16.msra.mxu1 %v728_v9  ;;  %v748_v9 = vld [vmem:[#allocation2 + $0x250] sm:$0xff] }
 0x2c0   :  { %1131 = vmatprep.subr.bf16.mxu1 %v731_v10  ;;  %v751_v10 = vld [vmem:[#allocation2 + $0x268] sm:$0xff] }
 0x2c1   :  { %1296 = vmatpush1.bf16.msra.mxu0 %v858_v62  ;;  %v747_v62 = vld [vmem:[#allocation2 + $0x248] sm:$0xff] }
 0x2c2   :  { %1297 = vmatprep.subr.bf16.mxu0 %v861_v0  ;;  %v881_v0 = vld [vmem:[#allocation2 + $0x678] sm:$0xff] }
 0x2c3   :  { %1132 = vmatpush1.bf16.msra.mxu1 %v730_v13  ;;  %v750_v13 = vld [vmem:[#allocation2 + $0x260] sm:$0xff] }
 0x2c4   :  { %1133 = vmatprep.subr.bf16.mxu1 %v733_v15  ;;  %v884_v15 = vld [vmem:[#allocation2 + $0x690] sm:$0xff] }
 0x2c5   :  { %1298 = vmatpush1.bf16.msra.mxu0 %v860_v2  ;;  %v749_v2 = vld [vmem:[#allocation2 + $0x258] sm:$0xff] }
 0x2c6   :  { %1299 = vmatprep.subr.bf16.mxu0 %v863_v8  ;;  %v883_v8 = vld [vmem:[#allocation2 + $0x688] sm:$0xff] }
 0x2c7   :  { %1134 = vmatpush1.bf16.msra.mxu1 %v732_v20  ;;  %v889_v20 = vld [vmem:[#allocation2 + $0x6b8] sm:$0xff] }
 0x2c8   :  { %1135 = vmatprep.subr.bf16.mxu1 %v735_v21  ;;  %v754_v21 = vld [vmem:[#allocation2 + $0x280] sm:$0xff] }
 0x2c9   :  { %1300 = vmatpush1.bf16.msra.mxu0 %v862_v11  ;;  %v882_v11 = vld [vmem:[#allocation2 + $0x680] sm:$0xff] }
 0x2ca   :  { %1301 = vmatprep.subr.bf16.mxu0 %v865_v12  ;;  %v885_v12 = vld [vmem:[#allocation2 + $0x698] sm:$0xff] }
 0x2cb   :  { %1136 = vmatpush1.bf16.msra.mxu1 %v734_v27  ;;  %v756_v27 = vld [vmem:[#allocation2 + $0x290] sm:$0xff] }
 0x2cc   :  { %1137 = vmatprep.subr.bf16.mxu1 %v737_v28  ;;  %v759_v28 = vld [vmem:[#allocation2 + $0x2a8] sm:$0xff] }
 0x2cd   :  { %1302 = vmatpush1.bf16.msra.mxu0 %v864_v16  ;;  %v887_v16 = vld [vmem:[#allocation2 + $0x6a8] sm:$0xff] }
 0x2ce   :  { %1312 = vmatprep.subr.bf16.mxu0 %v867_v18  ;;  %v755_v18 = vld [vmem:[#allocation2 + $0x288] sm:$0xff] }
 0x2cf   :  { %1138 = vmatpush1.bf16.msra.mxu1 %v736_v32  ;;  %v761_v32 = vld [vmem:[#allocation2 + $0x2b8] sm:$0xff] }
 0x2d0   :  { %1304 = vmatmul.mubr.bf16.vlgmr.msra.gmra.mrb[8].mxu0 %v660_v19  ;;  %1148 = vmatprep.subr.bf16.mxu1 %v739_v34  ;;  %v886_v19 = vld [vmem:[#allocation2 + $0x6a0] sm:$0xff]  ;;  %v895_v34 = vld [vmem:[#allocation2 + $0x6e8] sm:$0xff] }
 0x2d1   :  { %1313 = vmatpush1.bf16.msra.mxu0 %v866_v23  ;;  %1344 = vmatprep.mubr.bf16.mxu0 %v663_v22  ;;  %v757_v22 = vld [vmem:[#allocation2 + $0x298] sm:$0xff]  ;;  %v888_v23 = vld [vmem:[#allocation2 + $0x6b0] sm:$0xff] }
 0x2d2   :  { %1314 = vmatprep.subr.bf16.mxu0 %v869_v24  ;;  %1140 = vmatmul.mubr.bf16.vlgmr.msra.gmra.mrb[0].mxu1 %v652_v38  ;;  %v891_v24 = vld [vmem:[#allocation2 + $0x6c8] sm:$0xff] }
 0x2d3   :  { %1149 = vmatpush1.bf16.msra.mxu1 %v738_v41  ;;  %1180 = vmatprep.mubr.bf16.mxu1 %v655_v40  ;;  %v763_v38 = vld [vmem:[#allocation2 + $0x2c8] sm:$0xff]  ;;  %v897_v40 = vld [vmem:[#allocation2 + $0x6f8] sm:$0xff]  ;;  %v762_v41 = vld [vmem:[#allocation2 + $0x2c0] sm:$0xff] }
 0x2d4   :  { %1150 = vmatprep.subr.bf16.mxu1 %v741_v42  ;;  %v638_v42 = vld [vmem:[%s4406_s0 + $0x60] sm:$0xff] }
 0x2d5   :  { %1315 = vmatpush1.bf16.msra.mxu0 %v868_v29  ;;  %v890_v29 = vld [vmem:[#allocation2 + $0x6c0] sm:$0xff] }
 0x2d6   :  { %1316 = vmatprep.subr.bf16.mxu0 %v871_v30  ;;  %v893_v30 = vld [vmem:[#allocation2 + $0x6d8] sm:$0xff] }
 0x2d7   :  { %1151 = vmatpush1.bf16.msra.mxu1 %v740_v53  ;;  %v641_v53 = vld [vmem:[%s4406_s0 + $0x78] sm:$0xff] }
 0x2d8   :  { %1152 = vmatprep.subr.bf16.mxu1 %v743_v54  ;;  %v899_v54 = vld [vmem:[#allocation2 + $0x708] sm:$0xff] }
 0x2d9   :  { %1317 = vmatpush1.bf16.msra.mxu0 %v870_v37  ;;  %v760_v37 = vld [vmem:[#allocation2 + $0x2b0] sm:$0xff] }
 0x2da   :  { %1318 = vmatprep.subr.bf16.mxu0 %v873_v39  ;;  %v894_v39 = vld [vmem:[#allocation2 + $0x6e0] sm:$0xff] }
 0x2db   :  { %1153 = vmatpush1.bf16.msra.mxu1 %v742_v57  ;;  %v767_v57 = vld [vmem:[#allocation2 + $0x2e8] sm:$0xff] }
 0x2dc   :  { %1154 = vmatprep.subr.bf16.mxu1 %v745_v58  ;;  %v665_v58 = vpack.c.bf16 %v641_v53, %v641_v53  ;;  %v784_v53 = vld [vmem:[#allocation2 + $0x370] sm:$0xff] }
 0x2dd   :  { %1319 = vmatpush1.bf16.msra.mxu0 %v872_v43  ;;  %v765_v43 = vld [vmem:[#allocation2 + $0x2d8] sm:$0xff] }
 0x2de   :  { %1320 = vmatprep.subr.bf16.mxu0 %v875_v44  ;;  %v896_v44 = vld [vmem:[#allocation2 + $0x6f0] sm:$0xff] }
 0x2df   :  { %1155 = vmatpush1.bf16.msra.mxu1 %v744_v61  ;;  %v766_v61 = vld [vmem:[#allocation2 + $0x2e0] sm:$0xff] }
 0x2e0   :  { %1156 = vmatprep.subr.bf16.mxu1 %v747_v62  ;;  %v769_v62 = vld [vmem:[#allocation2 + $0x2f8] sm:$0xff] }
 0x2e1   :  { %1321 = vmatpush1.bf16.msra.mxu0 %v874_v55  ;;  %v662_v55 = vpack.c.bf16 %v638_v42, %v638_v42  ;;  %v785_v42 = vld [vmem:[#allocation2 + $0x378] sm:$0xff] }
 0x2e2   :  { %1322 = vmatprep.subr.bf16.mxu0 %v877_v56  ;;  %v764_v56 = vld [vmem:[#allocation2 + $0x2d0] sm:$0xff] }
 0x2e3   :  { %1157 = vmatpush1.bf16.msra.mxu1 %v746_v1  ;;  %v630_v1 = vld [vmem:[%s4406_s0 + $0x20] sm:$0xff] }
 0x2e4   :  { %1158 = vmatprep.subr.bf16.mxu1 %v749_v2  ;;  %v768_v2 = vld [vmem:[#allocation2 + $0x2f0] sm:$0xff] }
 0x2e5   :  { %1323 = vmatpush1.bf16.msra.mxu0 %v876_v59  ;;  %v898_v59 = vld [vmem:[#allocation2 + $0x700] sm:$0xff] }
 0x2e6   :  { %1324 = vmatprep.subr.bf16.mxu0 %v879_v60  ;;  %v901_v60 = vld [vmem:[#allocation2 + $0x718] sm:$0xff] }
 0x2e7   :  { %1159 = vmatpush1.bf16.msra.mxu1 %v748_v9  ;;  %v902_v9 = vld [vmem:[#allocation2 + $0x720] sm:$0xff] }
 0x2e8   :  { %1160 = vmatprep.subr.bf16.mxu1 %v751_v10  ;;  %v654_v10 = vpack.c.bf16 %v630_v1, %v630_v1  ;;  %v790_v1 = vld [vmem:[#allocation2 + $0x3a0] sm:$0xff] }
 0x2e9   :  { %1325 = vmatpush1.bf16.msra.mxu0 %v878_v63  ;;  %v900_v63 = vld [vmem:[#allocation2 + $0x710] sm:$0xff] }
 0x2ea   :  { %1326 = vmatprep.subr.bf16.mxu0 %v881_v0  ;;  %v903_v0 = vld [vmem:[#allocation2 + $0x728] sm:$0xff] }
 0x2eb   :  { %1161 = vmatpush1.bf16.msra.mxu1 %v750_v13  ;;  %v770_v13 = vld [vmem:[#allocation2 + $0x300] sm:$0xff] }
 0x2ec   :  { %1162 = vmatprep.subr.bf16.mxu1 %v753_v14  ;;  %v773_v14 = vld [vmem:[#allocation2 + $0x318] sm:$0xff] }
 0x2ed   :  { %1327 = vmatpush1.bf16.msra.mxu0 %v880_v7  ;;  %v633_v7 = vld [vmem:[%s4406_s0 + $0x38] sm:$0xff] }
 0x2ee   :  { %1328 = vmatprep.subr.bf16.mxu0 %v883_v8  ;;  %v771_v8 = vld [vmem:[#allocation2 + $0x308] sm:$0xff] }
 0x2ef   :  { %1163 = vmatpush1.bf16.msra.mxu1 %v752_v17  ;;  %v772_v17 = vld [vmem:[#allocation2 + $0x310] sm:$0xff] }
 0x2f0   :  { %1164 = vmatprep.subr.bf16.mxu1 %v755_v18  ;;  %v775_v18 = vld [vmem:[#allocation2 + $0x328] sm:$0xff] }
 0x2f1   :  { %1329 = vmatpush1.bf16.msra.mxu0 %v882_v11  ;;  %v905_v11 = vld [vmem:[#allocation2 + $0x738] sm:$0xff] }
 0x2f2   :  { %1330 = vmatprep.subr.bf16.mxu0 %v885_v12  ;;  %v657_v12 = vpack.c.bf16 %v633_v7, %v633_v7  ;;  %v924_v7 = vld [vmem:[#allocation2 + $0x7d0] sm:$0xff] }
 0x2f3   :  { %1165 = vmatpush1.bf16.msra.mxu1 %v754_v21  ;;  %v774_v21 = vld [vmem:[#allocation2 + $0x320] sm:$0xff] }
 0x2f4   :  { %1166 = vmatprep.subr.bf16.mxu1 %v757_v22  ;;  %v777_v22 = vld [vmem:[#allocation2 + $0x338] sm:$0xff] }
 0x2f5   :  { %1331 = vmatpush1.bf16.msra.mxu0 %v884_v15  ;;  %v904_v15 = vld [vmem:[#allocation2 + $0x730] sm:$0xff] }
 0x2f6   :  { %1332 = vmatprep.subr.bf16.mxu0 %v887_v16  ;;  %v907_v16 = vld [vmem:[#allocation2 + $0x748] sm:$0xff] }
 0x2f7   :  { %1167 = vmatpush1.bf16.msra.mxu1 %v756_v27  ;;  %v776_v27 = vld [vmem:[#allocation2 + $0x330] sm:$0xff] }
 0x2f8   :  { %1168 = vmatprep.subr.bf16.mxu1 %v759_v28  ;;  %v779_v28 = vld [vmem:[#allocation2 + $0x348] sm:$0xff] }
 0x2f9   :  { %1333 = vmatpush1.bf16.msra.mxu0 %v886_v19  ;;  %v906_v19 = vld [vmem:[#allocation2 + $0x740] sm:$0xff] }
 0x2fa   :  { %1334 = vmatprep.subr.bf16.mxu0 %v889_v20  ;;  %v909_v20 = vld [vmem:[#allocation2 + $0x758] sm:$0xff] }
 0x2fb   :  { %1169 = vmatpush1.bf16.msra.mxu1 %v758_v31  ;;  %v778_v31 = vld [vmem:[#allocation2 + $0x340] sm:$0xff] }
 0x2fc   :  { %1170 = vmatprep.subr.bf16.mxu1 %v761_v32  ;;  %v781_v32 = vld [vmem:[#allocation2 + $0x358] sm:$0xff] }
 0x2fd   :  { %1335 = vmatpush1.bf16.msra.mxu0 %v888_v23  ;;  %v908_v23 = vld [vmem:[#allocation2 + $0x750] sm:$0xff] }
 0x2fe   :  { %1336 = vmatprep.subr.bf16.mxu0 %v891_v24  ;;  %v911_v24 = vld [vmem:[#allocation2 + $0x768] sm:$0xff] }
 0x2ff   :  { %1171 = vmatpush1.bf16.msra.mxu1 %v760_v37  ;;  %v780_v37 = vld [vmem:[#allocation2 + $0x350] sm:$0xff] }
 0x300   :  { %1172 = vmatprep.subr.bf16.mxu1 %v763_v38  ;;  %v783_v38 = vld [vmem:[#allocation2 + $0x368] sm:$0xff] }
 0x301   :  { %1337 = vmatpush1.bf16.msra.mxu0 %v890_v29  ;;  %v910_v29 = vld [vmem:[#allocation2 + $0x760] sm:$0xff] }
 0x302   :  { %1338 = vmatprep.subr.bf16.mxu0 %v893_v30  ;;  %v913_v30 = vld [vmem:[#allocation2 + $0x778] sm:$0xff] }
 0x303   :  { %1173 = vmatpush1.bf16.msra.mxu1 %v762_v41  ;;  %v782_v41 = vld [vmem:[#allocation2 + $0x360] sm:$0xff] }
 0x304   :  { %1174 = vmatprep.subr.bf16.mxu1 %v765_v43  ;;  %v916_v43 = vld [vmem:[#allocation2 + $0x790] sm:$0xff] }
 0x305   :  { %1339 = vmatpush1.bf16.msra.mxu0 %v892_v33  ;;  %v912_v33 = vld [vmem:[#allocation2 + $0x770] sm:$0xff] }
 0x306   :  { %1340 = vmatprep.subr.bf16.mxu0 %v895_v34  ;;  %v915_v34 = vld [vmem:[#allocation2 + $0x788] sm:$0xff] }
 0x307   :  { %1175 = vmatpush1.bf16.msra.mxu1 %v764_v56  ;;  %v921_v56 = vld [vmem:[#allocation2 + $0x7b8] sm:$0xff] }
 0x308   :  { %1176 = vmatprep.subr.bf16.mxu1 %v767_v57  ;;  %v786_v57 = vld [vmem:[#allocation2 + $0x380] sm:$0xff] }
 0x309   :  { %1341 = vmatpush1.bf16.msra.mxu0 %v894_v39  ;;  %v914_v39 = vld [vmem:[#allocation2 + $0x780] sm:$0xff] }
 0x30a   :  { %1342 = vmatprep.subr.bf16.mxu0 %v897_v40  ;;  %v917_v40 = vld [vmem:[#allocation2 + $0x798] sm:$0xff] }
 0x30b   :  { %1177 = vmatpush1.bf16.msra.mxu1 %v766_v61  ;;  %v788_v61 = vld [vmem:[#allocation2 + $0x390] sm:$0xff] }
 0x30c   :  { %1178 = vmatprep.subr.bf16.mxu1 %v769_v62  ;;  %v791_v62 = vld [vmem:[#allocation2 + $0x3a8] sm:$0xff] }
 0x30d   :  { %1343 = vmatpush1.bf16.msra.mxu0 %v896_v44  ;;  %v919_v44 = vld [vmem:[#allocation2 + $0x7a8] sm:$0xff] }
 0x30e   :  { %1353 = vmatprep.subr.bf16.mxu0 %v899_v54  ;;  %v787_v54 = vld [vmem:[#allocation2 + $0x388] sm:$0xff] }
 0x30f   :  { %1179 = vmatpush1.bf16.msra.mxu1 %v768_v2  ;;  %v793_v2 = vld [vmem:[#allocation2 + $0x3b8] sm:$0xff] }
 0x310   :  { %1345 = vmatmul.mubr.bf16.vlgmr.msra.gmra.mrb[8].mxu0 %v662_v55  ;;  %1189 = vmatprep.subr.bf16.mxu1 %v771_v8  ;;  %v918_v55 = vld [vmem:[#allocation2 + $0x7a0] sm:$0xff]  ;;  %v927_v8 = vld [vmem:[#allocation2 + $0x7e8] sm:$0xff] }
 0x311   :  { %1354 = vmatpush1.bf16.msra.mxu0 %v898_v59  ;;  %1385 = vmatprep.mubr.bf16.mxu0 %v665_v58  ;;  %v789_v58 = vld [vmem:[#allocation2 + $0x398] sm:$0xff]  ;;  %v920_v59 = vld [vmem:[#allocation2 + $0x7b0] sm:$0xff] }
 0x312   :  { %1355 = vmatprep.subr.bf16.mxu0 %v901_v60  ;;  %1181 = vmatmul.mubr.bf16.vlgmr.msra.gmra.mrb[0].mxu1 %v654_v10  ;;  %v923_v60 = vld [vmem:[#allocation2 + $0x7c8] sm:$0xff] }
 0x313   :  { %1190 = vmatpush1.bf16.msra.mxu1 %v770_v13  ;;  %1221 = vmatprep.mubr.bf16.mxu1 %v657_v12  ;;  %v795_v10 = vld [vmem:[#allocation2 + $0x3c8] sm:$0xff]  ;;  %v929_v12 = vld [vmem:[#allocation2 + $0x7f8] sm:$0xff]  ;;  %v794_v13 = vld [vmem:[#allocation2 + $0x3c0] sm:$0xff] }
 0x314   :  { %1191 = vmatprep.subr.bf16.mxu1 %v773_v14  ;;  %v640_v14 = vld [vmem:[%s4406_s0 + $0x70] sm:$0xff] }
 0x315   :  { %1356 = vmatpush1.bf16.msra.mxu0 %v900_v63  ;;  %v922_v63 = vld [vmem:[#allocation2 + $0x7c0] sm:$0xff] }
 0x316   :  { %1357 = vmatprep.subr.bf16.mxu0 %v903_v0  ;;  %v925_v0 = vld [vmem:[#allocation2 + $0x7d8] sm:$0xff] }
 0x317   :  { %1192 = vmatpush1.bf16.msra.mxu1 %v772_v17  ;;  %v643_v17 = vld [vmem:[%s4406_s0 + $0x88] sm:$0xff] }
 0x318   :  { %1193 = vmatprep.subr.bf16.mxu1 %v775_v18  ;;  %v931_v18 = vld [vmem:[#allocation2 + $0x808] sm:$0xff] }
 0x319   :  { %1358 = vmatpush1.bf16.msra.mxu0 %v902_v9  ;;  %v792_v9 = vld [vmem:[#allocation2 + $0x3b0] sm:$0xff] }
 0x31a   :  { %1359 = vmatprep.subr.bf16.mxu0 %v905_v11  ;;  %v926_v11 = vld [vmem:[#allocation2 + $0x7e0] sm:$0xff] }
 0x31b   :  { %1194 = vmatpush1.bf16.msra.mxu1 %v774_v21  ;;  %v799_v21 = vld [vmem:[#allocation2 + $0x3e8] sm:$0xff] }
 0x31c   :  { %1195 = vmatprep.subr.bf16.mxu1 %v777_v22  ;;  %v667_v22 = vpack.c.bf16 %v643_v17, %v643_v17  ;;  %v965_v17 = vld [vmem:[#allocation2 + $0x918] sm:$0xff] }
 0x31d   :  { %1360 = vmatpush1.bf16.msra.mxu0 %v904_v15  ;;  %v797_v15 = vld [vmem:[#allocation2 + $0x3d8] sm:$0xff] }
 0x31e   :  { %1361 = vmatprep.subr.bf16.mxu0 %v907_v16  ;;  %v928_v16 = vld [vmem:[#allocation2 + $0x7f0] sm:$0xff] }
 0x31f   :  { %1196 = vmatpush1.bf16.msra.mxu1 %v776_v27  ;;  %v798_v27 = vld [vmem:[#allocation2 + $0x3e0] sm:$0xff] }
 0x320   :  { %1197 = vmatprep.subr.bf16.mxu1 %v779_v28  ;;  %v801_v28 = vld [vmem:[#allocation2 + $0x3f8] sm:$0xff] }
 0x321   :  { %1362 = vmatpush1.bf16.msra.mxu0 %v906_v19  ;;  %v664_v19 = vpack.c.bf16 %v640_v14, %v640_v14 }
 0x322   :  { %1363 = vmatprep.subr.bf16.mxu0 %v909_v20  ;;  %v796_v20 = vld [vmem:[#allocation2 + $0x3d0] sm:$0xff] }
 0x323   :  { %1198 = vmatpush1.bf16.msra.mxu1 %v778_v31  ;;  %v632_v31 = vld [vmem:[%s4406_s0 + $0x30] sm:$0xff] }
 0x324   :  { %1199 = vmatprep.subr.bf16.mxu1 %v781_v32  ;;  %v800_v32 = vld [vmem:[#allocation2 + $0x3f0] sm:$0xff] }
 0x325   :  { %1364 = vmatpush1.bf16.msra.mxu0 %v908_v23  ;;  %v930_v23 = vld [vmem:[#allocation2 + $0x800] sm:$0xff] }
 0x326   :  { %1365 = vmatprep.subr.bf16.mxu0 %v911_v24  ;;  %v933_v24 = vld [vmem:[#allocation2 + $0x818] sm:$0xff] }
 0x327   :  { %1200 = vmatpush1.bf16.msra.mxu1 %v780_v37  ;;  %v937_v37 = vld [vmem:[#allocation2 + $0x838] sm:$0xff] }
 0x328   :  { %1201 = vmatprep.subr.bf16.mxu1 %v783_v38  ;;  %v936_v38 = vld [vmem:[#allocation2 + $0x830] sm:$0xff] }
 0x329   :  { %1366 = vmatpush1.bf16.msra.mxu0 %v910_v29  ;;  %v932_v29 = vld [vmem:[#allocation2 + $0x810] sm:$0xff] }
 0x32a   :  { %1367 = vmatprep.subr.bf16.mxu0 %v913_v30  ;;  %v935_v30 = vld [vmem:[#allocation2 + $0x828] sm:$0xff] }
 0x32b   :  { %1202 = vmatpush1.bf16.msra.mxu1 %v782_v41  ;;  %v941_v41 = vld [vmem:[#allocation2 + $0x858] sm:$0xff] }
 0x32c   :  { %1203 = vmatprep.subr.bf16.mxu1 %v785_v42  ;;  %v940_v42 = vld [vmem:[#allocation2 + $0x850] sm:$0xff] }
 0x32d   :  { %1368 = vmatpush1.bf16.msra.mxu0 %v912_v33  ;;  %v934_v33 = vld [vmem:[#allocation2 + $0x820] sm:$0xff] }
 0x32e   :  { %1369 = vmatprep.subr.bf16.mxu0 %v915_v34  ;;  %v656_v34 = vpack.c.bf16 %v632_v31, %v632_v31  ;;  %v977_v31 = vld [vmem:[#allocation2 + $0x978] sm:$0xff] }
 0x32f   :  { %1204 = vmatpush1.bf16.msra.mxu1 %v784_v53  ;;  %v945_v53 = vld [vmem:[#allocation2 + $0x878] sm:$0xff] }
 0x330   :  { %1205 = vmatprep.subr.bf16.mxu1 %v787_v54  ;;  %v944_v54 = vld [vmem:[#allocation2 + $0x870] sm:$0xff] }
 0x331   :  { %1370 = vmatpush1.bf16.msra.mxu0 %v914_v39  ;;  %v939_v39 = vld [vmem:[#allocation2 + $0x848] sm:$0xff] }
 0x332   :  { %1371 = vmatprep.subr.bf16.mxu0 %v917_v40  ;;  %v938_v40 = vld [vmem:[#allocation2 + $0x840] sm:$0xff] }
 0x333   :  { %1206 = vmatpush1.bf16.msra.mxu1 %v786_v57  ;;  %v949_v57 = vld [vmem:[#allocation2 + $0x898] sm:$0xff] }
 0x334   :  { %1207 = vmatprep.subr.bf16.mxu1 %v789_v58  ;;  %v948_v58 = vld [vmem:[#allocation2 + $0x890] sm:$0xff] }
 0x335   :  { %1372 = vmatpush1.bf16.msra.mxu0 %v916_v43  ;;  %v943_v43 = vld [vmem:[#allocation2 + $0x868] sm:$0xff] }
 0x336   :  { %1373 = vmatprep.subr.bf16.mxu0 %v919_v44  ;;  %v942_v44 = vld [vmem:[#allocation2 + $0x860] sm:$0xff] }
 0x337   :  { %1208 = vmatpush1.bf16.msra.mxu1 %v788_v61  ;;  %v953_v61 = vld [vmem:[#allocation2 + $0x8b8] sm:$0xff] }
 0x338   :  { %1209 = vmatprep.subr.bf16.mxu1 %v791_v62  ;;  %v952_v62 = vld [vmem:[#allocation2 + $0x8b0] sm:$0xff] }
 0x339   :  { %1374 = vmatpush1.bf16.msra.mxu0 %v918_v55  ;;  %v947_v55 = vld [vmem:[#allocation2 + $0x888] sm:$0xff] }
 0x33a   :  { %1375 = vmatprep.subr.bf16.mxu0 %v921_v56  ;;  %v946_v56 = vld [vmem:[#allocation2 + $0x880] sm:$0xff] }
 0x33b   :  { %1210 = vmatpush1.bf16.msra.mxu1 %v790_v1  ;;  %v957_v1 = vld [vmem:[#allocation2 + $0x8d8] sm:$0xff] }
 0x33c   :  { %1211 = vmatprep.subr.bf16.mxu1 %v793_v2  ;;  %v956_v2 = vld [vmem:[#allocation2 + $0x8d0] sm:$0xff] }
 0x33d   :  { %1376 = vmatpush1.bf16.msra.mxu0 %v920_v59  ;;  %v951_v59 = vld [vmem:[#allocation2 + $0x8a8] sm:$0xff] }
 0x33e   :  { %1377 = vmatprep.subr.bf16.mxu0 %v923_v60  ;;  %v950_v60 = vld [vmem:[#allocation2 + $0x8a0] sm:$0xff] }
 0x33f   :  { %1212 = vmatpush1.bf16.msra.mxu1 %v792_v9  ;;  %v961_v9 = vld [vmem:[#allocation2 + $0x8f8] sm:$0xff] }
 0x340   :  { %1213 = vmatprep.subr.bf16.mxu1 %v795_v10  ;;  %v642_v10 = vld [vmem:[%s4406_s0 + $0x80] sm:$0xff] }
 0x341   :  { %1378 = vmatpush1.bf16.msra.mxu0 %v922_v63  ;;  %v955_v63 = vld [vmem:[#allocation2 + $0x8c8] sm:$0xff]  ;;  %v666_v14 = vpack.c.bf16 %v642_v10, %v642_v10  ;;  %v1000_v10 = vld [vmem:[#allocation2 + $0xa30] sm:$0xff] }
 0x342   :  { %1379 = vmatprep.subr.bf16.mxu0 %v925_v0  ;;  %v954_v0 = vld [vmem:[#allocation2 + $0x8c0] sm:$0xff] }
 0x343   :  { %1214 = vmatpush1.bf16.msra.mxu1 %v794_v13  ;;  %v963_v13 = vld [vmem:[#allocation2 + $0x908] sm:$0xff] }
 0x344   :  { %1215 = vmatprep.subr.bf16.mxu1 %v797_v15 }
 0x345   :  { %1380 = vmatpush1.bf16.msra.mxu0 %v924_v7  ;;  %v959_v7 = vld [vmem:[#allocation2 + $0x8e8] sm:$0xff] }
 0x346   :  { %1381 = vmatprep.subr.bf16.mxu0 %v927_v8  ;;  %v958_v8 = vld [vmem:[#allocation2 + $0x8e0] sm:$0xff] }
 0x347   :  { %1216 = vmatpush1.bf16.msra.mxu1 %v796_v20  ;;  %v966_v20 = vld [vmem:[#allocation2 + $0x920] sm:$0xff] }
 0x348   :  { %1217 = vmatprep.subr.bf16.mxu1 %v799_v21  ;;  %v969_v21 = vld [vmem:[#allocation2 + $0x938] sm:$0xff] }
 0x349   :  { %1382 = vmatpush1.bf16.msra.mxu0 %v926_v11  ;;  %v960_v11 = vld [vmem:[#allocation2 + $0x8f0] sm:$0xff] }
 0x34a   :  { %1383 = vmatprep.subr.bf16.mxu0 %v929_v12  ;;  %v645_v12 = vld [vmem:[%s4406_s0 + $0x98] sm:$0xff] }
 0x34b   :  { %1218 = vmatpush1.bf16.msra.mxu1 %v798_v27  ;;  %v669_v15 = vpack.c.bf16 %v645_v12, %v645_v12  ;;  %v973_v27 = vld [vmem:[#allocation2 + $0x958] sm:$0xff]  ;;  %v1002_v12 = vld [vmem:[#allocation2 + $0xa40] sm:$0xff] }
 0x34c   :  { %1219 = vmatprep.subr.bf16.mxu1 %v801_v28  ;;  %v972_v28 = vld [vmem:[#allocation2 + $0x950] sm:$0xff] }
 0x34d   :  { %1384 = vmatpush1.bf16.msra.mxu0 %v928_v16  ;;  %v962_v16 = vld [vmem:[#allocation2 + $0x900] sm:$0xff] }
 0x34e   :  { %1394 = vmatprep.subr.bf16.mxu0 %v931_v18  ;;  %v964_v18 = vld [vmem:[#allocation2 + $0x910] sm:$0xff] }
 0x34f   :  { %1220 = vmatpush1.bf16.msra.mxu1 %v800_v32  ;;  %v976_v32 = vld [vmem:[#allocation2 + $0x970] sm:$0xff] }
 0x350   :  { %1386 = vmatmul.mubr.bf16.vlgmr.msra.gmra.mrb[8].mxu0 %v664_v19  ;;  %v967_v19 = vld [vmem:[#allocation2 + $0x928] sm:$0xff] }
 0x351   :  { %1395 = vmatpush1.bf16.msra.mxu0 %v930_v23  ;;  %1426 = vmatprep.mubr.bf16.mxu0 %v667_v22  ;;  %v968_v22 = vld [vmem:[#allocation2 + $0x930] sm:$0xff]  ;;  %v971_v23 = vld [vmem:[#allocation2 + $0x948] sm:$0xff] }
 0x352   :  { %1396 = vmatprep.subr.bf16.mxu0 %v933_v24  ;;  %1222 = vmatmul.mubr.bf16.vlgmr.msra.gmra.mrb[0].mxu1 %v656_v34  ;;  %v970_v24 = vld [vmem:[#allocation2 + $0x940] sm:$0xff] }
 0x353   :  { %v978_v34 = vld [vmem:[#allocation2 + $0x980] sm:$0xff] }
 0x355   :  { %1397 = vmatpush1.bf16.msra.mxu0 %v932_v29  ;;  %v975_v29 = vld [vmem:[#allocation2 + $0x968] sm:$0xff] }
 0x356   :  { %1398 = vmatprep.subr.bf16.mxu0 %v935_v30  ;;  %v974_v30 = vld [vmem:[#allocation2 + $0x960] sm:$0xff] }
 0x359   :  { %1399 = vmatpush1.bf16.msra.mxu0 %v934_v33  ;;  %v979_v33 = vld [vmem:[#allocation2 + $0x988] sm:$0xff] }
 0x35a   :  { %1400 = vmatprep.subr.bf16.mxu0 %v937_v37  ;;  %v981_v37 = vld [vmem:[#allocation2 + $0x998] sm:$0xff] }
 0x35d   :  { %1401 = vmatpush1.bf16.msra.mxu0 %v936_v38  ;;  %v980_v38 = vld [vmem:[#allocation2 + $0x990] sm:$0xff] }
 0x35e   :  { %1402 = vmatprep.subr.bf16.mxu0 %v939_v39  ;;  %v983_v39 = vld [vmem:[#allocation2 + $0x9a8] sm:$0xff] }
 0x361   :  { %1403 = vmatpush1.bf16.msra.mxu0 %v938_v40  ;;  %v982_v40 = vld [vmem:[#allocation2 + $0x9a0] sm:$0xff] }
 0x362   :  { %1404 = vmatprep.subr.bf16.mxu0 %v941_v41  ;;  %v985_v41 = vld [vmem:[#allocation2 + $0x9b8] sm:$0xff] }
 0x365   :  { %1405 = vmatpush1.bf16.msra.mxu0 %v940_v42  ;;  %v984_v42 = vld [vmem:[#allocation2 + $0x9b0] sm:$0xff] }
 0x366   :  { %1406 = vmatprep.subr.bf16.mxu0 %v943_v43  ;;  %v987_v43 = vld [vmem:[#allocation2 + $0x9c8] sm:$0xff] }
 0x369   :  { %1407 = vmatpush1.bf16.msra.mxu0 %v942_v44  ;;  %v986_v44 = vld [vmem:[#allocation2 + $0x9c0] sm:$0xff] }
 0x36a   :  { %1408 = vmatprep.subr.bf16.mxu0 %v945_v53  ;;  %v989_v53 = vld [vmem:[#allocation2 + $0x9d8] sm:$0xff] }
 0x36d   :  { %1409 = vmatpush1.bf16.msra.mxu0 %v944_v54  ;;  %v988_v54 = vld [vmem:[#allocation2 + $0x9d0] sm:$0xff] }
 0x36e   :  { %1410 = vmatprep.subr.bf16.mxu0 %v947_v55  ;;  %v991_v55 = vld [vmem:[#allocation2 + $0x9e8] sm:$0xff] }
 0x371   :  { %1411 = vmatpush1.bf16.msra.mxu0 %v946_v56  ;;  %v990_v56 = vld [vmem:[#allocation2 + $0x9e0] sm:$0xff] }
 0x372   :  { %1412 = vmatprep.subr.bf16.mxu0 %v949_v57  ;;  %v993_v57 = vld [vmem:[#allocation2 + $0x9f8] sm:$0xff] }
 0x375   :  { %1413 = vmatpush1.bf16.msra.mxu0 %v948_v58  ;;  %v644_v58 = vld [vmem:[%s4406_s0 + $0x90] sm:$0xff] }
 0x376   :  { %1414 = vmatprep.subr.bf16.mxu0 %v951_v59  ;;  %v992_v59 = vld [vmem:[#allocation2 + $0x9f0] sm:$0xff] }
 0x379   :  { %1415 = vmatpush1.bf16.msra.mxu0 %v950_v60  ;;  %v647_v60 = vld [vmem:[%s4406_s0 + $0xa8] sm:$0xff] }
 0x37a   :  { %1416 = vmatprep.subr.bf16.mxu0 %v953_v61  ;;  %v995_v61 = vld [vmem:[#allocation2 + $0xa08] sm:$0xff] }
 0x37d   :  { %1417 = vmatpush1.bf16.msra.mxu0 %v952_v62  ;;  %v668_v62 = vpack.c.bf16 %v644_v58, %v644_v58  ;;  %v1032_v58 = vld [vmem:[#allocation2 + $0xb30] sm:$0xff] }
 0x37e   :  { %1418 = vmatprep.subr.bf16.mxu0 %v955_v63  ;;  %v671_v63 = vpack.c.bf16 %v647_v60, %v647_v60  ;;  %v1034_v60 = vld [vmem:[#allocation2 + $0xb40] sm:$0xff] }
 0x381   :  { %1419 = vmatpush1.bf16.msra.mxu0 %v954_v0  ;;  %v994_v0 = vld [vmem:[#allocation2 + $0xa00] sm:$0xff] }
 0x382   :  { %1420 = vmatprep.subr.bf16.mxu0 %v957_v1  ;;  %v997_v1 = vld [vmem:[#allocation2 + $0xa18] sm:$0xff] }
 0x385   :  { %1421 = vmatpush1.bf16.msra.mxu0 %v956_v2  ;;  %v996_v2 = vld [vmem:[#allocation2 + $0xa10] sm:$0xff] }
 0x386   :  { %1422 = vmatprep.subr.bf16.mxu0 %v959_v7  ;;  %v999_v7 = vld [vmem:[#allocation2 + $0xa28] sm:$0xff] }
 0x389   :  { %1423 = vmatpush1.bf16.msra.mxu0 %v958_v8  ;;  %v998_v8 = vld [vmem:[#allocation2 + $0xa20] sm:$0xff] }
 0x38a   :  { %1424 = vmatprep.subr.bf16.mxu0 %v961_v9  ;;  %v1001_v9 = vld [vmem:[#allocation2 + $0xa38] sm:$0xff] }
 0x38d   :  { %1425 = vmatpush1.bf16.msra.mxu0 %v960_v11  ;;  %v1003_v11 = vld [vmem:[#allocation2 + $0xa48] sm:$0xff] }
 0x38e   :  { %1435 = vmatprep.subr.bf16.mxu0 %v963_v13  ;;  %v1005_v13 = vld [vmem:[#allocation2 + $0xa58] sm:$0xff] }
 0x390   :  { %1427 = vmatmul.mubr.bf16.vlgmr.msra.gmra.mrb[8].mxu0 %v666_v14  ;;  %v1004_v14 = vld [vmem:[#allocation2 + $0xa50] sm:$0xff] }
 0x391   :  { %1436 = vmatpush1.bf16.msra.mxu0 %v962_v16  ;;  %1467 = vmatprep.mubr.bf16.mxu0 %v669_v15  ;;  %v1007_v15 = vld [vmem:[#allocation2 + $0xa68] sm:$0xff]  ;;  %v1006_v16 = vld [vmem:[#allocation2 + $0xa60] sm:$0xff] }
 0x392   :  { %1437 = vmatprep.subr.bf16.mxu0 %v965_v17  ;;  %v1009_v17 = vld [vmem:[#allocation2 + $0xa78] sm:$0xff] }
 0x395   :  { %1438 = vmatpush1.bf16.msra.mxu0 %v964_v18  ;;  %v1008_v18 = vld [vmem:[#allocation2 + $0xa70] sm:$0xff] }
 0x396   :  { %1439 = vmatprep.subr.bf16.mxu0 %v967_v19  ;;  %v1011_v19 = vld [vmem:[#allocation2 + $0xa88] sm:$0xff] }
 0x399   :  { %1440 = vmatpush1.bf16.msra.mxu0 %v966_v20  ;;  %v1010_v20 = vld [vmem:[#allocation2 + $0xa80] sm:$0xff] }
 0x39a   :  { %1441 = vmatprep.subr.bf16.mxu0 %v969_v21  ;;  %v1013_v21 = vld [vmem:[#allocation2 + $0xa98] sm:$0xff] }
 0x39d   :  { %1442 = vmatpush1.bf16.msra.mxu0 %v968_v22  ;;  %v1012_v22 = vld [vmem:[#allocation2 + $0xa90] sm:$0xff] }
 0x39e   :  { %1443 = vmatprep.subr.bf16.mxu0 %v971_v23  ;;  %v1015_v23 = vld [vmem:[#allocation2 + $0xaa8] sm:$0xff] }
 0x3a1   :  { %1444 = vmatpush1.bf16.msra.mxu0 %v970_v24  ;;  %v1014_v24 = vld [vmem:[#allocation2 + $0xaa0] sm:$0xff] }
 0x3a2   :  { %1445 = vmatprep.subr.bf16.mxu0 %v973_v27  ;;  %v1017_v27 = vld [vmem:[#allocation2 + $0xab8] sm:$0xff] }
 0x3a5   :  { %1446 = vmatpush1.bf16.msra.mxu0 %v972_v28  ;;  %v1016_v28 = vld [vmem:[#allocation2 + $0xab0] sm:$0xff] }
 0x3a6   :  { %1447 = vmatprep.subr.bf16.mxu0 %v975_v29  ;;  %v1019_v29 = vld [vmem:[#allocation2 + $0xac8] sm:$0xff] }
 0x3a9   :  { %1448 = vmatpush1.bf16.msra.mxu0 %v974_v30  ;;  %v1018_v30 = vld [vmem:[#allocation2 + $0xac0] sm:$0xff] }
 0x3aa   :  { %1449 = vmatprep.subr.bf16.mxu0 %v977_v31  ;;  %v1021_v31 = vld [vmem:[#allocation2 + $0xad8] sm:$0xff] }
 0x3ad   :  { %1450 = vmatpush1.bf16.msra.mxu0 %v976_v32  ;;  %v1020_v32 = vld [vmem:[#allocation2 + $0xad0] sm:$0xff] }
 0x3ae   :  { %1451 = vmatprep.subr.bf16.mxu0 %v979_v33  ;;  %v1023_v33 = vld [vmem:[#allocation2 + $0xae8] sm:$0xff] }
 0x3b1   :  { %1452 = vmatpush1.bf16.msra.mxu0 %v978_v34  ;;  %v1022_v34 = vld [vmem:[#allocation2 + $0xae0] sm:$0xff] }
 0x3b2   :  { %1453 = vmatprep.subr.bf16.mxu0 %v981_v37  ;;  %v1025_v37 = vld [vmem:[#allocation2 + $0xaf8] sm:$0xff] }
 0x3b5   :  { %1454 = vmatpush1.bf16.msra.mxu0 %v980_v38  ;;  %v646_v38 = vld [vmem:[%s4406_s0 + $0xa0] sm:$0xff] }
 0x3b6   :  { %1455 = vmatprep.subr.bf16.mxu0 %v983_v39  ;;  %v1024_v39 = vld [vmem:[#allocation2 + $0xaf0] sm:$0xff] }
 0x3b9   :  { %1456 = vmatpush1.bf16.msra.mxu0 %v982_v40  ;;  %v649_v40 = vld [vmem:[%s4406_s0 + $0xb8] sm:$0xff] }
 0x3ba   :  { %1457 = vmatprep.subr.bf16.mxu0 %v985_v41  ;;  %v1027_v41 = vld [vmem:[#allocation2 + $0xb08] sm:$0xff] }
 0x3bd   :  { %1458 = vmatpush1.bf16.msra.mxu0 %v984_v42  ;;  %v670_v42 = vpack.c.bf16 %v646_v38, %v646_v38  ;;  %v3423_v38 = vld [vmem:[#allocation4 + $0x20] ss:$8 sps:$4 sm:$0xff]  }
 0x3be   :  { %1459 = vmatprep.subr.bf16.mxu0 %v987_v43  ;;  %v673_v43 = vpack.c.bf16 %v649_v40, %v649_v40  ;;  %v3426_v40 = vld [vmem:[#allocation4 + $0x30] ss:$8 sps:$4 sm:$0xff]  }
 0x3c1   :  { %1460 = vmatpush1.bf16.msra.mxu0 %v986_v44  ;;  %v1026_v44 = vld [vmem:[#allocation2 + $0xb00] sm:$0xff] }
 0x3c2   :  { %1461 = vmatprep.subr.bf16.mxu0 %v989_v53  ;;  %v1029_v53 = vld [vmem:[#allocation2 + $0xb18] sm:$0xff] }
 0x3c5   :  { %1462 = vmatpush1.bf16.msra.mxu0 %v988_v54  ;;  %v1028_v54 = vld [vmem:[#allocation2 + $0xb10] sm:$0xff] }
 0x3c6   :  { %1463 = vmatprep.subr.bf16.mxu0 %v991_v55  ;;  %v1031_v55 = vld [vmem:[#allocation2 + $0xb28] sm:$0xff] }
 0x3c9   :  { %1464 = vmatpush1.bf16.msra.mxu0 %v990_v56  ;;  %v1030_v56 = vld [vmem:[#allocation2 + $0xb20] sm:$0xff] }
 0x3ca   :  { %1465 = vmatprep.subr.bf16.mxu0 %v993_v57  ;;  %v1033_v57 = vld [vmem:[#allocation2 + $0xb38] sm:$0xff] }
 0x3cd   :  { %1466 = vmatpush1.bf16.msra.mxu0 %v992_v59  ;;  %v1035_v59 = vld [vmem:[#allocation2 + $0xb48] sm:$0xff] }
 0x3ce   :  { %1476 = vmatprep.subr.bf16.mxu0 %v995_v61  ;;  %v1037_v61 = vld [vmem:[#allocation2 + $0xb58] sm:$0xff] }
 0x3d0   :  { %1468 = vmatmul.mubr.bf16.vlgmr.msra.gmra.mrb[8].mxu0 %v668_v62  ;;  %v1036_v62 = vld [vmem:[#allocation2 + $0xb50] sm:$0xff] }
 0x3d1   :  { %1477 = vmatpush1.bf16.msra.mxu0 %v994_v0  ;;  %1508 = vmatprep.mubr.bf16.mxu0 %v671_v63  ;;  %v1039_v63 = vld [vmem:[#allocation2 + $0xb68] sm:$0xff]  ;;  %v1038_v0 = vld [vmem:[#allocation2 + $0xb60] sm:$0xff] }
 0x3d2   :  { %1478 = vmatprep.subr.bf16.mxu0 %v997_v1  ;;  %v1041_v1 = vld [vmem:[#allocation2 + $0xb78] sm:$0xff] }
 0x3d5   :  { %1479 = vmatpush1.bf16.msra.mxu0 %v996_v2  ;;  %v1040_v2 = vld [vmem:[#allocation2 + $0xb70] sm:$0xff] }
 0x3d6   :  { %1480 = vmatprep.subr.bf16.mxu0 %v999_v7  ;;  %v1043_v7 = vld [vmem:[#allocation2 + $0xb88] sm:$0xff] }
 0x3d9   :  { %1481 = vmatpush1.bf16.msra.mxu0 %v998_v8 }
 0x3da   :  { %1482 = vmatprep.subr.bf16.mxu0 %v1001_v9  ;;  %v1042_v9 = vld [vmem:[#allocation2 + $0xb80] sm:$0xff] }
 0x3dd   :  { %1483 = vmatpush1.bf16.msra.mxu0 %v1000_v10 }
 0x3de   :  { %1484 = vmatprep.subr.bf16.mxu0 %v1003_v11  ;;  %v1045_v11 = vld [vmem:[#allocation2 + $0xb98] sm:$0xff] }
 0x3e1   :  { %1485 = vmatpush1.bf16.msra.mxu0 %v1002_v12 }
 0x3e2   :  { %1486 = vmatprep.subr.bf16.mxu0 %v1005_v13 }
 0x3e5   :  { %1487 = vmatpush1.bf16.msra.mxu0 %v1004_v14  ;;  %v1044_v14 = vld [vmem:[#allocation2 + $0xb90] sm:$0xff] }
 0x3e6   :  { %1488 = vmatprep.subr.bf16.mxu0 %v1007_v15  ;;  %v1047_v15 = vld [vmem:[#allocation2 + $0xba8] sm:$0xff] }
 0x3e9   :  { %1489 = vmatpush1.bf16.msra.mxu0 %v1006_v16  ;;  %v1046_v16 = vld [vmem:[#allocation2 + $0xba0] sm:$0xff] }
 0x3ea   :  { %1490 = vmatprep.subr.bf16.mxu0 %v1009_v17  ;;  %v1049_v17 = vld [vmem:[#allocation2 + $0xbb8] sm:$0xff] }
 0x3ed   :  { %1491 = vmatpush1.bf16.msra.mxu0 %v1008_v18  ;;  %v1048_v18 = vld [vmem:[#allocation2 + $0xbb0] sm:$0xff] }
 0x3ee   :  { %1492 = vmatprep.subr.bf16.mxu0 %v1011_v19  ;;  %v1051_v19 = vld [vmem:[#allocation2 + $0xbc8] sm:$0xff] }
 0x3f1   :  { %1493 = vmatpush1.bf16.msra.mxu0 %v1010_v20  ;;  %v1050_v20 = vld [vmem:[#allocation2 + $0xbc0] sm:$0xff] }
 0x3f2   :  { %1494 = vmatprep.subr.bf16.mxu0 %v1013_v21  ;;  %v1053_v21 = vld [vmem:[#allocation2 + $0xbd8] sm:$0xff] }
 0x3f5   :  { %1495 = vmatpush1.bf16.msra.mxu0 %v1012_v22  ;;  %v1052_v22 = vld [vmem:[#allocation2 + $0xbd0] sm:$0xff] }
 0x3f6   :  { %1496 = vmatprep.subr.bf16.mxu0 %v1015_v23  ;;  %v1055_v23 = vld [vmem:[#allocation2 + $0xbe8] sm:$0xff] }
 0x3f9   :  { %1497 = vmatpush1.bf16.msra.mxu0 %v1014_v24  ;;  %v1054_v24 = vld [vmem:[#allocation2 + $0xbe0] sm:$0xff] }
 0x3fa   :  { %1498 = vmatprep.subr.bf16.mxu0 %v1017_v27  ;;  %v1057_v27 = vld [vmem:[#allocation2 + $0xbf8] sm:$0xff] }
 0x3fd   :  { %1499 = vmatpush1.bf16.msra.mxu0 %v1016_v28  ;;  %v648_v28 = vld [vmem:[%s4406_s0 + $0xb0] sm:$0xff] }
 0x3fe   :  { %1500 = vmatprep.subr.bf16.mxu0 %v1019_v29  ;;  %v1056_v29 = vld [vmem:[#allocation2 + $0xbf0] sm:$0xff] }
 0x401   :  { %1501 = vmatpush1.bf16.msra.mxu0 %v1018_v30  ;;  %v672_v30 = vpack.c.bf16 %v648_v28, %v648_v28 }
 0x402   :  { %1502 = vmatprep.subr.bf16.mxu0 %v1021_v31  ;;  %v3419_v31 = vld [vmem:[#allocation4 + $0x4] ss:$8 sps:$4 sm:$0xff]  }
 0x403   :  { %1854 = vmatprep.subr.bf16.mxu1 %v3419_v31 }
 0x405   :  { %1503 = vmatpush1.bf16.msra.mxu0 %v1020_v32  ;;  %v3417_v32 = vld [vmem:[#allocation4] ss:$8 sps:$4 sm:$0xff]  }
 0x406   :  { %1504 = vmatprep.subr.bf16.mxu0 %v1023_v33  ;;  %1855 = vmatpush1.bf16.msra.mxu1 %v3417_v32  ;;  %v3422_v33 = vld [vmem:[#allocation4 + $0x14] ss:$8 sps:$4 sm:$0xff]  }
 0x407   :  { %1856 = vmatprep.subr.bf16.mxu1 %v3422_v33 }
 0x409   :  { %1505 = vmatpush1.bf16.msra.mxu0 %v1022_v34  ;;  %v3420_v34 = vld [vmem:[#allocation4 + $0x10] ss:$8 sps:$4 sm:$0xff]  }
 0x40a   :  { %1506 = vmatprep.subr.bf16.mxu0 %v1025_v37  ;;  %1857 = vmatpush1.bf16.msra.mxu1 %v3420_v34  ;;  %v3425_v37 = vld [vmem:[#allocation4 + $0x24] ss:$8 sps:$4 sm:$0xff]  }
 0x40b   :  { %1858 = vmatprep.subr.bf16.mxu1 %v3425_v37 }
 0x40d   :  { %1507 = vmatpush1.bf16.msra.mxu0 %v1024_v39  ;;  %v3428_v39 = vld [vmem:[#allocation4 + $0x34] ss:$8 sps:$4 sm:$0xff]  }
 0x40e   :  { %1517 = vmatprep.subr.bf16.mxu0 %v1027_v41  ;;  %1859 = vmatpush1.bf16.msra.mxu1 %v3423_v38  ;;  %v3431_v41 = vld [vmem:[#allocation4 + $0x44] ss:$8 sps:$4 sm:$0xff]  }
 0x40f   :  { %1860 = vmatprep.subr.bf16.mxu1 %v3428_v39 }
 0x410   :  { %1509 = vmatmul.mubr.bf16.vlgmr.msra.gmra.mrb[8].mxu0 %v670_v42  ;;  %v3429_v42 = vld [vmem:[#allocation4 + $0x40] ss:$8 sps:$4 sm:$0xff]  }
 0x411   :  { %1518 = vmatpush1.bf16.msra.mxu0 %v1026_v44  ;;  %1549 = vmatprep.mubr.bf16.mxu0 %v673_v43  ;;  %v3434_v43 = vld [vmem:[#allocation4 + $0x54] ss:$8 sps:$4 sm:$0xff]   ;;  %v3432_v44 = vld [vmem:[#allocation4 + $0x50] ss:$8 sps:$4 sm:$0xff]  }
 0x412   :  { %1519 = vmatprep.subr.bf16.mxu0 %v1029_v53  ;;  %1861 = vmatpush1.bf16.msra.mxu1 %v3426_v40  ;;  %v3437_v53 = vld [vmem:[#allocation4 + $0x64] ss:$8 sps:$4 sm:$0xff]  }
 0x413   :  { %1862 = vmatprep.subr.bf16.mxu1 %v3431_v41 }
 0x415   :  { %1520 = vmatpush1.bf16.msra.mxu0 %v1028_v54  ;;  %v3435_v54 = vld [vmem:[#allocation4 + $0x60] ss:$8 sps:$4 sm:$0xff]  }
 0x416   :  { %1521 = vmatprep.subr.bf16.mxu0 %v1031_v55  ;;  %1863 = vmatpush1.bf16.msra.mxu1 %v3429_v42  ;;  %v3440_v55 = vld [vmem:[#allocation4 + $0x74] ss:$8 sps:$4 sm:$0xff]  }
 0x417   :  { %1864 = vmatprep.subr.bf16.mxu1 %v3434_v43 }
 0x419   :  { %1522 = vmatpush1.bf16.msra.mxu0 %v1030_v56  ;;  %v3438_v56 = vld [vmem:[#allocation4 + $0x70] ss:$8 sps:$4 sm:$0xff]  }
 0x41a   :  { %1523 = vmatprep.subr.bf16.mxu0 %v1033_v57  ;;  %1865 = vmatpush1.bf16.msra.mxu1 %v3432_v44  ;;  %v3443_v57 = vld [vmem:[#allocation4 + $0x84] ss:$8 sps:$4 sm:$0xff]  }
 0x41b   :  { %1866 = vmatprep.subr.bf16.mxu1 %v3437_v53 }
 0x41d   :  { %1524 = vmatpush1.bf16.msra.mxu0 %v1032_v58  ;;  %v3441_v58 = vld [vmem:[#allocation4 + $0x80] ss:$8 sps:$4 sm:$0xff]  }
 0x41e   :  { %1525 = vmatprep.subr.bf16.mxu0 %v1035_v59  ;;  %1867 = vmatpush1.bf16.msra.mxu1 %v3435_v54  ;;  %v3446_v59 = vld [vmem:[#allocation4 + $0x94] ss:$8 sps:$4 sm:$0xff]  }
 0x41f   :  { %1868 = vmatprep.subr.bf16.mxu1 %v3440_v55 }
 0x421   :  { %1526 = vmatpush1.bf16.msra.mxu0 %v1034_v60  ;;  %v3444_v60 = vld [vmem:[#allocation4 + $0x90] ss:$8 sps:$4 sm:$0xff]  }
 0x422   :  { %1527 = vmatprep.subr.bf16.mxu0 %v1037_v61  ;;  %1869 = vmatpush1.bf16.msra.mxu1 %v3438_v56  ;;  %v3449_v61 = vld [vmem:[#allocation4 + $0xa4] ss:$8 sps:$4 sm:$0xff]  }
 0x423   :  { %1870 = vmatprep.subr.bf16.mxu1 %v3443_v57 }
 0x425   :  { %1528 = vmatpush1.bf16.msra.mxu0 %v1036_v62  ;;  %v4206_v8 = vpop.f32.mrb[0].mxu1  ;;  %v3447_v62 = vld [vmem:[#allocation4 + $0xa0] ss:$8 sps:$4 sm:$0xff]  }
 0x426   :  { %1529 = vmatprep.subr.bf16.mxu0 %v1039_v63  ;;  %v4208_v10 = vpop.f32.mrb[1].mxu1  ;;  %1871 = vmatpush1.bf16.msra.mxu1 %v3441_v58  ;;  %v3452_v63 = vld [vmem:[#allocation4 + $0xb4] ss:$8 sps:$4 sm:$0xff]  }
 0x427   :  { %v1227_v12 = vpop.f32.mrb[2].mxu1  ;;  %1872 = vmatprep.subr.bf16.mxu1 %v3446_v59 }
 0x428   :  { %v1228_v13 = vpop.f32.mrb[3].mxu1  ;;  %v3459_v12 = vld [vmem:[#allocation4 + $0xe0] ss:$8 sps:$4 sm:$0xff]  }
 0x429   :  { %1530 = vmatpush1.bf16.msra.mxu0 %v1038_v0  ;;  %v3450_v0 = vld [vmem:[#allocation4 + $0xb0] ss:$8 sps:$4 sm:$0xff]   ;;  %v3464_v13 = vld [vmem:[#allocation4 + $0xf4] ss:$8 sps:$4 sm:$0xff]  }
 0x42a   :  { %1531 = vmatprep.subr.bf16.mxu0 %v1041_v1  ;;  %1873 = vmatpush1.bf16.msra.mxu1 %v3444_v60  ;;  %v3455_v1 = vld [vmem:[#allocation4 + $0xc4] ss:$8 sps:$4 sm:$0xff]  }
 0x42b   :  { %1874 = vmatprep.subr.bf16.mxu1 %v3449_v61 }
 0x42d   :  { %1532 = vmatpush1.bf16.msra.mxu0 %v1040_v2  ;;  %v3453_v2 = vld [vmem:[#allocation4 + $0xc0] ss:$8 sps:$4 sm:$0xff]  }
 0x42e   :  { %1533 = vmatprep.subr.bf16.mxu0 %v1043_v7  ;;  %1875 = vmatpush1.bf16.msra.mxu1 %v3447_v62  ;;  %v3458_v7 = vld [vmem:[#allocation4 + $0xd4] ss:$8 sps:$4 sm:$0xff]  }
 0x42f   :  { %1876 = vmatprep.subr.bf16.mxu1 %v3452_v63 }
 0x431   :  { %1534 = vmatpush1.bf16.msra.mxu0 %v1042_v9  ;;  %v3456_v9 = vld [vmem:[#allocation4 + $0xd0] ss:$8 sps:$4 sm:$0xff]  }
 0x432   :  { %1535 = vmatprep.subr.bf16.mxu0 %v1045_v11  ;;  %1877 = vmatpush1.bf16.msra.mxu1 %v3450_v0  ;;  %v3461_v11 = vld [vmem:[#allocation4 + $0xe4] ss:$8 sps:$4 sm:$0xff]  }
 0x433   :  { %1878 = vmatprep.subr.bf16.mxu1 %v3455_v1 }
 0x435   :  { %1536 = vmatpush1.bf16.msra.mxu0 %v1044_v14  ;;  %v3462_v14 = vld [vmem:[#allocation4 + $0xf0] ss:$8 sps:$4 sm:$0xff]  }
 0x436   :  { %1537 = vmatprep.subr.bf16.mxu0 %v1047_v15  ;;  %1879 = vmatpush1.bf16.msra.mxu1 %v3453_v2  ;;  %v4214_v15 = vsub.s32 0, %v4100_v46 }
 0x437   :  { %1880 = vmatprep.subr.bf16.mxu1 %v3458_v7 }
 0x439   :  { %1538 = vmatpush1.bf16.msra.mxu0 %v1046_v16  ;;  %v1061_v16 = vrot.slane %v4065_v3, %v4214_v15 }
 0x43a   :  { %1539 = vmatprep.subr.bf16.mxu0 %v1049_v17  ;;  %1881 = vmatpush1.bf16.msra.mxu1 %v3456_v9  ;;  %v1065_v17 = vrot.slane %v4067_v4, %v4214_v15 }
 0x43b   :  { %1882 = vmatprep.subr.bf16.mxu1 %v3461_v11 }
 0x43d   :  { %1540 = vmatpush1.bf16.msra.mxu0 %v1048_v18  ;;  %v3337_v18 = vadd.f32 %v4206_v8, %v1061_v16 }
 0x43e   :  { %1541 = vmatprep.subr.bf16.mxu0 %v1051_v19  ;;  %1883 = vmatpush1.bf16.msra.mxu1 %v3459_v12  ;;  %v3339_v19 = vadd.f32 %v4208_v10, %v1065_v17  ;;  %v1599_v12 = vrot.slane %v4065_v3, %v4109_v50 }
 0x43f   :  { %1884 = vmatprep.subr.bf16.mxu1 %v3464_v13 }
 0x441   :  { %1542 = vmatpush1.bf16.msra.mxu0 %v1050_v20 }
 0x442   :  { %1543 = vmatprep.subr.bf16.mxu0 %v1053_v21  ;;  %1885 = vmatpush1.bf16.msra.mxu1 %v3462_v14  ;;  %v1603_v14 = vrot.slane %v4067_v4, %v4109_v50 }
 0x445   :  { %1544 = vmatpush1.bf16.msra.mxu0 %v1052_v22 }
 0x446   :  { %1545 = vmatprep.subr.bf16.mxu0 %v1055_v23 }
 0x449   :  { %1546 = vmatpush1.bf16.msra.mxu0 %v1054_v24 }
 0x44a   :  { %1547 = vmatprep.subr.bf16.mxu0 %v1057_v27 }
 0x44d   :  { %1548 = vmatpush1.bf16.msra.mxu0 %v1056_v29 }
 0x450   :  { %1550 = vmatmul.mubr.bf16.vlgmr.msra.gmra.mrb[8].mxu0 %v672_v30 }
 0x523   :  { %v1551_v20 = vpop.f32.mrb[8].mxu0 }
 0x524   :  { %v3338_v21 = vadd.f32 %v3337_v18, %v1551_v20  ;;  %v1553_v22 = vpop.f32.mrb[9].mxu0  ;;  %v1609_v18 = vrot.slane %v4065_v3, %v4120_v35  ;;  %v1613_v20 = vrot.slane %v4067_v4, %v4120_v35 }
 0x525   :  { %v3340_v23 = vadd.f32 %v3339_v19, %v1553_v22  ;;  %v1555_v24 = vpop.f32.mrb[10].mxu0 }
 0x526   :  { %v1558_v27 = vrot.slane %v3338_v21, 4  ;;  %v1556_v28 = vpop.f32.mrb[11].mxu0 }
 0x527   :  { %v1564_v29 = vrot.slane %v3340_v23, 4 }
 0x528   :  { %v1559_v30 = vadd.f32 %v3338_v21, %v1558_v27 }
 0x529   :  { %v1565_v31 = vadd.f32 %v3340_v23, %v1564_v29 }
 0x52a   :  { %v1560_v32 = vrot.slane %v1559_v30, 2 }
 0x52b   :  { %v1566_v33 = vrot.slane %v1565_v31, 2 }
 0x52c   :  { %v1561_v34 = vadd.f32 %v1560_v32, %v1559_v30 }
 0x52d   :  { %v1567_v37 = vadd.f32 %v1566_v33, %v1565_v31 }
 0x52e   :  { %v1562_v38 = vrot.slane %v1561_v34, 1 }
 0x52f   :  { %v1568_v39 = vrot.slane %v1567_v37, 1 }
 0x530   :  { %v1563_v40 = vadd.f32 %v1562_v38, %v1561_v34 }
 0x531   :  { %v1569_v8 = vadd.f32 %v1568_v39, %v1567_v37 }
 0x532   :  { %v1570_v41 = vmul.f32 0.125, %v1563_v40 }
 0x533   :  { %v1571_v10 = vmul.f32 0.125, %v1569_v8 }
 0x534   :  { %v1572_v42 = vsub.f32 %v3338_v21, %v1570_v41 }
 0x535   :  { %v1573_v43 = vsub.f32 %v3340_v23, %v1571_v10 }
 0x536   :  { %v1574_v44 = vmul.f32 %v1572_v42, %v1572_v42 }
 0x537   :  { %v1575_v53 = vmul.f32 %v1573_v43, %v1573_v43 }
 0x538   :  { %v1576_v54 = vrot.slane %v1574_v44, 4 }
 0x539   :  { %v1582_v55 = vrot.slane %v1575_v53, 4 }
 0x53a   :  { %v1577_v56 = vadd.f32 %v1576_v54, %v1574_v44 }
 0x53b   :  { %v1583_v57 = vadd.f32 %v1582_v55, %v1575_v53 }
 0x53c   :  { %v1578_v58 = vrot.slane %v1577_v56, 2 }
 0x53d   :  { %v1584_v59 = vrot.slane %v1583_v57, 2 }
 0x53e   :  { %v1579_v60 = vadd.f32 %v1578_v58, %v1577_v56 }
 0x53f   :  { %v1585_v61 = vadd.f32 %v1584_v59, %v1583_v57 }
 0x540   :  { %v1580_v62 = vrot.slane %v1579_v60, 1 }
 0x541   :  { %v1586_v63 = vrot.slane %v1585_v61, 1 }
 0x542   :  { %v1581_v0 = vadd.f32 %v1580_v62, %v1579_v60 }
 0x543   :  { %v1587_v1 = vadd.f32 %v1586_v63, %v1585_v61 }
 0x544   :  { %v1588_v2 = vmul.f32 0.125, %v1581_v0 }
 0x545   :  { %v1589_v7 = vmul.f32 0.125, %v1587_v1 }
 0x546   :  { %v1590_v9 = vadd.f32 1e-05, %v1588_v2 }
 0x547   :  { %v1591_v11 = vadd.f32 1e-05, %v1589_v7  ;;  %v3467_v7 = vld [vmem:[#allocation7 + $0x4] ss:$8 sps:$4 sm:$0xff]  }
 0x548   :  { %3609 = vrsqrt.f32 %v1590_v9  ;;  %v3465_v9 = vld [vmem:[#allocation7] ss:$8 sps:$4 sm:$0xff]   ;;  %2191 = vmatprep.subr.bf16.mxu1 %v3467_v7 }
 0x549   :  { %3611 = vrsqrt.f32 %v1591_v11  ;;  %v3470_v11 = vld [vmem:[#allocation7 + $0x14] ss:$8 sps:$4 sm:$0xff]  }
 0x552   :  { %v3610_v13 = vpop.eup %3609 }
 0x553   :  { %v3612_v16 = vpop.eup %3611  ;;  %v1594_v17 = vmul.f32 %v3610_v13, %v1572_v42  ;;  %v3473_v13 = vld [vmem:[#allocation7 + $0x24] ss:$8 sps:$4 sm:$0xff]  }
 0x554   :  { %v1595_v19 = vmul.f32 %v3612_v16, %v1573_v43  ;;  %v3476_v16 = vld [vmem:[#allocation7 + $0x34] ss:$8 sps:$4 sm:$0xff]  }
 0x555   :  { %v1604_v21 = vmul.f32 %v1599_v12, %v1594_v17  ;;  %v3468_v12 = vld [vmem:[#allocation7 + $0x10] ss:$8 sps:$4 sm:$0xff]  }
 0x556   :  { %v1605_v22 = vmul.f32 %v1603_v14, %v1595_v19  ;;  %v3471_v14 = vld [vmem:[#allocation7 + $0x20] ss:$8 sps:$4 sm:$0xff]   ;;  %v3474_v17 = vld [vmem:[#allocation7 + $0x30] ss:$8 sps:$4 sm:$0xff]  }
 0x557   :  { %v1614_v23 = vadd.f32 %v1609_v18, %v1604_v21  ;;  %v3479_v18 = vld [vmem:[#allocation7 + $0x44] ss:$8 sps:$4 sm:$0xff]   ;;  %v3477_v19 = vld [vmem:[#allocation7 + $0x40] ss:$8 sps:$4 sm:$0xff]   ;;  %v3480_v21 = vld [vmem:[#allocation7 + $0x50] ss:$8 sps:$4 sm:$0xff]  }
 0x558   :  { %v1615_v24 = vadd.f32 %v1613_v20, %v1605_v22  ;;  %v3482_v20 = vld [vmem:[#allocation7 + $0x54] ss:$8 sps:$4 sm:$0xff]   ;;  %v3485_v22 = vld [vmem:[#allocation7 + $0x64] ss:$8 sps:$4 sm:$0xff]  }
 0x559   :  { %v1622_v27 = vand.u32 2147483647, %v1614_v23  ;;  %v1616_v57 = vmax.f32 %v1614_v23, 0.0  ;;  %vm1618_vm12 = vcmp.ne.f32.partialorder %v1614_v23, %v1614_v23 }
 0x55a   :  { %v1623_v28 = vand.u32 2147483647, %v1615_v24  ;;  %v1617_v58 = vmax.f32 %v1615_v24, 0.0  ;;  %vm1619_vm13 = vcmp.ne.f32.partialorder %v1615_v24, %v1615_v24 }
 0x55b   :  { %v1624_v29 = vsub.f32 0.0, %v1622_v27  ;;  %v3486_v27 = vld [vmem:[#allocation7 + $0x70] ss:$8 sps:$4 sm:$0xff]  }
 0x55c   :  { %v1625_v30 = vsub.f32 0.0, %v1623_v28  ;;  %v3491_v28 = vld [vmem:[#allocation7 + $0x84] ss:$8 sps:$4 sm:$0xff]  }
 0x55d   :  { %v1626_v31 = vmul.f32 1.442695, %v1624_v29  ;;  %v3489_v29 = vld [vmem:[#allocation7 + $0x80] ss:$8 sps:$4 sm:$0xff]  }
 0x55e   :  { %v1628_v32 = vmul.f32 1.442695, %v1625_v30  ;;  %v3494_v30 = vld [vmem:[#allocation7 + $0x94] ss:$8 sps:$4 sm:$0xff]  }
 0x55f   :  { %3613 = vpow2.f32 %v1626_v31  ;;  %v3492_v31 = vld [vmem:[#allocation7 + $0x90] ss:$8 sps:$4 sm:$0xff]  }
 0x560   :  { %3615 = vpow2.f32 %v1628_v32  ;;  %v3497_v32 = vld [vmem:[#allocation7 + $0xa4] ss:$8 sps:$4 sm:$0xff]  }
 0x569   :  { %v3614_v33 = vpop.eup %3613 }
 0x56a   :  { %v3616_v34 = vpop.eup %3615  ;;  %v1630_v37 = vadd.f32 1.0, %v3614_v33  ;;  %v1633_v39 = vmul.f32 -0.5, %v3614_v33  ;;  %v1636_v10 = vand.u32 2147483647, %v3614_v33 }
 0x56b   :  { %v1639_v38 = vadd.f32 1.0, %v3616_v34  ;;  %v1642_v40 = vmul.f32 -0.5, %v3616_v34  ;;  %v1645_v42 = vand.u32 2147483647, %v3616_v34 }
 0x56c   :  { %3617 = vlog2.f32 %v1630_v37  ;;  %v1634_v8 = vadd.f32 1.0, %v1633_v39  ;;  %vm1637_vm10 = vcmp.lt.f32.partialorder %v1636_v10, 0.0004427343  ;;  %v3498_v37 = vld [vmem:[#allocation7 + $0xb0] ss:$8 sps:$4 sm:$0xff]  }
 0x56d   :  { %3619 = vlog2.f32 %v1639_v38  ;;  %v1643_v41 = vadd.f32 1.0, %v1642_v40  ;;  %vm1646_vm11 = vcmp.lt.f32.partialorder %v1645_v42, 0.0004427343  ;;  %v3503_v38 = vld [vmem:[#allocation7 + $0xc4] ss:$8 sps:$4 sm:$0xff]  }
 0x56e   :  { %v1635_v54 = vmul.f32 %v3614_v33, %v1634_v8  ;;  %v3495_v33 = vld [vmem:[#allocation7 + $0xa0] ss:$8 sps:$4 sm:$0xff]   ;;  %v3506_v40 = vld [vmem:[#allocation7 + $0xd4] ss:$8 sps:$4 sm:$0xff]   ;;  %v3504_v8 = vld [vmem:[#allocation7 + $0xd0] ss:$8 sps:$4 sm:$0xff]  }
 0x56f   :  { %v1644_v56 = vmul.f32 %v3616_v34, %v1643_v41  ;;  %v3500_v34 = vld [vmem:[#allocation7 + $0xb4] ss:$8 sps:$4 sm:$0xff]   ;;  %v3501_v39 = vld [vmem:[#allocation7 + $0xc0] ss:$8 sps:$4 sm:$0xff]   ;;  %v3509_v41 = vld [vmem:[#allocation7 + $0xe4] ss:$8 sps:$4 sm:$0xff]  }
 0x570   :  { %v3507_v10 = vld [vmem:[#allocation7 + $0xe0] ss:$8 sps:$4 sm:$0xff]   ;;  %v3512_v42 = vld [vmem:[#allocation7 + $0xf4] ss:$8 sps:$4 sm:$0xff]  }
 0x576   :  { %v3618_v43 = vpop.eup %3617 }
 0x577   :  { %v3620_v44 = vpop.eup %3619  ;;  %v1632_v53 = vmul.f32 0.6931472, %v3618_v43  ;;  %v3510_v43 = vld [vmem:[#allocation7 + $0xf0] ss:$8 sps:$4 sm:$0xff]  }
 0x578   :  { %v1641_v55 = vmul.f32 0.6931472, %v3620_v44  ;;  %v3515_v44 = vld [vmem:[#allocation12 + $0x4] ss:$8 sps:$4 sm:$0xff]  }
 0x579   :  { %v1638_v59 = vsel %vm1637_vm10, %v1635_v54, %v1632_v53  ;;  %v1689_v53 = vrot.slane %v4065_v3, %v4123_v36  ;;  %v1693_v54 = vrot.slane %v4067_v4, %v4123_v36  ;;  %vm3076_vm10 = vcmask 64512  }
 0x57a   :  { %v1647_v60 = vsel %vm1646_vm11, %v1644_v56, %v1641_v55  ;;  %v1648_v61 = vadd.f32 %v1638_v59, %v1616_v57 }
 0x57b   :  { %v1649_v62 = vadd.f32 %v1647_v60, %v1617_v58 }
 0x57c   :  { %v1650_v63 = vsel %vm1618_vm12, %v1614_v23, %v1648_v61  ;;  %v3483_v23 = vld [vmem:[#allocation7 + $0x60] ss:$8 sps:$4 sm:$0xff]  }
 0x57d   :  { %v1651_v0 = vsel %vm1619_vm13, %v1615_v24, %v1649_v62  ;;  %v1652_v2 = vpack.c.bf16 %v1650_v63, %v1650_v63  ;;  %v3488_v24 = vld [vmem:[#allocation7 + $0x74] ss:$8 sps:$4 sm:$0xff]  }
 0x57e   :  { %v1653_v1 = vpack.c.bf16 %v1651_v0, %v1651_v0 }
 0x580   :  { %1886 = vmatprep.mubr.bf16.mxu1 %v1653_v1 }
 0x581   :  { %1887 = vmatmul.mubr.bf16.vlgmr.msra.gmra.mrb[4].mxu1 %v1652_v2 }
 0x582   :  { %2192 = vmatpush1.bf16.msra.mxu1 %v3465_v9 }
 0x583   :  { %2193 = vmatprep.subr.bf16.mxu1 %v3470_v11 }
 0x586   :  { %2194 = vmatpush1.bf16.msra.mxu1 %v3468_v12 }
 0x587   :  { %2195 = vmatprep.subr.bf16.mxu1 %v3473_v13 }
 0x58a   :  { %2196 = vmatpush1.bf16.msra.mxu1 %v3471_v14 }
 0x58b   :  { %2197 = vmatprep.subr.bf16.mxu1 %v3476_v16 }
 0x58e   :  { %2198 = vmatpush1.bf16.msra.mxu1 %v3474_v17 }
 0x58f   :  { %2199 = vmatprep.subr.bf16.mxu1 %v3479_v18 }
 0x592   :  { %2200 = vmatpush1.bf16.msra.mxu1 %v3477_v19 }
 0x593   :  { %2201 = vmatprep.subr.bf16.mxu1 %v3482_v20 }
 0x596   :  { %2202 = vmatpush1.bf16.msra.mxu1 %v3480_v21 }
 0x597   :  { %2203 = vmatprep.subr.bf16.mxu1 %v3485_v22 }
 0x59a   :  { %2204 = vmatpush1.bf16.msra.mxu1 %v3483_v23 }
 0x59b   :  { %2205 = vmatprep.subr.bf16.mxu1 %v3488_v24 }
 0x59e   :  { %2206 = vmatpush1.bf16.msra.mxu1 %v3486_v27 }
 0x59f   :  { %2207 = vmatprep.subr.bf16.mxu1 %v3491_v28 }
 0x5a2   :  { %2208 = vmatpush1.bf16.msra.mxu1 %v3489_v29 }
 0x5a3   :  { %2209 = vmatprep.subr.bf16.mxu1 %v3494_v30 }
 0x5a6   :  { %2210 = vmatpush1.bf16.msra.mxu1 %v3492_v31 }
 0x5a7   :  { %2211 = vmatprep.subr.bf16.mxu1 %v3497_v32 }
 0x5aa   :  { %2212 = vmatpush1.bf16.msra.mxu1 %v3495_v33 }
 0x5ab   :  { %2213 = vmatprep.subr.bf16.mxu1 %v3500_v34 }
 0x5ae   :  { %2214 = vmatpush1.bf16.msra.mxu1 %v3498_v37 }
 0x5af   :  { %2215 = vmatprep.subr.bf16.mxu1 %v3503_v38 }
 0x5b2   :  { %2216 = vmatpush1.bf16.msra.mxu1 %v3501_v39 }
 0x5b3   :  { %2217 = vmatprep.subr.bf16.mxu1 %v3506_v40 }
 0x5b6   :  { %2218 = vmatpush1.bf16.msra.mxu1 %v3504_v8  ;;  %v4235_v8 = vsub.s32 4, %v4100_v46 }
 0x5b7   :  { %2219 = vmatprep.subr.bf16.mxu1 %v3509_v41  ;;  %v4238_v41 = vsub.s32 5, %v4100_v46 }
 0x5ba   :  { %2220 = vmatpush1.bf16.msra.mxu1 %v3507_v10  ;;  %v1936_v10 = vrot.slane %v4065_v3, %v4235_v8 }
 0x5bb   :  { %2221 = vmatprep.subr.bf16.mxu1 %v3512_v42 }
 0x5be   :  { %2222 = vmatpush1.bf16.msra.mxu1 %v3510_v43  ;;  %v1940_v43 = vrot.slane %v4067_v4, %v4235_v8 }
 0x5bf   :  { %2494 = vmatprep.subr.bf16.mxu1 %v3515_v44 }
 0x654   :  { %v1888_v55 = vpop.f32.mrb[4].mxu1 }
 0x655   :  { %v1889_v56 = vadd.f32 %v1888_v55, %v1689_v53  ;;  %v1890_v57 = vpop.f32.mrb[5].mxu1 }
 0x656   :  { %v1891_v58 = vadd.f32 %v1890_v57, %v1693_v54  ;;  %v1892_v59 = vpop.f32.mrb[6].mxu1  ;;  %v1946_v54 = vrot.slane %v4065_v3, %v4238_v41 }
 0x657   :  { %v1895_v60 = vrot.slane %v1889_v56, 4  ;;  %v1893_v61 = vpop.f32.mrb[7].mxu1 }
 0x658   :  { %v1901_v62 = vrot.slane %v1891_v58, 4 }
 0x659   :  { %v1896_v63 = vadd.f32 %v1895_v60, %v1889_v56 }
 0x65a   :  { %v1902_v0 = vadd.f32 %v1901_v62, %v1891_v58 }
 0x65b   :  { %v1897_v1 = vrot.slane %v1896_v63, 2 }
 0x65c   :  { %v1903_v2 = vrot.slane %v1902_v0, 2 }
 0x65d   :  { %v1898_v7 = vadd.f32 %v1897_v1, %v1896_v63 }
 0x65e   :  { %v1904_v9 = vadd.f32 %v1903_v2, %v1902_v0 }
 0x65f   :  { %v1899_v11 = vrot.slane %v1898_v7, 1 }
 0x660   :  { %v1905_v12 = vrot.slane %v1904_v9, 1 }
 0x661   :  { %v1900_v13 = vadd.f32 %v1899_v11, %v1898_v7 }
 0x662   :  { %v1906_v14 = vadd.f32 %v1905_v12, %v1904_v9 }
 0x663   :  { %v1907_v16 = vmul.f32 0.125, %v1900_v13 }
 0x664   :  { %v1908_v36 = vmul.f32 0.125, %v1906_v14 }
 0x665   :  { %v1909_v17 = vsub.f32 %v1889_v56, %v1907_v16  ;;  %v1950_v56 = vrot.slane %v4067_v4, %v4238_v41 }
 0x666   :  { %v1910_v18 = vsub.f32 %v1891_v58, %v1908_v36 }
 0x667   :  { %v1911_v19 = vmul.f32 %v1909_v17, %v1909_v17 }
 0x668   :  { %v1912_v20 = vmul.f32 %v1910_v18, %v1910_v18 }
 0x669   :  { %v1913_v21 = vrot.slane %v1911_v19, 4 }
 0x66a   :  { %v1919_v22 = vrot.slane %v1912_v20, 4 }
 0x66b   :  { %v1914_v23 = vadd.f32 %v1913_v21, %v1911_v19 }
 0x66c   :  { %v1920_v24 = vadd.f32 %v1919_v22, %v1912_v20 }
 0x66d   :  { %v1915_v27 = vrot.slane %v1914_v23, 2 }
 0x66e   :  { %v1921_v28 = vrot.slane %v1920_v24, 2 }
 0x66f   :  { %v1916_v29 = vadd.f32 %v1915_v27, %v1914_v23 }
 0x670   :  { %v1922_v30 = vadd.f32 %v1921_v28, %v1920_v24 }
 0x671   :  { %v1917_v31 = vrot.slane %v1916_v29, 1 }
 0x672   :  { %v1923_v32 = vrot.slane %v1922_v30, 1 }
 0x673   :  { %v1918_v33 = vadd.f32 %v1917_v31, %v1916_v29 }
 0x674   :  { %v1924_v34 = vadd.f32 %v1923_v32, %v1922_v30 }
 0x675   :  { %v1925_v37 = vmul.f32 0.125, %v1918_v33 }
 0x676   :  { %v1926_v38 = vmul.f32 0.125, %v1924_v34 }
 0x677   :  { %v1927_v39 = vadd.f32 1e-05, %v1925_v37 }
 0x678   :  { %v1928_v40 = vadd.f32 1e-05, %v1926_v38  ;;  %v3513_v38 = vld [vmem:[#allocation12] ss:$8 sps:$4 sm:$0xff]  }
 0x679   :  { %3621 = vrsqrt.f32 %v1927_v39 }
 0x67a   :  { %3623 = vrsqrt.f32 %v1928_v40  ;;  %v3518_v40 = vld [vmem:[#allocation12 + $0x14] ss:$8 sps:$4 sm:$0xff]  }
 0x683   :  { %v3622_v42 = vpop.eup %3621 }
 0x684   :  { %v3624_v44 = vpop.eup %3623  ;;  %v1931_v53 = vmul.f32 %v3622_v42, %v1909_v17  ;;  %v3521_v42 = vld [vmem:[#allocation12 + $0x24] ss:$8 sps:$4 sm:$0xff]  }
 0x685   :  { %v1932_v55 = vmul.f32 %v3624_v44, %v1910_v18  ;;  %v3524_v44 = vld [vmem:[#allocation12 + $0x34] ss:$8 sps:$4 sm:$0xff]  }
 0x686   :  { %v1941_v57 = vmul.f32 %v1936_v10, %v1931_v53  ;;  %v3516_v10 = vld [vmem:[#allocation12 + $0x10] ss:$8 sps:$4 sm:$0xff]  }
 0x687   :  { %v1942_v58 = vmul.f32 %v1940_v43, %v1932_v55  ;;  %v3519_v43 = vld [vmem:[#allocation12 + $0x20] ss:$8 sps:$4 sm:$0xff]   ;;  %v3522_v53 = vld [vmem:[#allocation12 + $0x30] ss:$8 sps:$4 sm:$0xff]  }
 0x688   :  { %v1951_v59 = vadd.f32 %v1946_v54, %v1941_v57  ;;  %v3527_v54 = vld [vmem:[#allocation12 + $0x44] ss:$8 sps:$4 sm:$0xff]   ;;  %v3525_v55 = vld [vmem:[#allocation12 + $0x40] ss:$8 sps:$4 sm:$0xff]   ;;  %v3528_v57 = vld [vmem:[#allocation12 + $0x50] ss:$8 sps:$4 sm:$0xff]  }
 0x689   :  { %v1952_v60 = vadd.f32 %v1950_v56, %v1942_v58  ;;  %v3530_v56 = vld [vmem:[#allocation12 + $0x54] ss:$8 sps:$4 sm:$0xff]   ;;  %v3533_v58 = vld [vmem:[#allocation12 + $0x64] ss:$8 sps:$4 sm:$0xff]  }
 0x68a   :  { %v1959_v61 = vand.u32 2147483647, %v1951_v59  ;;  %v1953_v27 = vmax.f32 %v1951_v59, 0.0  ;;  %vm1955_vm0 = vcmp.ne.f32.partialorder %v1951_v59, %v1951_v59 }
 0x68b   :  { %v1960_v62 = vand.u32 2147483647, %v1952_v60  ;;  %v1954_v28 = vmax.f32 %v1952_v60, 0.0  ;;  %vm1956_vm1 = vcmp.ne.f32.partialorder %v1952_v60, %v1952_v60 }
 0x68c   :  { %v1961_v63 = vsub.f32 0.0, %v1959_v61  ;;  %v3534_v61 = vld [vmem:[#allocation12 + $0x70] ss:$8 sps:$4 sm:$0xff]  }
 0x68d   :  { %v1962_v0 = vsub.f32 0.0, %v1960_v62  ;;  %v3539_v62 = vld [vmem:[#allocation12 + $0x84] ss:$8 sps:$4 sm:$0xff]  }
 0x68e   :  { %v1963_v1 = vmul.f32 1.442695, %v1961_v63  ;;  %v3537_v63 = vld [vmem:[#allocation12 + $0x80] ss:$8 sps:$4 sm:$0xff]  }
 0x68f   :  { %v1965_v2 = vmul.f32 1.442695, %v1962_v0  ;;  %v3542_v0 = vld [vmem:[#allocation12 + $0x94] ss:$8 sps:$4 sm:$0xff]  }
 0x690   :  { %3625 = vpow2.f32 %v1963_v1  ;;  %v3540_v1 = vld [vmem:[#allocation12 + $0x90] ss:$8 sps:$4 sm:$0xff]  }
 0x691   :  { %3627 = vpow2.f32 %v1965_v2  ;;  %v3545_v2 = vld [vmem:[#allocation12 + $0xa4] ss:$8 sps:$4 sm:$0xff]  }
 0x69a   :  { %v3626_v7 = vpop.eup %3625 }
 0x69b   :  { %v3628_v9 = vpop.eup %3627  ;;  %v1967_v11 = vadd.f32 1.0, %v3626_v7  ;;  %v1970_v13 = vmul.f32 -0.5, %v3626_v7  ;;  %v1973_v17 = vand.u32 2147483647, %v3626_v7 }
 0x69c   :  { %v1976_v12 = vadd.f32 1.0, %v3628_v9  ;;  %v1979_v14 = vmul.f32 -0.5, %v3628_v9  ;;  %v1982_v18 = vand.u32 2147483647, %v3628_v9 }
 0x69d   :  { %3629 = vlog2.f32 %v1967_v11  ;;  %v1971_v16 = vadd.f32 1.0, %v1970_v13  ;;  %vm1974_vm14 = vcmp.lt.f32.partialorder %v1973_v17, 0.0004427343  ;;  %v3546_v11 = vld [vmem:[#allocation12 + $0xb0] ss:$8 sps:$4 sm:$0xff]  }
 0x69e   :  { %3631 = vlog2.f32 %v1976_v12  ;;  %v1980_v36 = vadd.f32 1.0, %v1979_v14  ;;  %vm1983_vm15 = vcmp.lt.f32.partialorder %v1982_v18, 0.0004427343  ;;  %v3551_v12 = vld [vmem:[#allocation12 + $0xc4] ss:$8 sps:$4 sm:$0xff]  }
 0x69f   :  { %v1972_v22 = vmul.f32 %v3626_v7, %v1971_v16  ;;  %v3543_v7 = vld [vmem:[#allocation12 + $0xa0] ss:$8 sps:$4 sm:$0xff]   ;;  %v3554_v14 = vld [vmem:[#allocation12 + $0xd4] ss:$8 sps:$4 sm:$0xff]   ;;  %v3552_v16 = vld [vmem:[#allocation12 + $0xd0] ss:$8 sps:$4 sm:$0xff]  }
 0x6a0   :  { %v1981_v24 = vmul.f32 %v3628_v9, %v1980_v36  ;;  %v3548_v9 = vld [vmem:[#allocation12 + $0xb4] ss:$8 sps:$4 sm:$0xff]   ;;  %v3549_v13 = vld [vmem:[#allocation12 + $0xc0] ss:$8 sps:$4 sm:$0xff]   ;;  %v3557_v17 = vld [vmem:[#allocation12 + $0xe4] ss:$8 sps:$4 sm:$0xff]  }
 0x6a1   :  { %v3555_v36 = vld [vmem:[#allocation12 + $0xe0] ss:$8 sps:$4 sm:$0xff]   ;;  %v3560_v18 = vld [vmem:[#allocation12 + $0xf4] ss:$8 sps:$4 sm:$0xff]  }
 0x6a7   :  { %v3630_v19 = vpop.eup %3629 }
 0x6a8   :  { %v3632_v20 = vpop.eup %3631  ;;  %v1969_v21 = vmul.f32 0.6931472, %v3630_v19  ;;  %v3558_v19 = vld [vmem:[#allocation12 + $0xf0] ss:$8 sps:$4 sm:$0xff]  }
 0x6a9   :  { %v1978_v23 = vmul.f32 0.6931472, %v3632_v20  ;;  %v4249_v20 = vsub.s32 6, %v4100_v46 }
 0x6aa   :  { %v1975_v29 = vsel %vm1974_vm14, %v1972_v22, %v1969_v21 }
 0x6ab   :  { %v1984_v30 = vsel %vm1983_vm15, %v1981_v24, %v1978_v23  ;;  %v1985_v31 = vadd.f32 %v1975_v29, %v1953_v27  ;;  %v2026_v21 = vrot.slane %v4065_v3, %v4249_v20  ;;  %v2030_v22 = vrot.slane %v4067_v4, %v4249_v20 }
 0x6ac   :  { %v1986_v32 = vadd.f32 %v1984_v30, %v1954_v28 }
 0x6ad   :  { %v1987_v33 = vsel %vm1955_vm0, %v1951_v59, %v1985_v31  ;;  %v3531_v59 = vld [vmem:[#allocation12 + $0x60] ss:$8 sps:$4 sm:$0xff]  }
 0x6ae   :  { %v1988_v34 = vsel %vm1956_vm1, %v1952_v60, %v1986_v32  ;;  %v1989_v39 = vpack.c.bf16 %v1987_v33, %v1987_v33  ;;  %v3536_v60 = vld [vmem:[#allocation12 + $0x74] ss:$8 sps:$4 sm:$0xff]  }
 0x6af   :  { %v1990_v37 = vpack.c.bf16 %v1988_v34, %v1988_v34 }
 0x6b1   :  { %2223 = vmatprep.mubr.bf16.mxu1 %v1990_v37 }
 0x6b2   :  { %2224 = vmatmul.mubr.bf16.vlgmr.msra.gmra.mrb[8].mxu1 %v1989_v39 }
 0x6b3   :  { %2495 = vmatpush1.bf16.msra.mxu1 %v3513_v38 }
 0x6b4   :  { %2496 = vmatprep.subr.bf16.mxu1 %v3518_v40 }
 0x6b7   :  { %2497 = vmatpush1.bf16.msra.mxu1 %v3516_v10 }
 0x6b8   :  { %2498 = vmatprep.subr.bf16.mxu1 %v3521_v42 }
 0x6bb   :  { %2499 = vmatpush1.bf16.msra.mxu1 %v3519_v43 }
 0x6bc   :  { %2500 = vmatprep.subr.bf16.mxu1 %v3524_v44 }
 0x6bf   :  { %2501 = vmatpush1.bf16.msra.mxu1 %v3522_v53 }
 0x6c0   :  { %2502 = vmatprep.subr.bf16.mxu1 %v3527_v54 }
 0x6c3   :  { %2503 = vmatpush1.bf16.msra.mxu1 %v3525_v55 }
 0x6c4   :  { %2504 = vmatprep.subr.bf16.mxu1 %v3530_v56 }
 0x6c7   :  { %2505 = vmatpush1.bf16.msra.mxu1 %v3528_v57 }
 0x6c8   :  { %2506 = vmatprep.subr.bf16.mxu1 %v3533_v58 }
 0x6cb   :  { %2507 = vmatpush1.bf16.msra.mxu1 %v3531_v59 }
 0x6cc   :  { %2508 = vmatprep.subr.bf16.mxu1 %v3536_v60 }
 0x6cf   :  { %2509 = vmatpush1.bf16.msra.mxu1 %v3534_v61 }
 0x6d0   :  { %2510 = vmatprep.subr.bf16.mxu1 %v3539_v62 }
 0x6d3   :  { %2511 = vmatpush1.bf16.msra.mxu1 %v3537_v63 }
 0x6d4   :  { %2512 = vmatprep.subr.bf16.mxu1 %v3542_v0 }
 0x6d7   :  { %2513 = vmatpush1.bf16.msra.mxu1 %v3540_v1 }
 0x6d8   :  { %2514 = vmatprep.subr.bf16.mxu1 %v3545_v2 }
 0x6db   :  { %2515 = vmatpush1.bf16.msra.mxu1 %v3543_v7 }
 0x6dc   :  { %2516 = vmatprep.subr.bf16.mxu1 %v3548_v9 }
 0x6df   :  { %2517 = vmatpush1.bf16.msra.mxu1 %v3546_v11 }
 0x6e0   :  { %2518 = vmatprep.subr.bf16.mxu1 %v3551_v12 }
 0x6e3   :  { %2519 = vmatpush1.bf16.msra.mxu1 %v3549_v13 }
 0x6e4   :  { %2520 = vmatprep.subr.bf16.mxu1 %v3554_v14 }
 0x6e7   :  { %2521 = vmatpush1.bf16.msra.mxu1 %v3552_v16 }
 0x6e8   :  { %2522 = vmatprep.subr.bf16.mxu1 %v3557_v17  ;;  %v4256_v17 = vsub.s32 7, %v4100_v46 }
 0x6eb   :  { %2523 = vmatpush1.bf16.msra.mxu1 %v3555_v36 }
 0x6ec   :  { %2524 = vmatprep.subr.bf16.mxu1 %v3560_v18  ;;  %v2273_v18 = vrot.slane %v4065_v3, %v4256_v17 }
 0x6ef   :  { %2525 = vmatpush1.bf16.msra.mxu1 %v3558_v19 }
 0x785   :  { %v2225_v23 = vpop.f32.mrb[8].mxu1 }
 0x786   :  { %v2226_v24 = vadd.f32 %v2225_v23, %v2026_v21  ;;  %v2227_v27 = vpop.f32.mrb[9].mxu1  ;;  %v2277_v21 = vrot.slane %v4067_v4, %v4256_v17  ;;  %v3563_v4 = vld [vmem:[#allocation13 + $0x4] ss:$8 sps:$4 sm:$0xff]  }
 0x787   :  { %v2228_v28 = vadd.f32 %v2227_v27, %v2030_v22  ;;  %v2229_v29 = vpop.f32.mrb[10].mxu1  ;;  %2833 = vmatprep.subr.bf16.mxu1 %v3563_v4 }
 0x788   :  { %v2232_v30 = vrot.slane %v2226_v24, 4  ;;  %v2230_v31 = vpop.f32.mrb[11].mxu1 }
 0x789   :  { %v2238_v32 = vrot.slane %v2228_v28, 4 }
 0x78a   :  { %v2233_v33 = vadd.f32 %v2232_v30, %v2226_v24 }
 0x78b   :  { %v2239_v34 = vadd.f32 %v2238_v32, %v2228_v28 }
 0x78c   :  { %v2234_v37 = vrot.slane %v2233_v33, 2 }
 0x78d   :  { %v2240_v38 = vrot.slane %v2239_v34, 2 }
 0x78e   :  { %v2235_v39 = vadd.f32 %v2234_v37, %v2233_v33  ;;  %v3561_v37 = vld [vmem:[#allocation13] ss:$8 sps:$4 sm:$0xff]  }
 0x78f   :  { %v2241_v40 = vadd.f32 %v2240_v38, %v2239_v34  ;;  %v3566_v38 = vld [vmem:[#allocation13 + $0x14] ss:$8 sps:$4 sm:$0xff]  }
 0x790   :  { %v2236_v10 = vrot.slane %v2235_v39, 1 }
 0x791   :  { %v2242_v42 = vrot.slane %v2241_v40, 1 }
 0x792   :  { %v2237_v43 = vadd.f32 %v2236_v10, %v2235_v39  ;;  %v3564_v39 = vld [vmem:[#allocation13 + $0x10] ss:$8 sps:$4 sm:$0xff]   ;;  %v3567_v10 = vld [vmem:[#allocation13 + $0x20] ss:$8 sps:$4 sm:$0xff]  }
 0x793   :  { %v2243_v44 = vadd.f32 %v2242_v42, %v2241_v40  ;;  %v3569_v40 = vld [vmem:[#allocation13 + $0x24] ss:$8 sps:$4 sm:$0xff]   ;;  %v3572_v42 = vld [vmem:[#allocation13 + $0x34] ss:$8 sps:$4 sm:$0xff]  }
 0x794   :  { %v2244_v53 = vmul.f32 0.125, %v2237_v43  ;;  %v3573_v43 = vld [vmem:[#allocation13 + $0x40] ss:$8 sps:$4 sm:$0xff]  }
 0x795   :  { %v2245_v54 = vmul.f32 0.125, %v2243_v44  ;;  %v3578_v44 = vld [vmem:[#allocation13 + $0x54] ss:$8 sps:$4 sm:$0xff]  }
 0x796   :  { %v2246_v55 = vsub.f32 %v2226_v24, %v2244_v53  ;;  %v2283_v24 = vrot.slane %v4111_v51, %v4214_v15  ;;  %v3576_v53 = vld [vmem:[#allocation13 + $0x50] ss:$8 sps:$4 sm:$0xff]  }
 0x797   :  { %v2247_v56 = vsub.f32 %v2228_v28, %v2245_v54  ;;  %v2287_v28 = vrot.slane %v4113_v52, %v4214_v15  ;;  %v3581_v54 = vld [vmem:[#allocation13 + $0x64] ss:$8 sps:$4 sm:$0xff]  }
 0x798   :  { %v2248_v57 = vmul.f32 %v2246_v55, %v2246_v55 }
 0x799   :  { %v2249_v58 = vmul.f32 %v2247_v56, %v2247_v56 }
 0x79a   :  { %v2250_v59 = vrot.slane %v2248_v57, 4 }
 0x79b   :  { %v2256_v60 = vrot.slane %v2249_v58, 4 }
 0x79c   :  { %v2251_v61 = vadd.f32 %v2250_v59, %v2248_v57  ;;  %v3582_v57 = vld [vmem:[#allocation13 + $0x70] ss:$8 sps:$4 sm:$0xff]   ;;  %v3585_v59 = vld [vmem:[#allocation13 + $0x80] ss:$8 sps:$4 sm:$0xff]  }
 0x79d   :  { %v2257_v62 = vadd.f32 %v2256_v60, %v2249_v58  ;;  %v3587_v58 = vld [vmem:[#allocation13 + $0x84] ss:$8 sps:$4 sm:$0xff]   ;;  %v3590_v60 = vld [vmem:[#allocation13 + $0x94] ss:$8 sps:$4 sm:$0xff]  }
 0x79e   :  { %v2252_v63 = vrot.slane %v2251_v61, 2 }
 0x79f   :  { %v2258_v0 = vrot.slane %v2257_v62, 2 }
 0x7a0   :  { %v2253_v1 = vadd.f32 %v2252_v63, %v2251_v61  ;;  %v3588_v61 = vld [vmem:[#allocation13 + $0x90] ss:$8 sps:$4 sm:$0xff]   ;;  %v3591_v63 = vld [vmem:[#allocation13 + $0xa0] ss:$8 sps:$4 sm:$0xff]  }
 0x7a1   :  { %v2259_v2 = vadd.f32 %v2258_v0, %v2257_v62  ;;  %v3593_v62 = vld [vmem:[#allocation13 + $0xa4] ss:$8 sps:$4 sm:$0xff]   ;;  %v3596_v0 = vld [vmem:[#allocation13 + $0xb4] ss:$8 sps:$4 sm:$0xff]  }
 0x7a2   :  { %v2254_v7 = vrot.slane %v2253_v1, 1 }
 0x7a3   :  { %v2260_v9 = vrot.slane %v2259_v2, 1 }
 0x7a4   :  { %v2255_v11 = vadd.f32 %v2254_v7, %v2253_v1  ;;  %v3594_v1 = vld [vmem:[#allocation13 + $0xb0] ss:$8 sps:$4 sm:$0xff]   ;;  %v3597_v7 = vld [vmem:[#allocation13 + $0xc0] ss:$8 sps:$4 sm:$0xff]  }
 0x7a5   :  { %v2261_v12 = vadd.f32 %v2260_v9, %v2259_v2  ;;  %v3599_v2 = vld [vmem:[#allocation13 + $0xc4] ss:$8 sps:$4 sm:$0xff]   ;;  %v3602_v9 = vld [vmem:[#allocation13 + $0xd4] ss:$8 sps:$4 sm:$0xff]  }
 0x7a6   :  { %v2262_v13 = vmul.f32 0.125, %v2255_v11  ;;  %v3600_v11 = vld [vmem:[#allocation13 + $0xd0] ss:$8 sps:$4 sm:$0xff]  }
 0x7a7   :  { %v2263_v14 = vmul.f32 0.125, %v2261_v12  ;;  %v3605_v12 = vld [vmem:[#allocation13 + $0xe4] ss:$8 sps:$4 sm:$0xff]  }
 0x7a8   :  { %v2264_v16 = vadd.f32 1e-05, %v2262_v13  ;;  %v3603_v13 = vld [vmem:[#allocation13 + $0xe0] ss:$8 sps:$4 sm:$0xff]  }
 0x7a9   :  { %v2265_v36 = vadd.f32 1e-05, %v2263_v14  ;;  %v3608_v14 = vld [vmem:[#allocation13 + $0xf4] ss:$8 sps:$4 sm:$0xff]  }
 0x7aa   :  { %3633 = vrsqrt.f32 %v2264_v16  ;;  %v3606_v16 = vld [vmem:[#allocation13 + $0xf0] ss:$8 sps:$4 sm:$0xff]  }
 0x7ab   :  { %3635 = vrsqrt.f32 %v2265_v36  ;;  %v2329_v36 = vrot.slane %v4111_v51, %v4235_v8 }
 0x7b4   :  { %v3634_v19 = vpop.eup %3633 }
 0x7b5   :  { %v3636_v22 = vpop.eup %3635  ;;  %v2268_v23 = vmul.f32 %v3634_v19, %v2246_v55  ;;  %v3579_v55 = vld [vmem:[#allocation13 + $0x60] ss:$8 sps:$4 sm:$0xff]  }
 0x7b6   :  { %v2269_v27 = vmul.f32 %v3636_v22, %v2247_v56  ;;  %v3584_v56 = vld [vmem:[#allocation13 + $0x74] ss:$8 sps:$4 sm:$0xff]  }
 0x7b7   :  { %v2278_v29 = vmul.f32 %v2273_v18, %v2268_v23  ;;  %v2333_v18 = vrot.slane %v4113_v52, %v4235_v8 }
 0x7b8   :  { %v2279_v30 = vmul.f32 %v2277_v21, %v2269_v27 }
 0x7b9   :  { %v2288_v46 = vadd.f32 %v2283_v24, %v2278_v29 }
 0x7ba   :  { %v2289_v31 = vadd.f32 %v2287_v28, %v2279_v30 }
 0x7bb   :  { %v2290_v32 = vmul.f32 %v2288_v46, %v4133_v25  ;;  %v3570_v25 = vld [vmem:[#allocation13 + $0x30] ss:$8 sps:$4 sm:$0xff]  }
 0x7bc   :  { %v2291_v3 = vmul.f32 %v2289_v31, %v4135_v26  ;;  %v3575_v26 = vld [vmem:[#allocation13 + $0x44] ss:$8 sps:$4 sm:$0xff]  }
 0x7bd   :  { %v2292_v34 = vpack.c.bf16 %v2290_v32, %v2290_v32 }
 0x7be   :  { %v2293_v33 = vpack.c.bf16 %v2291_v3, %v2291_v3 }
 0x7c0   :  { %2526 = vmatprep.mubr.bf16.mxu1 %v2293_v33 }
 0x7c1   :  { %2527 = vmatmul.mubr.bf16.vlgmr.msra.gmra.mrb[12].mxu1 %v2292_v34 }
 0x7c2   :  { %2834 = vmatpush1.bf16.msra.mxu1 %v3561_v37 }
 0x7c3   :  { %2835 = vmatprep.subr.bf16.mxu1 %v3566_v38 }
 0x7c6   :  { %2836 = vmatpush1.bf16.msra.mxu1 %v3564_v39 }
 0x7c7   :  { %2837 = vmatprep.subr.bf16.mxu1 %v3569_v40 }
 0x7ca   :  { %2838 = vmatpush1.bf16.msra.mxu1 %v3567_v10 }
 0x7cb   :  { %2839 = vmatprep.subr.bf16.mxu1 %v3572_v42 }
 0x7ce   :  { %2840 = vmatpush1.bf16.msra.mxu1 %v3570_v25 }
 0x7cf   :  { %2841 = vmatprep.subr.bf16.mxu1 %v3575_v26 }
 0x7d2   :  { %2842 = vmatpush1.bf16.msra.mxu1 %v3573_v43 }
 0x7d3   :  { %2843 = vmatprep.subr.bf16.mxu1 %v3578_v44 }
 0x7d6   :  { %2844 = vmatpush1.bf16.msra.mxu1 %v3576_v53 }
 0x7d7   :  { %2845 = vmatprep.subr.bf16.mxu1 %v3581_v54 }
 0x7da   :  { %2846 = vmatpush1.bf16.msra.mxu1 %v3579_v55 }
 0x7db   :  { %2847 = vmatprep.subr.bf16.mxu1 %v3584_v56 }
 0x7de   :  { %2848 = vmatpush1.bf16.msra.mxu1 %v3582_v57 }
 0x7df   :  { %2849 = vmatprep.subr.bf16.mxu1 %v3587_v58 }
 0x7e2   :  { %2850 = vmatpush1.bf16.msra.mxu1 %v3585_v59 }
 0x7e3   :  { %2851 = vmatprep.subr.bf16.mxu1 %v3590_v60 }
 0x7e6   :  { %2852 = vmatpush1.bf16.msra.mxu1 %v3588_v61 }
 0x7e7   :  { %2853 = vmatprep.subr.bf16.mxu1 %v3593_v62 }
 0x7ea   :  { %2854 = vmatpush1.bf16.msra.mxu1 %v3591_v63 }
 0x7eb   :  { %2855 = vmatprep.subr.bf16.mxu1 %v3596_v0 }
 0x7ee   :  { %2856 = vmatpush1.bf16.msra.mxu1 %v3594_v1 }
 0x7ef   :  { %2857 = vmatprep.subr.bf16.mxu1 %v3599_v2  ;;  %v2578_v2 = vrot.slane %v4111_v51, %v4238_v41 }
 0x7f2   :  { %2858 = vmatpush1.bf16.msra.mxu1 %v3597_v7 }
 0x7f3   :  { %2859 = vmatprep.subr.bf16.mxu1 %v3602_v9  ;;  %v2582_v9 = vrot.slane %v4113_v52, %v4238_v41 }
 0x7f6   :  { %2860 = vmatpush1.bf16.msra.mxu1 %v3600_v11 }
 0x7f7   :  { %2861 = vmatprep.subr.bf16.mxu1 %v3605_v12 }
 0x7fa   :  { %2862 = vmatpush1.bf16.msra.mxu1 %v3603_v13  ;;  %v2588_v13 = vrot.slane %v4111_v51, %v4249_v20 }
 0x7fb   :  { %2863 = vmatprep.subr.bf16.mxu1 %v3608_v14 }
 0x7fe   :  { %2864 = vmatpush1.bf16.msra.mxu1 %v3606_v16  ;;  %v2592_v16 = vrot.slane %v4113_v52, %v4249_v20 }
 0x894   :  { %v2528_v19 = vpop.f32.mrb[12].mxu1 }
 0x895   :  { %v2529_v21 = vadd.f32 %v2528_v19, %v2329_v36  ;;  %v2530_v22 = vpop.f32.mrb[13].mxu1 }
 0x896   :  { %v2531_v23 = vadd.f32 %v2530_v22, %v2333_v18  ;;  %v2532_v24 = vpop.f32.mrb[14].mxu1 }
 0x897   :  { %v2535_v27 = vmul.f32 %v2529_v21, %v4098_v45  ;;  %v2533_v28 = vpop.f32.mrb[15].mxu1 }
 0x898   :  { %v2536_v29 = vmul.f32 %v2531_v23, %v4102_v47 }
 0x899   :  { %v2537_v30 = vrot.slane %v2535_v27, 4 }
 0x89a   :  { %v2543_v46 = vrot.slane %v2536_v29, 4 }
 0x89b   :  { %v2538_v31 = vadd.f32 %v2537_v30, %v2535_v27 }
 0x89c   :  { %v2544_v32 = vadd.f32 %v2543_v46, %v2536_v29 }
 0x89d   :  { %v2539_v3 = vrot.slane %v2538_v31, 2 }
 0x89e   :  { %v2545_v33 = vrot.slane %v2544_v32, 2 }
 0x89f   :  { %v2540_v34 = vadd.f32 %v2539_v3, %v2538_v31 }
 0x8a0   :  { %v2546_v4 = vadd.f32 %v2545_v33, %v2544_v32 }
 0x8a1   :  { %v2541_v37 = vrot.slane %v2540_v34, 1 }
 0x8a2   :  { %v2547_v8 = vrot.slane %v2546_v4, 1 }
 0x8a3   :  { %v2542_v38 = vadd.f32 %v2541_v37, %v2540_v34 }
 0x8a4   :  { %v2548_v39 = vadd.f32 %v2547_v8, %v2546_v4 }
 0x8a5   :  { %v2549_v40 = vmul.f32 0.125, %v2542_v38 }
 0x8a6   :  { %v2550_v10 = vmul.f32 0.125, %v2548_v39 }
 0x8a7   :  { %v2551_v42 = vsub.f32 %v2535_v27, %v2549_v40 }
 0x8a8   :  { %v2552_v25 = vsub.f32 %v2536_v29, %v2550_v10 }
 0x8a9   :  { %v2553_v45 = vmul.f32 %v2551_v42, %v2551_v42 }
 0x8aa   :  { %v2554_v26 = vmul.f32 %v2552_v25, %v2552_v25 }
 0x8ab   :  { %v2555_v43 = vrot.slane %v2553_v45, 4 }
 0x8ac   :  { %v2561_v47 = vrot.slane %v2554_v26, 4 }
 0x8ad   :  { %v2556_v44 = vadd.f32 %v2555_v43, %v2553_v45 }
 0x8ae   :  { %v2562_v53 = vadd.f32 %v2561_v47, %v2554_v26 }
 0x8af   :  { %v2557_v54 = vrot.slane %v2556_v44, 2 }
 0x8b0   :  { %v2563_v55 = vrot.slane %v2562_v53, 2 }
 0x8b1   :  { %v2558_v56 = vadd.f32 %v2557_v54, %v2556_v44 }
 0x8b2   :  { %v2564_v57 = vadd.f32 %v2563_v55, %v2562_v53 }
 0x8b3   :  { %v2559_v58 = vrot.slane %v2558_v56, 1 }
 0x8b4   :  { %v2565_v59 = vrot.slane %v2564_v57, 1 }
 0x8b5   :  { %v2560_v60 = vadd.f32 %v2559_v58, %v2558_v56  ;;  %v2986_v56 = vld [vmem:[%s4416_s10 + $0x80] sm:$0xff] }
 0x8b6   :  { %v2566_v61 = vadd.f32 %v2565_v59, %v2564_v57  ;;  %v2987_v57 = vld [vmem:[%s4416_s10 + $0x88] sm:$0xff]  ;;  %v2970_v58 = vld [vmem:[%s4416_s10] sm:$0xff] }
 0x8b7   :  { %v2567_v62 = vmul.f32 0.125, %v2560_v60  ;;  %v3305_v59 = vpack.c.bf16 %v2987_v57, %v2986_v56  ;;  %v2971_v60 = vld [vmem:[%s4416_s10 + $0x8] sm:$0xff] }
 0x8b8   :  { %v2568_v63 = vmul.f32 0.125, %v2566_v61  ;;  %v2988_v61 = vld [vmem:[%s4416_s10 + $0x90] sm:$0xff] }
 0x8b9   :  { %v2569_v0 = vadd.f32 1e-05, %v2567_v62  ;;  %v2989_v62 = vld [vmem:[%s4416_s10 + $0x98] sm:$0xff]  ;;  %3306 = vmatprep.subr.bf16.mxu1 %v3305_v59 }
 0x8ba   :  { %v2570_v1 = vadd.f32 1e-05, %v2568_v63  ;;  %v3307_v63 = vpack.c.bf16 %v2971_v60, %v2970_v58 }
 0x8bb   :  { %3637 = vrsqrt.f32 %v2569_v0  ;;  %v3309_v0 = vpack.c.bf16 %v2989_v62, %v2988_v61 }
 0x8bc   :  { %3639 = vrsqrt.f32 %v2570_v1  ;;  %v2972_v1 = vld [vmem:[%s4416_s10 + $0x10] sm:$0xff] }
 0x8c5   :  { %v3638_v7 = vpop.eup %3637 }
 0x8c6   :  { %v3640_v11 = vpop.eup %3639  ;;  %v2573_v12 = vmul.f32 %v3638_v7, %v2551_v42  ;;  %v2990_v7 = vld [vmem:[%s4416_s10 + $0xa0] sm:$0xff] }
 0x8c7   :  { %v2574_v14 = vmul.f32 %v3640_v11, %v2552_v25 }
 0x8c8   :  { %v2583_v36 = vmul.f32 %v2578_v2, %v2573_v12  ;;  %v2973_v2 = vld [vmem:[%s4416_s10 + $0x18] sm:$0xff] }
 0x8c9   :  { %v2584_v18 = vmul.f32 %v2582_v9, %v2574_v14  ;;  %v2991_v9 = vld [vmem:[%s4416_s10 + $0xa8] sm:$0xff]  ;;  %v3311_v11 = vpack.c.bf16 %v2973_v2, %v2972_v1 }
 0x8ca   :  { %v2593_v19 = vadd.f32 %v2588_v13, %v2583_v36  ;;  %v3313_v12 = vpack.c.bf16 %v2991_v9, %v2990_v7  ;;  %v2974_v13 = vld [vmem:[%s4416_s10 + $0x20] sm:$0xff]  ;;  %v2975_v14 = vld [vmem:[%s4416_s10 + $0x28] sm:$0xff]  ;;  %v2993_v36 = vld [vmem:[%s4416_s10 + $0xb8] sm:$0xff] }
 0x8cb   :  { %v2594_v21 = vadd.f32 %v2592_v16, %v2584_v18  ;;  %v2992_v16 = vld [vmem:[%s4416_s10 + $0xb0] sm:$0xff]  ;;  %v3315_v18 = vpack.c.bf16 %v2975_v14, %v2974_v13 }
 0x8cc   :  { %v2601_v22 = vand.u32 2147483647, %v2593_v19  ;;  %v2595_v42 = vmax.f32 %v2593_v19, 0.0  ;;  %vm2597_vm4 = vcmp.ne.f32.partialorder %v2593_v19, %v2593_v19 }
 0x8cd   :  { %v2602_v23 = vand.u32 2147483647, %v2594_v21  ;;  %v2596_v25 = vmax.f32 %v2594_v21, 0.0  ;;  %vm2598_vm5 = vcmp.ne.f32.partialorder %v2594_v21, %v2594_v21 }
 0x8ce   :  { %v2603_v24 = vsub.f32 0.0, %v2601_v22  ;;  %v2977_v22 = vld [vmem:[%s4416_s10 + $0x38] sm:$0xff] }
 0x8cf   :  { %v2604_v27 = vsub.f32 0.0, %v2602_v23  ;;  %v2994_v23 = vld [vmem:[%s4416_s10 + $0xc0] sm:$0xff] }
 0x8d0   :  { %v2605_v28 = vmul.f32 1.442695, %v2603_v24  ;;  %v2995_v24 = vld [vmem:[%s4416_s10 + $0xc8] sm:$0xff] }
 0x8d1   :  { %v2607_v29 = vmul.f32 1.442695, %v2604_v27 }
 0x8d2   :  { %3641 = vpow2.f32 %v2605_v28  ;;  %v3321_v28 = vpack.c.bf16 %v2995_v24, %v2994_v23 }
 0x8d3   :  { %3643 = vpow2.f32 %v2607_v29  ;;  %v2978_v29 = vld [vmem:[%s4416_s10 + $0x40] sm:$0xff] }
 0x8dc   :  { %v3642_v41 = vpop.eup %3641 }
 0x8dd   :  { %v3644_v30 = vpop.eup %3643  ;;  %v2609_v46 = vadd.f32 1.0, %v3642_v41  ;;  %v2612_v32 = vmul.f32 -0.5, %v3642_v41  ;;  %v2615_v34 = vand.u32 2147483647, %v3642_v41 }
 0x8de   :  { %v2618_v31 = vadd.f32 1.0, %v3644_v30  ;;  %v2621_v20 = vmul.f32 -0.5, %v3644_v30  ;;  %v2624_v4 = vand.u32 2147483647, %v3644_v30 }
 0x8df   :  { %3645 = vlog2.f32 %v2609_v46  ;;  %v2613_v3 = vadd.f32 1.0, %v2612_v32  ;;  %vm2616_vm2 = vcmp.lt.f32.partialorder %v2615_v34, 0.0004427343  ;;  %v2997_v46 = vld [vmem:[%s4416_s10 + $0xd8] sm:$0xff]  ;;  %v2999_v34 = vld [vmem:[%s4416_s10 + $0xe8] sm:$0xff] }
 0x8e0   :  { %3647 = vlog2.f32 %v2618_v31  ;;  %v2622_v33 = vadd.f32 1.0, %v2621_v20  ;;  %vm2625_vm3 = vcmp.lt.f32.partialorder %v2624_v4, 0.0004427343  ;;  %v2980_v20 = vld [vmem:[%s4416_s10 + $0x50] sm:$0xff] }
 0x8e1   :  { %v2614_v39 = vmul.f32 %v3642_v41, %v2613_v3  ;;  %v2979_v41 = vld [vmem:[%s4416_s10 + $0x48] sm:$0xff]  ;;  %v2981_v3 = vld [vmem:[%s4416_s10 + $0x58] sm:$0xff] }
 0x8e2   :  { %v2623_v10 = vmul.f32 %v3644_v30, %v2622_v33  ;;  %v2996_v30 = vld [vmem:[%s4416_s10 + $0xd0] sm:$0xff]  ;;  %v3323_v31 = vpack.c.bf16 %v2979_v41, %v2978_v29  ;;  %v2998_v33 = vld [vmem:[%s4416_s10 + $0xe0] sm:$0xff]  ;;  %v3327_v4 = vpack.c.bf16 %v2981_v3, %v2980_v20  ;;  %v2917_v20 = vrot.slane %v4069_v5, %v4214_v15 }
 0x8e3   :  { %v3325_v32 = vpack.c.bf16 %v2997_v46, %v2996_v30 }
 0x8e9   :  { %v3646_v37 = vpop.eup %3645 }
 0x8ea   :  { %v3648_v8 = vpop.eup %3647  ;;  %v2611_v38 = vmul.f32 0.6931472, %v3646_v37  ;;  %v3329_v37 = vpack.c.bf16 %v2999_v34, %v2998_v33  ;;  %v2921_v33 = vrot.slane %v4071_v6, %v4214_v15 }
 0x8eb   :  { %v2620_v40 = vmul.f32 0.6931472, %v3648_v8  ;;  %v2982_v8 = vld [vmem:[%s4416_s10 + $0x60] sm:$0xff] }
 0x8ec   :  { %v2617_v45 = vsel %vm2616_vm2, %v2614_v39, %v2611_v38  ;;  %v2983_v38 = vld [vmem:[%s4416_s10 + $0x68] sm:$0xff]  ;;  %v3000_v39 = vld [vmem:[%s4416_s10 + $0xf0] sm:$0xff] }
 0x8ed   :  { %v2626_v26 = vsel %vm2625_vm3, %v2623_v10, %v2620_v40  ;;  %v2627_v43 = vadd.f32 %v2617_v45, %v2595_v42  ;;  %v3001_v40 = vld [vmem:[%s4416_s10 + $0xf8] sm:$0xff]  ;;  %v3331_v10 = vpack.c.bf16 %v2983_v38, %v2982_v8  ;;  %v2931_v38 = vrot.slane %v4071_v6, %v4109_v50 }
 0x8ee   :  { %v2628_v47 = vadd.f32 %v2626_v26, %v2596_v25  ;;  %v3333_v42 = vpack.c.bf16 %v3001_v40, %v3000_v39  ;;  %v2984_v25 = vld [vmem:[%s4416_s10 + $0x70] sm:$0xff]  ;;  %v2985_v45 = vld [vmem:[%s4416_s10 + $0x78] sm:$0xff] }
 0x8ef   :  { %v2629_v44 = vsel %vm2597_vm4, %v2593_v19, %v2627_v43  ;;  %v3317_v19 = vpack.c.bf16 %v2993_v36, %v2992_v16  ;;  %v3335_v26 = vpack.c.bf16 %v2985_v45, %v2984_v25  ;;  %v2668_v43 = vrot.slane %v4111_v51, %v4256_v17 }
 0x8f0   :  { %v2630_v53 = vsel %vm2598_vm5, %v2594_v21, %v2628_v47  ;;  %v2631_v55 = vpack.c.bf16 %v2629_v44, %v2629_v44  ;;  %v2976_v21 = vld [vmem:[%s4416_s10 + $0x30] sm:$0xff]  ;;  %v2672_v47 = vrot.slane %v4113_v52, %v4256_v17  ;;  %s3871_s10 = smov [#allocation16]  }
 0x8f1   :  { %v2632_v54 = vpack.c.bf16 %v2630_v53, %v2630_v53  ;;  %v3319_v27 = vpack.c.bf16 %v2977_v22, %v2976_v21  ;;  %s3084_s26 = sshll.u32 %s3871_s10, 4  ;;  %s3085_s26 = int_to_ptr.vmem [resolvable:$true] %s3084_s26 }
 0x8f2   :  { %s3815_s2 = scalar_lea.vmem %s3085_s26, 128  ;;  %p3820_p1 = scmp.lt.s32.totalorder %s3085_s26, %s3085_s26 }
 0x8f3   :  { %2865 = vmatprep.mubr.bf16.mxu1 %v2632_v54  ;;  %p3816_p0 = scmp.ne.s32.totalorder %s3085_s26, %s3815_s2  ;;  %p3821_p2 = scmp.lt.s32.totalorder %s3815_s2, %s3815_s2 }
 0x8f4   :  { %2866 = vmatmul.mubr.bf16.vlgmr.msra.gmra.mrb[16].mxu1 %v2631_v55 }
 0x8f5   :  { %3308 = vmatpush3.bf16.msra.mxu1 %v3307_v63  ;;  %p3822_p3 = por %p3821_p2, %p3820_p1 }
 0x8f6   :  { %3310 = vmatprep.subr.bf16.mxu1 %v3309_v0 }
 0x8f7   :  { %p3823_p4 = pnand %p3822_p3, %p3816_p0 }
 0x8f9   :  { %3312 = vmatpush3.bf16.msra.mxu1 %v3311_v11 }
 0x8fa   :  { %3314 = vmatprep.subr.bf16.mxu1 %v3313_v12 }
 0x8fd   :  { %3316 = vmatpush3.bf16.msra.mxu1 %v3315_v18 }
 0x8fe   :  { %3318 = vmatprep.subr.bf16.mxu1 %v3317_v19 }
 0x901   :  { %3320 = vmatpush3.bf16.msra.mxu1 %v3319_v27 }
 0x902   :  { %3322 = vmatprep.subr.bf16.mxu1 %v3321_v28 }
 0x905   :  { %3324 = vmatpush3.bf16.msra.mxu1 %v3323_v31 }
 0x906   :  { %3326 = vmatprep.subr.bf16.mxu1 %v3325_v32 }
 0x909   :  { %3328 = vmatpush3.bf16.msra.mxu1 %v3327_v4 }
 0x90a   :  { %3330 = vmatprep.subr.bf16.mxu1 %v3329_v37  ;;  %v2927_v37 = vrot.slane %v4069_v5, %v4109_v50 }
 0x90d   :  { %3332 = vmatpush3.bf16.msra.mxu1 %v3331_v10 }
 0x90e   :  { %3334 = vmatprep.subr.bf16.mxu1 %v3333_v42 }
 0x911   :  { %3336 = vmatpush3.bf16.msra.mxu1 %v3335_v26 }
 0x9c7   :  { %v2867_v44 = vpop.f32.mrb[16].mxu1 }
 0x9c8   :  { %v2868_v53 = vadd.f32 %v2867_v44, %v2668_v43  ;;  %v2869_v54 = vpop.f32.mrb[17].mxu1 }
 0x9c9   :  { %v2870_v55 = vadd.f32 %v2869_v54, %v2672_v47  ;;  %v2871_v56 = vpop.f32.mrb[18].mxu1 }
 0x9ca   :  { %v2874_v57 = vmul.f32 %v2868_v53, %v4104_v48  ;;  %v2872_v58 = vpop.f32.mrb[19].mxu1 }
 0x9cb   :  { %v2875_v59 = vmul.f32 %v2870_v55, %v4106_v49 }
 0x9cc   :  { %v2876_v60 = vrot.slane %v2874_v57, 4 }
 0x9cd   :  { %v2882_v61 = vrot.slane %v2875_v59, 4 }
 0x9ce   :  { %v2877_v62 = vadd.f32 %v2876_v60, %v2874_v57 }
 0x9cf   :  { %v2883_v63 = vadd.f32 %v2882_v61, %v2875_v59 }
 0x9d0   :  { %v2878_v0 = vrot.slane %v2877_v62, 2 }
 0x9d1   :  { %v2884_v1 = vrot.slane %v2883_v63, 2 }
 0x9d2   :  { %v2879_v51 = vadd.f32 %v2878_v0, %v2877_v62 }
 0x9d3   :  { %v2885_v2 = vadd.f32 %v2884_v1, %v2883_v63 }
 0x9d4   :  { %v2880_v7 = vrot.slane %v2879_v51, 1 }
 0x9d5   :  { %v2886_v52 = vrot.slane %v2885_v2, 1 }
 0x9d6   :  { %v2881_v17 = vadd.f32 %v2880_v7, %v2879_v51 }
 0x9d7   :  { %v2887_v9 = vadd.f32 %v2886_v52, %v2885_v2 }
 0x9d8   :  { %v2888_v11 = vmul.f32 0.125, %v2881_v17 }
 0x9d9   :  { %v2889_v12 = vmul.f32 0.125, %v2887_v9 }
 0x9da   :  { %v2890_v13 = vsub.f32 %v2874_v57, %v2888_v11 }
 0x9db   :  { %v2891_v14 = vsub.f32 %v2875_v59, %v2889_v12 }
 0x9dc   :  { %v2892_v48 = vmul.f32 %v2890_v13, %v2890_v13 }
 0x9dd   :  { %v2893_v16 = vmul.f32 %v2891_v14, %v2891_v14 }
 0x9de   :  { %v2894_v36 = vrot.slane %v2892_v48, 4 }
 0x9df   :  { %v2900_v49 = vrot.slane %v2893_v16, 4 }
 0x9e0   :  { %v2895_v18 = vadd.f32 %v2894_v36, %v2892_v48 }
 0x9e1   :  { %v2901_v19 = vadd.f32 %v2900_v49, %v2893_v16 }
 0x9e2   :  { %v2896_v21 = vrot.slane %v2895_v18, 2 }
 0x9e3   :  { %v2902_v22 = vrot.slane %v2901_v19, 2 }
 0x9e4   :  { %v2897_v23 = vadd.f32 %v2896_v21, %v2895_v18 }
 0x9e5   :  { %v2903_v24 = vadd.f32 %v2902_v22, %v2901_v19 }
 0x9e6   :  { %v2898_v27 = vrot.slane %v2897_v23, 1 }
 0x9e7   :  { %v2904_v28 = vrot.slane %v2903_v24, 1 }
 0x9e8   :  { %v2899_v29 = vadd.f32 %v2898_v27, %v2897_v23 }
 0x9e9   :  { %v2905_v41 = vadd.f32 %v2904_v28, %v2903_v24 }
 0x9ea   :  { %v2906_v30 = vmul.f32 0.125, %v2899_v29 }
 0x9eb   :  { %v2907_v46 = vmul.f32 0.125, %v2905_v41 }
 0x9ec   :  { %v2908_v31 = vadd.f32 1e-05, %v2906_v30 }
 0x9ed   :  { %v2909_v32 = vadd.f32 1e-05, %v2907_v46 }
 0x9ee   :  { %3649 = vrsqrt.f32 %v2908_v31 }
 0x9ef   :  { %3651 = vrsqrt.f32 %v2909_v32 }
 0x9f8   :  { %v3650_v3 = vpop.eup %3649 }
 0x9f9   :  { %v3652_v34 = vpop.eup %3651  ;;  %v2912_v4 = vmul.f32 %v3650_v3, %v2890_v13 }
 0x9fa   :  { %v2913_v8 = vmul.f32 %v3652_v34, %v2891_v14  ;;  %v3005_v14 = vrot.slane %v4069_v5, %v4120_v35 }
 0x9fb   :  { %v2922_v39 = vmul.f32 %v2917_v20, %v2912_v4 }
 0x9fc   :  { %v2923_v40 = vmul.f32 %v2921_v33, %v2913_v8 }
 0x9fd   :  { %v2932_v10 = vadd.f32 %v2927_v37, %v2922_v39 }
 0x9fe   :  { %v2933_v42 = vadd.f32 %v2931_v38, %v2923_v40 }
 0x9ff   :  { %v2940_v25 = vand.u32 2147483647, %v2932_v10  ;;  %v2934_v51 = vmax.f32 %v2932_v10, 0.0  ;;  %vm2936_vm9 = vcmp.ne.f32.partialorder %v2932_v10, %v2932_v10 }
 0xa00   :  { %v2941_v45 = vand.u32 2147483647, %v2933_v42  ;;  %v2935_v2 = vmax.f32 %v2933_v42, 0.0  ;;  %vm2937_vm8 = vcmp.ne.f32.partialorder %v2933_v42, %v2933_v42 }
 0xa01   :  { %v2942_v26 = vsub.f32 0.0, %v2940_v25 }
 0xa02   :  { %v2943_v43 = vsub.f32 0.0, %v2941_v45 }
 0xa03   :  { %v2944_v47 = vmul.f32 1.442695, %v2942_v26 }
 0xa04   :  { %v2946_v44 = vmul.f32 1.442695, %v2943_v43 }
 0xa05   :  { %3653 = vpow2.f32 %v2944_v47 }
 0xa06   :  { %3655 = vpow2.f32 %v2946_v44 }
 0xa0f   :  { %v3654_v15 = vpop.eup %3653 }
 0xa10   :  { %v3656_v53 = vpop.eup %3655  ;;  %v2948_v54 = vadd.f32 1.0, %v3654_v15  ;;  %v2951_v56 = vmul.f32 -0.5, %v3654_v15  ;;  %v2954_v58 = vand.u32 2147483647, %v3654_v15 }
 0xa11   :  { %v2957_v55 = vadd.f32 1.0, %v3656_v53  ;;  %v2960_v6 = vmul.f32 -0.5, %v3656_v53  ;;  %v2963_v59 = vand.u32 2147483647, %v3656_v53 }
 0xa12   :  { %3657 = vlog2.f32 %v2948_v54  ;;  %v2952_v50 = vadd.f32 1.0, %v2951_v56  ;;  %vm2955_vm6 = vcmp.lt.f32.partialorder %v2954_v58, 0.0004427343 }
 0xa13   :  { %3659 = vlog2.f32 %v2957_v55  ;;  %v2961_v57 = vadd.f32 1.0, %v2960_v6  ;;  %vm2964_vm7 = vcmp.lt.f32.partialorder %v2963_v59, 0.0004427343 }
 0xa14   :  { %v2953_v63 = vmul.f32 %v3654_v15, %v2952_v50 }
 0xa15   :  { %v2962_v1 = vmul.f32 %v3656_v53, %v2961_v57 }
 0xa1c   :  { %v3658_v60 = vpop.eup %3657 }
 0xa1d   :  { %v3660_v61 = vpop.eup %3659  ;;  %v2950_v62 = vmul.f32 0.6931472, %v3658_v60 }
 0xa1e   :  { %v2959_v0 = vmul.f32 0.6931472, %v3660_v61 }
 0xa1f   :  { %v2956_v7 = vsel %vm2955_vm6, %v2953_v63, %v2950_v62 }
 0xa20   :  { %v2965_v52 = vsel %vm2964_vm7, %v2962_v1, %v2959_v0  ;;  %v2966_v17 = vadd.f32 %v2956_v7, %v2934_v51 }
 0xa21   :  { %v2967_v9 = vadd.f32 %v2965_v52, %v2935_v2 }
 0xa22   :  { %v2968_v12 = vsel %vm2936_vm9, %v2932_v10, %v2966_v17 }
 0xa23   :  { %v2969_v11 = vsel %vm2937_vm8, %v2933_v42, %v2967_v9 }
 0xa24   :  { %3070 = vmatprep.mubr.f32.mxu1 %v2969_v11 }
 0xa25   :  { %3071 = vmatmul.mubr.f32.vlgmr.msra.gmra.mrb[20].mxu1 %v2968_v12 }
 0xaf8   :  { %v3276_v13 = vpop.f32.mrb[20].mxu1 }
 0xaf9   :  { %v3277_v48 = vpop.f32.mrb[21].mxu1 }
 0xafa   :  { %v3278_v16 = vadd.f32 %v3277_v48, %v3276_v13 }
 0xafc   :  { %v3073_v36 = vadd.f32 %v3278_v16, %v3005_v14 }
 0xafe   :  { %3077 = vst.msk [vmem:[#allocation16] sm:$0xff] %vm3076_vm10, %v3073_v36 }
 0xaff   :  { %3826 = shalt.err (!%p3823_p4)
}
 0xb00   :  { %s3827_s13 = scalar_lea.hbm %s4418_s12, 128 }
 0xb01   :  { %p3828_p5 = scmp.ne.s32.totalorder %s4418_s12, %s3827_s13  ;;  %p3831_p6 = scmp.lt.u32.totalorder %s3827_s13, %s4418_s12 }
 0xb03   :  { %p3833_p7 = pnand %p3831_p6, %p3828_p5 }
 0xb05   :  { %3836 = shalt.err (!%p3833_p7)
}
 0xb06   :  { %3087 = dma.vmem_to_hbm [thread:$0]  %s3085_s26, 128, %s4418_s12, [#allocation6]  }
 0xb07   :  { %3847 = dma.done.wait [#allocation6], 128  }
 0xb08   :  { %3848 = vsyncadd [#allocation6], 4294967168 }
 0xb09   :  { %3091 = vsyncpa [#allocation5], 1 }
 0xb0a   :  { %3092 = vsyncpa [#allocation8], 1 }
 0xb0b   :  { %3093 = vsyncpa [#allocation11], 1 }
 0xb0c   :  { %3094 = vsyncpa [#allocation14], 1 }
 0xb0d   :  { %3095 = vsyncpa [#allocation6], 1 }
 0xb0e   :  { %3096 = vsyncmov [#allocation3] }
 0xb11   :  { %s3097_s9 = vpop.sfrf %3096 }
 0xb12   :  { %p3243_p8 = scmp.ne.s32.totalorder %s3097_s9, 0 }
 0xb14   :  { %3101 = shalt.err (%p3243_p8)  }

</bundles_post_ra>
